<compile_context>
chip_gen: v7x
topology: tpu7x:2x2x1
jax: 0.10.0
libtpu: 0.0.40
codegen_flags: <defaults>
</compile_context>

<pallas_src>
import functools

import jax
import jax.numpy as jnp
from jax.experimental import pallas as pl
from jax.experimental.pallas import tpu as pltpu

HIDP = 128  # hidden width padded to a full lane vector (logical hidden = 32)


def _softplus(x):
    # numerically stable softplus in f32: max(x,0) + log(1 + exp(-|x|))
    return jnp.maximum(x, 0.0) + jnp.log(1.0 + jnp.exp(-jnp.abs(x)))


def dim_loss_kernel(m_real_ref, m_fake_ref, y_row_ref, prior_ref,
                    wl1_mT_ref, wl1_yT_ref, wl2T_ref, wl3_row_ref,
                    wg1_m_ref, wg1_y_ref, wg2_ref, wg3_row_ref,
                    wp1_ref, wp2_ref, wp3_row_ref,
                    out_ref, *, n_batch, alpha, beta, gamma):
    f32 = jnp.float32
    bf16 = jnp.bfloat16
    tb, cm, hw = m_real_ref.shape  # (batch tile, channels, H*W)

    # Weights (bf16) are resident in VMEM once per grid step and shared by the
    # real and fake streams.
    wl1_mT = wl1_mT_ref[...]                    # (HIDP, cm)
    wl1_yT = wl1_yT_ref[...].astype(f32)        # (HIDP, cy)
    wl2T = wl2T_ref[...]                        # (HIDP, HIDP)
    wl3_row = wl3_row_ref[...]                  # (1, HIDP)
    wg1_y = wg1_y_ref[...]                      # (cy, HIDP)
    wg2 = wg2_ref[...]                          # (HIDP, HIDP)
    wg3_row = wg3_row_ref[...].astype(f32)      # (1, HIDP)
    wp1 = wp1_ref[...]                          # (cy, HIDP)
    wp2 = wp2_ref[...]                          # (HIDP, HIDP)
    wp3_row = wp3_row_ref[...].astype(f32)      # (1, HIDP)

    local_acc = jnp.float32(0.0)
    global_acc = jnp.float32(0.0)
    prior_acc = jnp.float32(0.0)

    for b in range(tb):                         # small static tile loop
        m_r = m_real_ref[b]                     # (cm, hw) bf16, HW on lanes
        m_f = m_fake_ref[b]                     # (cm, hw) bf16
        y_row = y_row_ref[b]                    # (1, cy)  bf16
        p_row = prior_ref[b]                    # (1, cy)  bf16

        # ----- local term: 1x1-conv discriminator on cat(M, Y_replicated) -----
        # bias[h] = sum_c Y[c] * W1y[c, h], computed once per sample (no 676x
        # replication of Y), broadcast over the 676 spatial lanes below.
        bias_l = jnp.sum(wl1_yT * y_row.astype(f32), axis=1, keepdims=True)  # (HIDP,1)

        def local_softplus_sum(x):
            h = jnp.dot(wl1_mT, x, preferred_element_type=f32) + bias_l      # (HIDP,hw)
            h = jnp.maximum(h, 0.0).astype(bf16)
            h = jnp.dot(wl2T, h, preferred_element_type=f32)                 # (HIDP,hw)
            h = jnp.maximum(h, 0.0).astype(bf16)
            s = jnp.dot(wl3_row, h, preferred_element_type=f32)              # (1,hw)
            return jnp.sum(_softplus(-s))

        local_acc += local_softplus_sum(m_r) - local_softplus_sum(m_f)

        # ----- global term: MLP on [flatten(M), Y] (split first-layer weight) -----
        h_r = jnp.dot(y_row, wg1_y, preferred_element_type=f32)              # (1,HIDP)
        h_f = h_r
        for c in range(cm):                     # per-channel partial matmuls
            w_c = wg1_m_ref[c]                  # (hw, HIDP) bf16, loaded once for both
            h_r = h_r + jnp.dot(m_r[c:c + 1, :], w_c, preferred_element_type=f32)
            h_f = h_f + jnp.dot(m_f[c:c + 1, :], w_c, preferred_element_type=f32)

        def global_softplus(h1):
            h = jnp.maximum(h1, 0.0).astype(bf16)
            h = jnp.maximum(jnp.dot(h, wg2, preferred_element_type=f32), 0.0)
            s = jnp.sum(h * wg3_row)            # scalar score (no (N,1) stores)
            return _softplus(-s)

        global_acc += global_softplus(h_r) - global_softplus(h_f)

        # ----- prior term (log-sigmoid via softplus identities, NaN-safe) -----
        def prior_score(x_row):
            h = jnp.maximum(jnp.dot(x_row, wp1, preferred_element_type=f32), 0.0)
            h = jnp.maximum(jnp.dot(h.astype(bf16), wp2, preferred_element_type=f32), 0.0)
            return jnp.sum(h * wp3_row)

        s_prior = prior_score(p_row)
        s_y = prior_score(y_row)
        # log(sigmoid(x)) = -softplus(-x) ; log(1 - sigmoid(x)) = -softplus(x)
        prior_acc += _softplus(-s_prior) + _softplus(s_y)

    partial = (jnp.float32(beta / (n_batch * hw)) * local_acc
               + jnp.float32(alpha / n_batch) * global_acc
               + jnp.float32(gamma / n_batch) * prior_acc)
    out_ref[...] = jnp.broadcast_to(partial, out_ref.shape).astype(f32)


def init_params(cm, cy, hw, hidden=32, seed=42):
    """PyTorch-style (un-padded, un-transposed) discriminator weights."""
    key = jax.random.PRNGKey(seed)
    ks = jax.random.split(key, 9)

    def w(k, shape):
        return 0.1 * jax.random.normal(k, shape, jnp.float32)

    return dict(
        wl1=w(ks[0], (cm + cy, hidden)),       # local_D: 1x1 convs on cat(M, Y_rep)
        wl2=w(ks[1], (hidden, hidden)),
        wl3=w(ks[2], (hidden, 1)),
        wg1=w(ks[3], (cm * hw + cy, hidden)),  # global_D: MLP on [flatten(M), Y]
        wg2=w(ks[4], (hidden, hidden)),
        wg3=w(ks[5], (hidden, 1)),
        wp1=w(ks[6], (cy, hidden)),            # prior_D: MLP (+ sigmoid folded away)
        wp2=w(ks[7], (hidden, hidden)),
        wp3=w(ks[8], (hidden, 1)),
    )


def _prepare_weights(params, cm, cy, hw, dtype=jnp.bfloat16):
    """Zero-pad hidden -> HIDP (value preserving through ReLU + final dot),
    split the cat-weights, and orient everything for the in-kernel layout."""
    hidden = params["wl2"].shape[0]
    assert hidden <= HIDP

    def pad_cols(w):
        return jnp.pad(w, [(0, 0)] * (w.ndim - 1) + [(0, HIDP - hidden)])

    def pad_rows(w):
        return jnp.pad(w, [(0, HIDP - hidden)] + [(0, 0)] * (w.ndim - 1))

    wl1 = pad_cols(params["wl1"])
    wl2 = pad_cols(pad_rows(params["wl2"]))
    wl3 = pad_rows(params["wl3"])
    wg1 = pad_cols(params["wg1"])
    wg2 = pad_cols(pad_rows(params["wg2"]))
    wg3 = pad_rows(params["wg3"])
    wp1 = pad_cols(params["wp1"])
    wp2 = pad_cols(pad_rows(params["wp2"]))
    wp3 = pad_rows(params["wp3"])

    prepared = dict(
        wl1_mT=wl1[:cm].T,                            # (HIDP, cm)
        wl1_yT=wl1[cm:].T,                            # (HIDP, cy)
        wl2T=wl2.T,                                   # (HIDP, HIDP)
        wl3_row=wl3.T,                                # (1, HIDP)
        wg1_m=wg1[:cm * hw].reshape(cm, hw, HIDP),    # (cm, hw, HIDP)
        wg1_y=wg1[cm * hw:],                          # (cy, HIDP)
        wg2=wg2,                                      # (HIDP, HIDP)
        wg3_row=wg3.T,                                # (1, HIDP)
        wp1=wp1,                                      # (cy, HIDP)
        wp2=wp2,                                      # (HIDP, HIDP)
        wp3_row=wp3.T,                                # (1, HIDP)
    )
    return {k: v.astype(dtype) for k, v in prepared.items()}


def deep_infomax_loss(Y, M, M_fake, params, prior_key,
                      alpha=0.5, beta=1.0, gamma=0.1, tile_b=1,
                      compute_dtype=jnp.bfloat16):
    B, cy = Y.shape
    _, cm, H, W = M.shape
    hw = H * W
    assert M_fake.shape == M.shape
    assert B % tile_b == 0, "tile_b must divide the batch"
    num_tiles = B // tile_b

    # Free reshape NCHW -> (B, C, H*W): channels on sublanes, positions on lanes.
    # bf16 cast halves HBM bytes for the memory-bound DMA (accumulation stays f32).
    m_real = M.reshape(B, cm, hw).astype(compute_dtype)
    m_fake = M_fake.reshape(B, cm, hw).astype(compute_dtype)
    y_rows = Y.astype(compute_dtype).reshape(B, 1, cy)
    prior = jax.random.uniform(prior_key, (B, cy), jnp.float32)   # torch.rand_like(Y)
    prior_rows = prior.astype(compute_dtype).reshape(B, 1, cy)

    w = _prepare_weights(params, cm, cy, hw, dtype=compute_dtype)

    kernel = functools.partial(dim_loss_kernel, n_batch=B,
                               alpha=alpha, beta=beta, gamma=gamma)

    def tiled3(shape):
        return pl.BlockSpec(shape, lambda i: (i, 0, 0))

    def full2(shape):
        return pl.BlockSpec(shape, lambda i: (0, 0))

    def full3(shape):
        return pl.BlockSpec(shape, lambda i: (0, 0, 0))

    in_specs = [
        tiled3((tile_b, cm, hw)),      # M (real)
        tiled3((tile_b, cm, hw)),      # M (fake)
        tiled3((tile_b, 1, cy)),       # Y rows
        tiled3((tile_b, 1, cy)),       # prior rows
        full2((HIDP, cm)),             # wl1_mT
        full2((HIDP, cy)),             # wl1_yT
        full2((HIDP, HIDP)),           # wl2T
        full2((1, HIDP)),              # wl3_row
        full3((cm, hw, HIDP)),         # wg1_m
        full2((cy, HIDP)),             # wg1_y
        full2((HIDP, HIDP)),           # wg2
        full2((1, HIDP)),              # wg3_row
        full2((cy, HIDP)),             # wp1
        full2((HIDP, HIDP)),           # wp2
        full2((1, HIDP)),              # wp3_row
    ]

    partials = pl.pallas_call(
        kernel,
        grid=(num_tiles,),
        in_specs=in_specs,
        out_specs=pl.BlockSpec((1, 1, 128), lambda i: (i, 0, 0)),
        out_shape=jax.ShapeDtypeStruct((num_tiles, 1, 128), jnp.float32),
        compiler_params=pltpu.CompilerParams(
            # parallel batch-tile axis: shards across both TensorCores on v7x,
            # per-tile partials avoid a serializing accumulator axis.
            dimension_semantics=("parallel",),
            # keep double-buffered tiles well inside v7x's 64 MiB physical VMEM
            vmem_limit_bytes=48 * 1024 * 1024,
        ),
    )(m_real, m_fake, y_rows, prior_rows,
      w["wl1_mT"], w["wl1_yT"], w["wl2T"], w["wl3_row"],
      w["wg1_m"], w["wg1_y"], w["wg2"], w["wg3_row"],
      w["wp1"], w["wp2"], w["wp3_row"])

    # Tiny epilogue: sum the per-tile partial losses.
    return jnp.sum(partials[:, 0, 0])


if __name__ == "__main__":
    key = jax.random.PRNGKey(0)
    k_y, k_m, k_mf, k_prior = jax.random.split(key, 4)

    # Spatial 26x26 is fixed by the module's hard-coded expand(-1, -1, 26, 26);
    # batch / channels kept small.
    B, CY, CM, H, W = 2, 8, 4, 26, 26
    Y = jax.random.normal(k_y, (B, CY), jnp.float32)
    M = jax.random.normal(k_m, (B, CM, H, W), jnp.float32)
    M_fake = jax.random.normal(k_mf, (B, CM, H, W), jnp.float32)

    params = init_params(cm=CM, cy=CY, hw=H * W, hidden=32)

    loss = deep_infomax_loss(Y, M, M_fake, params, k_prior,
                             alpha=0.5, beta=1.0, gamma=0.1, tile_b=1)
    jax.block_until_ready(loss)
    assert loss.shape == () and bool(jnp.isfinite(loss))
    print("KERNEL_OK")
</pallas_src>

<mosaic_0001>
module attributes {stable_mosaic.version = 11 : i64} {
  func.func @dim_loss_kernel(%arg0: i32, %arg1: memref<1x4x676xbf16, #tpu.memory_space<vmem>>, %arg2: memref<1x4x676xbf16, #tpu.memory_space<vmem>>, %arg3: memref<1x1x8xbf16, #tpu.memory_space<vmem>>, %arg4: memref<1x1x8xbf16, #tpu.memory_space<vmem>>, %arg5: memref<128x4xbf16, #tpu.memory_space<vmem>>, %arg6: memref<128x8xbf16, #tpu.memory_space<vmem>>, %arg7: memref<128x128xbf16, #tpu.memory_space<vmem>>, %arg8: memref<1x128xbf16, #tpu.memory_space<vmem>>, %arg9: memref<4x676x128xbf16, #tpu.memory_space<vmem>>, %arg10: memref<8x128xbf16, #tpu.memory_space<vmem>>, %arg11: memref<128x128xbf16, #tpu.memory_space<vmem>>, %arg12: memref<1x128xbf16, #tpu.memory_space<vmem>>, %arg13: memref<8x128xbf16, #tpu.memory_space<vmem>>, %arg14: memref<128x128xbf16, #tpu.memory_space<vmem>>, %arg15: memref<1x128xbf16, #tpu.memory_space<vmem>>, %arg16: memref<1x1x128xf32, #tpu.memory_space<vmem>>) attributes {dimension_semantics = [#tpu.dimension_semantics<parallel>], iteration_bounds = array<i64: 2>, scalar_prefetch = 0 : i64, scratch_operands = 0 : i64, tpu.core_type = #tpu.core_type<tc>, window_params = [{transform_indices = @transform_0, window_bounds = array<i64: 1, 4, 676>}, {transform_indices = @transform_1, window_bounds = array<i64: 1, 4, 676>}, {transform_indices = @transform_2, window_bounds = array<i64: 1, 1, 8>}, {transform_indices = @transform_3, window_bounds = array<i64: 1, 1, 8>}, {pipeline_mode = #tpu.pipeline_mode<synchronous>, transform_indices = @transform_4, window_bounds = array<i64: 128, 4>}, {pipeline_mode = #tpu.pipeline_mode<synchronous>, transform_indices = @transform_5, window_bounds = array<i64: 128, 8>}, {pipeline_mode = #tpu.pipeline_mode<synchronous>, transform_indices = @transform_6, window_bounds = array<i64: 128, 128>}, {pipeline_mode = #tpu.pipeline_mode<synchronous>, transform_indices = @transform_7, window_bounds = array<i64: 1, 128>}, {pipeline_mode = #tpu.pipeline_mode<synchronous>, transform_indices = @transform_8, window_bounds = array<i64: 4, 676, 128>}, {pipeline_mode = #tpu.pipeline_mode<synchronous>, transform_indices = @transform_9, window_bounds = array<i64: 8, 128>}, {pipeline_mode = #tpu.pipeline_mode<synchronous>, transform_indices = @transform_10, window_bounds = array<i64: 128, 128>}, {pipeline_mode = #tpu.pipeline_mode<synchronous>, transform_indices = @transform_11, window_bounds = array<i64: 1, 128>}, {pipeline_mode = #tpu.pipeline_mode<synchronous>, transform_indices = @transform_12, window_bounds = array<i64: 8, 128>}, {pipeline_mode = #tpu.pipeline_mode<synchronous>, transform_indices = @transform_13, window_bounds = array<i64: 128, 128>}, {pipeline_mode = #tpu.pipeline_mode<synchronous>, transform_indices = @transform_14, window_bounds = array<i64: 1, 128>}, {transform_indices = @transform_15, window_bounds = array<i64: 1, 1, 128>}]} {
    %c0 = arith.constant 0 : index
    %c0_0 = arith.constant 0 : index
    %0 = vector.load %arg5[%c0, %c0_0] : memref<128x4xbf16, #tpu.memory_space<vmem>>, vector<128x4xbf16>
    %c0_1 = arith.constant 0 : index
    %c0_2 = arith.constant 0 : index
    %1 = vector.load %arg6[%c0_1, %c0_2] : memref<128x8xbf16, #tpu.memory_space<vmem>>, vector<128x8xbf16>
    %2 = arith.extf %1 : vector<128x8xbf16> to vector<128x8xf32>
    %c0_3 = arith.constant 0 : index
    %c0_4 = arith.constant 0 : index
    %3 = vector.load %arg7[%c0_3, %c0_4] : memref<128x128xbf16, #tpu.memory_space<vmem>>, vector<128x128xbf16>
    %c0_5 = arith.constant 0 : index
    %c0_6 = arith.constant 0 : index
    %4 = vector.load %arg8[%c0_5, %c0_6] : memref<1x128xbf16, #tpu.memory_space<vmem>>, vector<1x128xbf16>
    %c0_7 = arith.constant 0 : index
    %c0_8 = arith.constant 0 : index
    %5 = vector.load %arg10[%c0_7, %c0_8] : memref<8x128xbf16, #tpu.memory_space<vmem>>, vector<8x128xbf16>
    %c0_9 = arith.constant 0 : index
    %c0_10 = arith.constant 0 : index
    %6 = vector.load %arg11[%c0_9, %c0_10] : memref<128x128xbf16, #tpu.memory_space<vmem>>, vector<128x128xbf16>
    %c0_11 = arith.constant 0 : index
    %c0_12 = arith.constant 0 : index
    %7 = vector.load %arg12[%c0_11, %c0_12] : memref<1x128xbf16, #tpu.memory_space<vmem>>, vector<1x128xbf16>
    %8 = arith.extf %7 : vector<1x128xbf16> to vector<1x128xf32>
    %c0_13 = arith.constant 0 : index
    %c0_14 = arith.constant 0 : index
    %9 = vector.load %arg13[%c0_13, %c0_14] : memref<8x128xbf16, #tpu.memory_space<vmem>>, vector<8x128xbf16>
    %c0_15 = arith.constant 0 : index
    %c0_16 = arith.constant 0 : index
    %10 = vector.load %arg14[%c0_15, %c0_16] : memref<128x128xbf16, #tpu.memory_space<vmem>>, vector<128x128xbf16>
    %c0_17 = arith.constant 0 : index
    %c0_18 = arith.constant 0 : index
    %11 = vector.load %arg15[%c0_17, %c0_18] : memref<1x128xbf16, #tpu.memory_space<vmem>>, vector<1x128xbf16>
    %12 = arith.extf %11 : vector<1x128xbf16> to vector<1x128xf32>
    %c0_19 = arith.constant 0 : index
    %c0_20 = arith.constant 0 : index
    %c0_21 = arith.constant 0 : index
    %13 = vector.load %arg1[%c0_19, %c0_20, %c0_21] : memref<1x4x676xbf16, #tpu.memory_space<vmem>>, vector<1x4x676xbf16>
    %14 = vector.shape_cast %13 : vector<1x4x676xbf16> to vector<4x676xbf16>
    %c0_22 = arith.constant 0 : index
    %c0_23 = arith.constant 0 : index
    %c0_24 = arith.constant 0 : index
    %15 = vector.load %arg2[%c0_22, %c0_23, %c0_24] : memref<1x4x676xbf16, #tpu.memory_space<vmem>>, vector<1x4x676xbf16>
    %16 = vector.shape_cast %15 : vector<1x4x676xbf16> to vector<4x676xbf16>
    %c0_25 = arith.constant 0 : index
    %c0_26 = arith.constant 0 : index
    %c0_27 = arith.constant 0 : index
    %17 = vector.load %arg3[%c0_25, %c0_26, %c0_27] : memref<1x1x8xbf16, #tpu.memory_space<vmem>>, vector<1x1x8xbf16>
    %18 = vector.shape_cast %17 : vector<1x1x8xbf16> to vector<1x8xbf16>
    %c0_28 = arith.constant 0 : index
    %c0_29 = arith.constant 0 : index
    %c0_30 = arith.constant 0 : index
    %19 = vector.load %arg4[%c0_28, %c0_29, %c0_30] : memref<1x1x8xbf16, #tpu.memory_space<vmem>>, vector<1x1x8xbf16>
    %20 = vector.shape_cast %19 : vector<1x1x8xbf16> to vector<1x8xbf16>
    %21 = arith.extf %18 : vector<1x8xbf16> to vector<1x8xf32>
    %22 = vector.broadcast %21 : vector<1x8xf32> to vector<128x8xf32>
    %23 = arith.mulf %2, %22 : vector<128x8xf32>
    %cst = arith.constant dense<0.000000e+00> : vector<128xf32>
    %24 = vector.multi_reduction <add>, %23, %cst [1] : vector<128x8xf32> to vector<128xf32>
    %25 = vector.shape_cast %24 : vector<128xf32> to vector<128x1xf32>
    %cst_31 = arith.constant dense<0.000000e+00> : vector<128x676xf32>
    %26 = tpu.matmul %0, %14, %cst_31 {dimension_numbers = #tpu.dot_dimension_numbers<[1], [0], [0], [1], [0, 0, 1, 1], [], []>} : vector<128x4xbf16>, vector<4x676xbf16>, vector<128x676xf32> -> vector<128x676xf32>
    %27 = vector.broadcast %25 : vector<128x1xf32> to vector<128x676xf32>
    %28 = arith.addf %26, %27 : vector<128x676xf32>
    %cst_32 = arith.constant 0.000000e+00 : f32
    %29 = vector.broadcast %cst_32 : f32 to vector<128x676xf32>
    %30 = arith.maximumf %28, %29 : vector<128x676xf32>
    %31 = arith.truncf %30 : vector<128x676xf32> to vector<128x676xbf16>
    %cst_33 = arith.constant dense<0.000000e+00> : vector<128x676xf32>
    %32 = tpu.matmul %3, %31, %cst_33 {dimension_numbers = #tpu.dot_dimension_numbers<[1], [0], [0], [1], [0, 0, 1, 1], [], []>} : vector<128x128xbf16>, vector<128x676xbf16>, vector<128x676xf32> -> vector<128x676xf32>
    %cst_34 = arith.constant 0.000000e+00 : f32
    %33 = vector.broadcast %cst_34 : f32 to vector<128x676xf32>
    %34 = arith.maximumf %32, %33 : vector<128x676xf32>
    %35 = arith.truncf %34 : vector<128x676xf32> to vector<128x676xbf16>
    %cst_35 = arith.constant dense<0.000000e+00> : vector<1x676xf32>
    %36 = tpu.matmul %4, %35, %cst_35 {dimension_numbers = #tpu.dot_dimension_numbers<[1], [0], [0], [1], [0, 0, 1, 1], [], []>} : vector<1x128xbf16>, vector<128x676xbf16>, vector<1x676xf32> -> vector<1x676xf32>
    %cst_36 = arith.constant 0.000000e+00 : f32
    %37 = vector.broadcast %cst_36 : f32 to vector<1x676xf32>
    %38 = arith.subf %37, %36 : vector<1x676xf32>
    %cst_37 = arith.constant 0.000000e+00 : f32
    %39 = vector.broadcast %cst_37 : f32 to vector<1x676xf32>
    %40 = arith.maximumf %38, %39 : vector<1x676xf32>
    %41 = math.absf %38 : vector<1x676xf32>
    %cst_38 = arith.constant 0.000000e+00 : f32
    %42 = vector.broadcast %cst_38 : f32 to vector<1x676xf32>
    %43 = arith.subf %42, %41 : vector<1x676xf32>
    %44 = math.exp %43 : vector<1x676xf32>
    %cst_39 = arith.constant 1.000000e+00 : f32
    %45 = vector.broadcast %cst_39 : f32 to vector<1x676xf32>
    %46 = arith.addf %45, %44 : vector<1x676xf32>
    %47 = math.log %46 : vector<1x676xf32>
    %48 = arith.addf %40, %47 : vector<1x676xf32>
    %49 = vector.shape_cast %48 : vector<1x676xf32> to vector<1x1x676xf32>
    %cst_40 = arith.constant dense<0.000000e+00> : vector<1xf32>
    %50 = vector.multi_reduction <add>, %49, %cst_40 [1, 2] : vector<1x1x676xf32> to vector<1xf32>
    %51 = vector.shape_cast %50 : vector<1xf32> to vector<1x1x1xf32>
    %52 = vector.extract %51[0, 0, 0] : f32 from vector<1x1x1xf32>
    %cst_41 = arith.constant dense<0.000000e+00> : vector<128x676xf32>
    %53 = tpu.matmul %0, %16, %cst_41 {dimension_numbers = #tpu.dot_dimension_numbers<[1], [0], [0], [1], [0, 0, 1, 1], [], []>} : vector<128x4xbf16>, vector<4x676xbf16>, vector<128x676xf32> -> vector<128x676xf32>
    %54 = vector.broadcast %25 : vector<128x1xf32> to vector<128x676xf32>
    %55 = arith.addf %53, %54 : vector<128x676xf32>
    %cst_42 = arith.constant 0.000000e+00 : f32
    %56 = vector.broadcast %cst_42 : f32 to vector<128x676xf32>
    %57 = arith.maximumf %55, %56 : vector<128x676xf32>
    %58 = arith.truncf %57 : vector<128x676xf32> to vector<128x676xbf16>
    %cst_43 = arith.constant dense<0.000000e+00> : vector<128x676xf32>
    %59 = tpu.matmul %3, %58, %cst_43 {dimension_numbers = #tpu.dot_dimension_numbers<[1], [0], [0], [1], [0, 0, 1, 1], [], []>} : vector<128x128xbf16>, vector<128x676xbf16>, vector<128x676xf32> -> vector<128x676xf32>
    %cst_44 = arith.constant 0.000000e+00 : f32
    %60 = vector.broadcast %cst_44 : f32 to vector<128x676xf32>
    %61 = arith.maximumf %59, %60 : vector<128x676xf32>
    %62 = arith.truncf %61 : vector<128x676xf32> to vector<128x676xbf16>
    %cst_45 = arith.constant dense<0.000000e+00> : vector<1x676xf32>
    %63 = tpu.matmul %4, %62, %cst_45 {dimension_numbers = #tpu.dot_dimension_numbers<[1], [0], [0], [1], [0, 0, 1, 1], [], []>} : vector<1x128xbf16>, vector<128x676xbf16>, vector<1x676xf32> -> vector<1x676xf32>
    %cst_46 = arith.constant 0.000000e+00 : f32
    %64 = vector.broadcast %cst_46 : f32 to vector<1x676xf32>
    %65 = arith.subf %64, %63 : vector<1x676xf32>
    %cst_47 = arith.constant 0.000000e+00 : f32
    %66 = vector.broadcast %cst_47 : f32 to vector<1x676xf32>
    %67 = arith.maximumf %65, %66 : vector<1x676xf32>
    %68 = math.absf %65 : vector<1x676xf32>
    %cst_48 = arith.constant 0.000000e+00 : f32
    %69 = vector.broadcast %cst_48 : f32 to vector<1x676xf32>
    %70 = arith.subf %69, %68 : vector<1x676xf32>
    %71 = math.exp %70 : vector<1x676xf32>
    %cst_49 = arith.constant 1.000000e+00 : f32
    %72 = vector.broadcast %cst_49 : f32 to vector<1x676xf32>
    %73 = arith.addf %72, %71 : vector<1x676xf32>
    %74 = math.log %73 : vector<1x676xf32>
    %75 = arith.addf %67, %74 : vector<1x676xf32>
    %76 = vector.shape_cast %75 : vector<1x676xf32> to vector<1x1x676xf32>
    %cst_50 = arith.constant dense<0.000000e+00> : vector<1xf32>
    %77 = vector.multi_reduction <add>, %76, %cst_50 [1, 2] : vector<1x1x676xf32> to vector<1xf32>
    %78 = vector.shape_cast %77 : vector<1xf32> to vector<1x1x1xf32>
    %79 = vector.extract %78[0, 0, 0] : f32 from vector<1x1x1xf32>
    %80 = arith.subf %52, %79 : f32
    %cst_51 = arith.constant 0.000000e+00 : f32
    %81 = arith.addf %cst_51, %80 : f32
    %cst_52 = arith.constant dense<0.000000e+00> : vector<1x128xf32>
    %82 = tpu.matmul %18, %5, %cst_52 {dimension_numbers = #tpu.dot_dimension_numbers<[1], [0], [0], [1], [0, 0, 1, 1], [], []>} : vector<1x8xbf16>, vector<8x128xbf16>, vector<1x128xf32> -> vector<1x128xf32>
    %c0_53 = arith.constant 0 : index
    %c0_54 = arith.constant 0 : index
    %c0_55 = arith.constant 0 : index
    %83 = vector.load %arg9[%c0_53, %c0_54, %c0_55] : memref<4x676x128xbf16, #tpu.memory_space<vmem>>, vector<1x676x128xbf16>
    %84 = vector.shape_cast %83 : vector<1x676x128xbf16> to vector<676x128xbf16>
    %85 = vector.extract_strided_slice %14 {offsets = [0, 0], sizes = [1, 676], strides = [1, 1]} : vector<4x676xbf16> to vector<1x676xbf16>
    %cst_56 = arith.constant dense<0.000000e+00> : vector<1x128xf32>
    %86 = tpu.matmul %85, %84, %cst_56 {dimension_numbers = #tpu.dot_dimension_numbers<[1], [0], [0], [1], [0, 0, 1, 1], [], []>} : vector<1x676xbf16>, vector<676x128xbf16>, vector<1x128xf32> -> vector<1x128xf32>
    %87 = arith.addf %82, %86 : vector<1x128xf32>
    %88 = vector.extract_strided_slice %16 {offsets = [0, 0], sizes = [1, 676], strides = [1, 1]} : vector<4x676xbf16> to vector<1x676xbf16>
    %cst_57 = arith.constant dense<0.000000e+00> : vector<1x128xf32>
    %89 = tpu.matmul %88, %84, %cst_57 {dimension_numbers = #tpu.dot_dimension_numbers<[1], [0], [0], [1], [0, 0, 1, 1], [], []>} : vector<1x676xbf16>, vector<676x128xbf16>, vector<1x128xf32> -> vector<1x128xf32>
    %90 = arith.addf %82, %89 : vector<1x128xf32>
    %c1 = arith.constant 1 : index
    %c0_58 = arith.constant 0 : index
    %c0_59 = arith.constant 0 : index
    %91 = vector.load %arg9[%c1, %c0_58, %c0_59] : memref<4x676x128xbf16, #tpu.memory_space<vmem>>, vector<1x676x128xbf16>
    %92 = vector.shape_cast %91 : vector<1x676x128xbf16> to vector<676x128xbf16>
    %93 = vector.extract_strided_slice %14 {offsets = [1, 0], sizes = [1, 676], strides = [1, 1]} : vector<4x676xbf16> to vector<1x676xbf16>
    %cst_60 = arith.constant dense<0.000000e+00> : vector<1x128xf32>
    %94 = tpu.matmul %93, %92, %cst_60 {dimension_numbers = #tpu.dot_dimension_numbers<[1], [0], [0], [1], [0, 0, 1, 1], [], []>} : vector<1x676xbf16>, vector<676x128xbf16>, vector<1x128xf32> -> vector<1x128xf32>
    %95 = arith.addf %87, %94 : vector<1x128xf32>
    %96 = vector.extract_strided_slice %16 {offsets = [1, 0], sizes = [1, 676], strides = [1, 1]} : vector<4x676xbf16> to vector<1x676xbf16>
    %cst_61 = arith.constant dense<0.000000e+00> : vector<1x128xf32>
    %97 = tpu.matmul %96, %92, %cst_61 {dimension_numbers = #tpu.dot_dimension_numbers<[1], [0], [0], [1], [0, 0, 1, 1], [], []>} : vector<1x676xbf16>, vector<676x128xbf16>, vector<1x128xf32> -> vector<1x128xf32>
    %98 = arith.addf %90, %97 : vector<1x128xf32>
    %c2 = arith.constant 2 : index
    %c0_62 = arith.constant 0 : index
    %c0_63 = arith.constant 0 : index
    %99 = vector.load %arg9[%c2, %c0_62, %c0_63] : memref<4x676x128xbf16, #tpu.memory_space<vmem>>, vector<1x676x128xbf16>
    %100 = vector.shape_cast %99 : vector<1x676x128xbf16> to vector<676x128xbf16>
    %101 = vector.extract_strided_slice %14 {offsets = [2, 0], sizes = [1, 676], strides = [1, 1]} : vector<4x676xbf16> to vector<1x676xbf16>
    %cst_64 = arith.constant dense<0.000000e+00> : vector<1x128xf32>
    %102 = tpu.matmul %101, %100, %cst_64 {dimension_numbers = #tpu.dot_dimension_numbers<[1], [0], [0], [1], [0, 0, 1, 1], [], []>} : vector<1x676xbf16>, vector<676x128xbf16>, vector<1x128xf32> -> vector<1x128xf32>
    %103 = arith.addf %95, %102 : vector<1x128xf32>
    %104 = vector.extract_strided_slice %16 {offsets = [2, 0], sizes = [1, 676], strides = [1, 1]} : vector<4x676xbf16> to vector<1x676xbf16>
    %cst_65 = arith.constant dense<0.000000e+00> : vector<1x128xf32>
    %105 = tpu.matmul %104, %100, %cst_65 {dimension_numbers = #tpu.dot_dimension_numbers<[1], [0], [0], [1], [0, 0, 1, 1], [], []>} : vector<1x676xbf16>, vector<676x128xbf16>, vector<1x128xf32> -> vector<1x128xf32>
    %106 = arith.addf %98, %105 : vector<1x128xf32>
    %c3 = arith.constant 3 : index
    %c0_66 = arith.constant 0 : index
    %c0_67 = arith.constant 0 : index
    %107 = vector.load %arg9[%c3, %c0_66, %c0_67] : memref<4x676x128xbf16, #tpu.memory_space<vmem>>, vector<1x676x128xbf16>
    %108 = vector.shape_cast %107 : vector<1x676x128xbf16> to vector<676x128xbf16>
    %109 = vector.extract_strided_slice %14 {offsets = [3, 0], sizes = [1, 676], strides = [1, 1]} : vector<4x676xbf16> to vector<1x676xbf16>
    %cst_68 = arith.constant dense<0.000000e+00> : vector<1x128xf32>
    %110 = tpu.matmul %109, %108, %cst_68 {dimension_numbers = #tpu.dot_dimension_numbers<[1], [0], [0], [1], [0, 0, 1, 1], [], []>} : vector<1x676xbf16>, vector<676x128xbf16>, vector<1x128xf32> -> vector<1x128xf32>
    %111 = arith.addf %103, %110 : vector<1x128xf32>
    %112 = vector.extract_strided_slice %16 {offsets = [3, 0], sizes = [1, 676], strides = [1, 1]} : vector<4x676xbf16> to vector<1x676xbf16>
    %cst_69 = arith.constant dense<0.000000e+00> : vector<1x128xf32>
    %113 = tpu.matmul %112, %108, %cst_69 {dimension_numbers = #tpu.dot_dimension_numbers<[1], [0], [0], [1], [0, 0, 1, 1], [], []>} : vector<1x676xbf16>, vector<676x128xbf16>, vector<1x128xf32> -> vector<1x128xf32>
    %114 = arith.addf %106, %113 : vector<1x128xf32>
    %cst_70 = arith.constant 0.000000e+00 : f32
    %115 = vector.broadcast %cst_70 : f32 to vector<1x128xf32>
    %116 = arith.maximumf %111, %115 : vector<1x128xf32>
    %117 = arith.truncf %116 : vector<1x128xf32> to vector<1x128xbf16>
    %cst_71 = arith.constant dense<0.000000e+00> : vector<1x128xf32>
    %118 = tpu.matmul %117, %6, %cst_71 {dimension_numbers = #tpu.dot_dimension_numbers<[1], [0], [0], [1], [0, 0, 1, 1], [], []>} : vector<1x128xbf16>, vector<128x128xbf16>, vector<1x128xf32> -> vector<1x128xf32>
    %cst_72 = arith.constant 0.000000e+00 : f32
    %119 = vector.broadcast %cst_72 : f32 to vector<1x128xf32>
    %120 = arith.maximumf %118, %119 : vector<1x128xf32>
    %121 = arith.mulf %120, %8 : vector<1x128xf32>
    %122 = vector.shape_cast %121 : vector<1x128xf32> to vector<1x1x128xf32>
    %cst_73 = arith.constant dense<0.000000e+00> : vector<1xf32>
    %123 = vector.multi_reduction <add>, %122, %cst_73 [1, 2] : vector<1x1x128xf32> to vector<1xf32>
    %124 = vector.shape_cast %123 : vector<1xf32> to vector<1x1x1xf32>
    %125 = vector.extract %124[0, 0, 0] : f32 from vector<1x1x1xf32>
    %cst_74 = arith.constant 0.000000e+00 : f32
    %126 = arith.subf %cst_74, %125 : f32
    %cst_75 = arith.constant 0.000000e+00 : f32
    %127 = arith.maximumf %126, %cst_75 : f32
    %128 = math.absf %126 : f32
    %cst_76 = arith.constant 0.000000e+00 : f32
    %129 = arith.subf %cst_76, %128 : f32
    %130 = math.exp %129 : f32
    %cst_77 = arith.constant 1.000000e+00 : f32
    %131 = arith.addf %cst_77, %130 : f32
    %132 = math.log %131 : f32
    %133 = arith.addf %127, %132 : f32
    %cst_78 = arith.constant 0.000000e+00 : f32
    %134 = vector.broadcast %cst_78 : f32 to vector<1x128xf32>
    %135 = arith.maximumf %114, %134 : vector<1x128xf32>
    %136 = arith.truncf %135 : vector<1x128xf32> to vector<1x128xbf16>
    %cst_79 = arith.constant dense<0.000000e+00> : vector<1x128xf32>
    %137 = tpu.matmul %136, %6, %cst_79 {dimension_numbers = #tpu.dot_dimension_numbers<[1], [0], [0], [1], [0, 0, 1, 1], [], []>} : vector<1x128xbf16>, vector<128x128xbf16>, vector<1x128xf32> -> vector<1x128xf32>
    %cst_80 = arith.constant 0.000000e+00 : f32
    %138 = vector.broadcast %cst_80 : f32 to vector<1x128xf32>
    %139 = arith.maximumf %137, %138 : vector<1x128xf32>
    %140 = arith.mulf %139, %8 : vector<1x128xf32>
    %141 = vector.shape_cast %140 : vector<1x128xf32> to vector<1x1x128xf32>
    %cst_81 = arith.constant dense<0.000000e+00> : vector<1xf32>
    %142 = vector.multi_reduction <add>, %141, %cst_81 [1, 2] : vector<1x1x128xf32> to vector<1xf32>
    %143 = vector.shape_cast %142 : vector<1xf32> to vector<1x1x1xf32>
    %144 = vector.extract %143[0, 0, 0] : f32 from vector<1x1x1xf32>
    %cst_82 = arith.constant 0.000000e+00 : f32
    %145 = arith.subf %cst_82, %144 : f32
    %cst_83 = arith.constant 0.000000e+00 : f32
    %146 = arith.maximumf %145, %cst_83 : f32
    %147 = math.absf %145 : f32
    %cst_84 = arith.constant 0.000000e+00 : f32
    %148 = arith.subf %cst_84, %147 : f32
    %149 = math.exp %148 : f32
    %cst_85 = arith.constant 1.000000e+00 : f32
    %150 = arith.addf %cst_85, %149 : f32
    %151 = math.log %150 : f32
    %152 = arith.addf %146, %151 : f32
    %153 = arith.subf %133, %152 : f32
    %cst_86 = arith.constant 0.000000e+00 : f32
    %154 = arith.addf %cst_86, %153 : f32
    %cst_87 = arith.constant dense<0.000000e+00> : vector<1x128xf32>
    %155 = tpu.matmul %20, %9, %cst_87 {dimension_numbers = #tpu.dot_dimension_numbers<[1], [0], [0], [1], [0, 0, 1, 1], [], []>} : vector<1x8xbf16>, vector<8x128xbf16>, vector<1x128xf32> -> vector<1x128xf32>
    %cst_88 = arith.constant 0.000000e+00 : f32
    %156 = vector.broadcast %cst_88 : f32 to vector<1x128xf32>
    %157 = arith.maximumf %155, %156 : vector<1x128xf32>
    %158 = arith.truncf %157 : vector<1x128xf32> to vector<1x128xbf16>
    %cst_89 = arith.constant dense<0.000000e+00> : vector<1x128xf32>
    %159 = tpu.matmul %158, %10, %cst_89 {dimension_numbers = #tpu.dot_dimension_numbers<[1], [0], [0], [1], [0, 0, 1, 1], [], []>} : vector<1x128xbf16>, vector<128x128xbf16>, vector<1x128xf32> -> vector<1x128xf32>
    %cst_90 = arith.constant 0.000000e+00 : f32
    %160 = vector.broadcast %cst_90 : f32 to vector<1x128xf32>
    %161 = arith.maximumf %159, %160 : vector<1x128xf32>
    %162 = arith.mulf %161, %12 : vector<1x128xf32>
    %163 = vector.shape_cast %162 : vector<1x128xf32> to vector<1x1x128xf32>
    %cst_91 = arith.constant dense<0.000000e+00> : vector<1xf32>
    %164 = vector.multi_reduction <add>, %163, %cst_91 [1, 2] : vector<1x1x128xf32> to vector<1xf32>
    %165 = vector.shape_cast %164 : vector<1xf32> to vector<1x1x1xf32>
    %166 = vector.extract %165[0, 0, 0] : f32 from vector<1x1x1xf32>
    %cst_92 = arith.constant dense<0.000000e+00> : vector<1x128xf32>
    %167 = tpu.matmul %18, %9, %cst_92 {dimension_numbers = #tpu.dot_dimension_numbers<[1], [0], [0], [1], [0, 0, 1, 1], [], []>} : vector<1x8xbf16>, vector<8x128xbf16>, vector<1x128xf32> -> vector<1x128xf32>
    %cst_93 = arith.constant 0.000000e+00 : f32
    %168 = vector.broadcast %cst_93 : f32 to vector<1x128xf32>
    %169 = arith.maximumf %167, %168 : vector<1x128xf32>
    %170 = arith.truncf %169 : vector<1x128xf32> to vector<1x128xbf16>
    %cst_94 = arith.constant dense<0.000000e+00> : vector<1x128xf32>
    %171 = tpu.matmul %170, %10, %cst_94 {dimension_numbers = #tpu.dot_dimension_numbers<[1], [0], [0], [1], [0, 0, 1, 1], [], []>} : vector<1x128xbf16>, vector<128x128xbf16>, vector<1x128xf32> -> vector<1x128xf32>
    %cst_95 = arith.constant 0.000000e+00 : f32
    %172 = vector.broadcast %cst_95 : f32 to vector<1x128xf32>
    %173 = arith.maximumf %171, %172 : vector<1x128xf32>
    %174 = arith.mulf %173, %12 : vector<1x128xf32>
    %175 = vector.shape_cast %174 : vector<1x128xf32> to vector<1x1x128xf32>
    %cst_96 = arith.constant dense<0.000000e+00> : vector<1xf32>
    %176 = vector.multi_reduction <add>, %175, %cst_96 [1, 2] : vector<1x1x128xf32> to vector<1xf32>
    %177 = vector.shape_cast %176 : vector<1xf32> to vector<1x1x1xf32>
    %178 = vector.extract %177[0, 0, 0] : f32 from vector<1x1x1xf32>
    %cst_97 = arith.constant 0.000000e+00 : f32
    %179 = arith.subf %cst_97, %166 : f32
    %cst_98 = arith.constant 0.000000e+00 : f32
    %180 = arith.maximumf %179, %cst_98 : f32
    %181 = math.absf %179 : f32
    %cst_99 = arith.constant 0.000000e+00 : f32
    %182 = arith.subf %cst_99, %181 : f32
    %183 = math.exp %182 : f32
    %cst_100 = arith.constant 1.000000e+00 : f32
    %184 = arith.addf %cst_100, %183 : f32
    %185 = math.log %184 : f32
    %186 = arith.addf %180, %185 : f32
    %cst_101 = arith.constant 0.000000e+00 : f32
    %187 = arith.maximumf %178, %cst_101 : f32
    %188 = math.absf %178 : f32
    %cst_102 = arith.constant 0.000000e+00 : f32
    %189 = arith.subf %cst_102, %188 : f32
    %190 = math.exp %189 : f32
    %cst_103 = arith.constant 1.000000e+00 : f32
    %191 = arith.addf %cst_103, %190 : f32
    %192 = math.log %191 : f32
    %193 = arith.addf %187, %192 : f32
    %194 = arith.addf %186, %193 : f32
    %cst_104 = arith.constant 0.000000e+00 : f32
    %195 = arith.addf %cst_104, %194 : f32
    %cst_105 = arith.constant 7.396450e-04 : f32
    %196 = arith.mulf %cst_105, %81 : f32
    %cst_106 = arith.constant 2.500000e-01 : f32
    %197 = arith.mulf %cst_106, %154 : f32
    %198 = arith.addf %196, %197 : f32
    %cst_107 = arith.constant 5.000000e-02 : f32
    %199 = arith.mulf %cst_107, %195 : f32
    %200 = arith.addf %198, %199 : f32
    %201 = vector.broadcast %200 : f32 to vector<1x1x128xf32>
    %c0_108 = arith.constant 0 : index
    %c0_109 = arith.constant 0 : index
    %c0_110 = arith.constant 0 : index
    %202 = vector.load %arg16[%c0_108, %c0_109, %c0_110] : memref<1x1x128xf32, #tpu.memory_space<vmem>>, vector<1x1x128xf32>
    tpu.vector_store %arg16[%c0_108, %c0_109, %c0_110], %201 {strides = array<i32>} : memref<1x1x128xf32, #tpu.memory_space<vmem>>, vector<1x1x128xf32>,
    return
  }
  func.func @transform_0(%arg0: i32) -> (i32, i32, i32) {
    %c0_i32 = arith.constant 0 : i32
    %c0_i32_0 = arith.constant 0 : i32
    %c0_i32_1 = arith.constant 0 : i32
    return %arg0, %c0_i32, %c0_i32_0 : i32, i32, i32
  }
  func.func @transform_1(%arg0: i32) -> (i32, i32, i32) {
    %c0_i32 = arith.constant 0 : i32
    %c0_i32_0 = arith.constant 0 : i32
    %c0_i32_1 = arith.constant 0 : i32
    return %arg0, %c0_i32, %c0_i32_0 : i32, i32, i32
  }
  func.func @transform_2(%arg0: i32) -> (i32, i32, i32) {
    %c0_i32 = arith.constant 0 : i32
    %c0_i32_0 = arith.constant 0 : i32
    %c0_i32_1 = arith.constant 0 : i32
    return %arg0, %c0_i32, %c0_i32_0 : i32, i32, i32
  }
  func.func @transform_3(%arg0: i32) -> (i32, i32, i32) {
    %c0_i32 = arith.constant 0 : i32
    %c0_i32_0 = arith.constant 0 : i32
    %c0_i32_1 = arith.constant 0 : i32
    return %arg0, %c0_i32, %c0_i32_0 : i32, i32, i32
  }
  func.func @transform_4(%arg0: i32) -> (i32, i32) {
    %c0_i32 = arith.constant 0 : i32
    %c0_i32_0 = arith.constant 0 : i32
    %c0_i32_1 = arith.constant 0 : i32
    return %c0_i32, %c0_i32_0 : i32, i32
  }
  func.func @transform_5(%arg0: i32) -> (i32, i32) {
    %c0_i32 = arith.constant 0 : i32
    %c0_i32_0 = arith.constant 0 : i32
    %c0_i32_1 = arith.constant 0 : i32
    return %c0_i32, %c0_i32_0 : i32, i32
  }
  func.func @transform_6(%arg0: i32) -> (i32, i32) {
    %c0_i32 = arith.constant 0 : i32
    %c0_i32_0 = arith.constant 0 : i32
    %c0_i32_1 = arith.constant 0 : i32
    return %c0_i32, %c0_i32_0 : i32, i32
  }
  func.func @transform_7(%arg0: i32) -> (i32, i32) {
    %c0_i32 = arith.constant 0 : i32
    %c0_i32_0 = arith.constant 0 : i32
    %c0_i32_1 = arith.constant 0 : i32
    return %c0_i32, %c0_i32_0 : i32, i32
  }
  func.func @transform_8(%arg0: i32) -> (i32, i32, i32) {
    %c0_i32 = arith.constant 0 : i32
    %c0_i32_0 = arith.constant 0 : i32
    %c0_i32_1 = arith.constant 0 : i32
    %c0_i32_2 = arith.constant 0 : i32
    return %c0_i32, %c0_i32_0, %c0_i32_1 : i32, i32, i32
  }
  func.func @transform_9(%arg0: i32) -> (i32, i32) {
    %c0_i32 = arith.constant 0 : i32
    %c0_i32_0 = arith.constant 0 : i32
    %c0_i32_1 = arith.constant 0 : i32
    return %c0_i32, %c0_i32_0 : i32, i32
  }
  func.func @transform_10(%arg0: i32) -> (i32, i32) {
    %c0_i32 = arith.constant 0 : i32
    %c0_i32_0 = arith.constant 0 : i32
    %c0_i32_1 = arith.constant 0 : i32
    return %c0_i32, %c0_i32_0 : i32, i32
  }
  func.func @transform_11(%arg0: i32) -> (i32, i32) {
    %c0_i32 = arith.constant 0 : i32
    %c0_i32_0 = arith.constant 0 : i32
    %c0_i32_1 = arith.constant 0 : i32
    return %c0_i32, %c0_i32_0 : i32, i32
  }
  func.func @transform_12(%arg0: i32) -> (i32, i32) {
    %c0_i32 = arith.constant 0 : i32
    %c0_i32_0 = arith.constant 0 : i32
    %c0_i32_1 = arith.constant 0 : i32
    return %c0_i32, %c0_i32_0 : i32, i32
  }
  func.func @transform_13(%arg0: i32) -> (i32, i32) {
    %c0_i32 = arith.constant 0 : i32
    %c0_i32_0 = arith.constant 0 : i32
    %c0_i32_1 = arith.constant 0 : i32
    return %c0_i32, %c0_i32_0 : i32, i32
  }
  func.func @transform_14(%arg0: i32) -> (i32, i32) {
    %c0_i32 = arith.constant 0 : i32
    %c0_i32_0 = arith.constant 0 : i32
    %c0_i32_1 = arith.constant 0 : i32
    return %c0_i32, %c0_i32_0 : i32, i32
  }
  func.func @transform_15(%arg0: i32) -> (i32, i32, i32) {
    %c0_i32 = arith.constant 0 : i32
    %c0_i32_0 = arith.constant 0 : i32
    %c0_i32_1 = arith.constant 0 : i32
    return %arg0, %c0_i32, %c0_i32_0 : i32, i32, i32
  }
}

</mosaic_0001>

<bundles_post_ra>
// kernel: tpu_custom_call.1
= control target key start
LH: loop header
LB: loop body
LE: loop exit
PB: predicated region body
PF: predicated region fallthrough
CT: control target
= control target key end

     0   :  { %s10280_s0 = inlined_call_operand.vmem [shape: bf16[2,4,676], index: 0, kind: input, shape index: {}]   ;;  %s10281_s1 = inlined_call_operand.vmem [shape: bf16[2,4,676], index: 1, kind: input, shape index: {}]   ;;  %s10282_s2 = inlined_call_operand.vmem [shape: bf16[2,1,8], index: 2, kind: input, shape index: {}]   ;;  %s10283_s3 = inlined_call_operand.vmem [shape: bf16[2,1,8], index: 3, kind: input, shape index: {}]   ;;  %s10284_s4 = inlined_call_operand.vmem [shape: bf16[128,4], index: 4, kind: input, shape index: {}]   ;;  %s10285_s5 = inlined_call_operand.vmem [shape: bf16[128,8], index: 5, kind: input, shape index: {}]   ;;  %s10286_s6 = inlined_call_operand.vmem [shape: bf16[128,128], index: 6, kind: input, shape index: {}]   ;;  %s10287_s7 = inlined_call_operand.vmem [shape: bf16[1,128], index: 7, kind: input, shape index: {}]   ;;  %s10288_s8 = inlined_call_operand.vmem [shape: bf16[4,676,128], index: 8, kind: input, shape index: {}]   ;;  %s10289_s9 = inlined_call_operand.vmem [shape: bf16[8,128], index: 9, kind: input, shape index: {}]   ;;  %s10290_s10 = inlined_call_operand.vmem [shape: bf16[128,128], index: 10, kind: input, shape index: {}]   ;;  %s10291_s11 = inlined_call_operand.vmem [shape: bf16[1,128], index: 11, kind: input, shape index: {}]   ;;  %s10292_s12 = inlined_call_operand.vmem [shape: bf16[8,128], index: 12, kind: input, shape index: {}]   ;;  %s10293_s13 = inlined_call_operand.vmem [shape: bf16[128,128], index: 13, kind: input, shape index: {}]   ;;  %s10294_s14 = inlined_call_operand.vmem [shape: bf16[1,128], index: 14, kind: input, shape index: {}]   ;;  %s10295_s15 = inlined_call_operand.hbm [shape: f32[2,1,128], index: 15, kind: output, shape index: {}]  }
   0x1   :  { %10313 = sst [smem:[#allocation8_spill]] %s10280_s0 }
   0x2   :  { %10314 = sst [smem:[#allocation9_spill]] %s10281_s1 }
   0x3   :  { %10315 = sst [smem:[#allocation10_spill]] %s10282_s2 }
   0x4   :  { %10316 = sst [smem:[#allocation11_spill]] %s10283_s3 }
   0x5   :  { %10317 = sst [smem:[#allocation12_spill]] %s10284_s4 }
   0x6   :  { %10318 = sst [smem:[#allocation13_spill]] %s10285_s5 }
   0x7   :  { %10319 = sst [smem:[#allocation14_spill]] %s10286_s6 }
   0x8   :  { %10320 = sst [smem:[#allocation15_spill]] %s10287_s7 }
   0x9   :  { %10321 = sst [smem:[#allocation16_spill]] %s10288_s8 }
   0xa   :  { %10322 = sst [smem:[#allocation17_spill]] %s10289_s9 }
   0xb   :  { %10323 = sst [smem:[#allocation18_spill]] %s10290_s10 }
   0xc   :  { %20 = vsyncpa [#allocation3], 0 }
   0xd   :  { %22 = vsyncpa [#allocation3 + $0x1], 0  ;;  %s7946_s18 = smov 0   ;;  %s7948_s19 = smov 0  }
   0xe   :  { %s7950_s20 = smov 0   ;;  %s7952_s21 = smov 0  }
   0xf LB: > { %10324 = sst [smem:[#allocation5_spill]] %s7854_s20  ;;  %s7967_s22 = sadd.s32 4294967295, %s7858_s21   ;;  %s7858_s21 = sphi %s7952_s21, %s10354_s21   ;;  %s7854_s20 = sphi %s7950_s20, %s10359_s20   ;;  %s7850_s19 = sphi %s7948_s19, %s10358_s19   ;;  %s7846_s18 = sphi %s7946_s18, %s10357_s18  }
  0x10   : > { %s6329_s23 = sadd.s32 4294967294, %s7858_s21   ;;  %s7971_s24 = sadd.s32 1, %s7858_s21  }
  0x11   : > { %10325 = sst [smem:[#allocation6_spill]] %s7971_s24  ;;  %s370_s25 = sadd.s32 1, %s7854_s20 }
  0x12   : > { %s367_s26 = ssub.s32 %s7858_s21, %s7971_s24  ;;  %p380_p0 = scmp.ne.s32.totalorder %s7854_s20, %s7850_s19 }
  0x13   : > { %p368_p1 = scmp.eq.s32.totalorder %s367_s26, 0  ;;  %p381_p2 = scmp.eq.s32.totalorder %s7967_s22, 1 }
  0x14   : > { %p386_p3 = scmp.ne.s32.totalorder %s7850_s19, %s7846_s18  ;;  %p387_p4 = scmp.eq.s32.totalorder %s6329_s23, 1 }
  0x15   : > { %s7982_s27 = scalar_select %p368_p1, %s7854_s20, %s370_s25  }
  0x16   : > { %p7984_p5 = por %p381_p2, %p380_p0  ;;  %p7988_p6 = por %p387_p4, %p386_p3 }
  0x17   : > { %10326 = sst [smem:[#allocation7_spill]] %s7982_s27  ;;  %p6332_p7 = scmp.ge.s32.totalorder %s7858_s21, 1 }
  0x18   : > { %p466_p8 = scmp.lt.s32.totalorder %s7858_s21, 3 }
  0x1a   : > { %p467_p9 = pnand %p6332_p7, %p466_p8 }
  0x1b   : > { %p524_p10 = scmp.lt.s32.totalorder (!%p467_p9), %s7967_s22, 1  ;;  %v651_v0 = vlaneseq (!%p467_p9)  ;;  %v7860_v1 = vmov (!%p467_p9), 1983009808   ;;  %v7861_v3 = vmov (!%p467_p9), 0   ;;  %s10329_s2 = sld [smem:[#allocation10_spill]] (!%p467_p9)  ;;  %vm812_vm0 = vcmask (!%p467_p9), 1041408  }
  0x1c   : > { %470 = sbr.rel (%p467_p9) target bundleno = 2822 (0xb06), region = 80  ;;  %v764_v2 = vunpack.c.l.s4 (!%p467_p9), %v7860_v1  ;;  %863 = vmatprep.mubr.bf16.mxu0 (!%p467_p9), %v7861_v3  ;;  %986 = vmatprep.mubr.bf16.mxu1 (!%p467_p9), %v7861_v3  ;;  %s10330_s0 = sld [smem:[#allocation8_spill]] (!%p467_p9)  ;;  %vm787_vm1 = vcmask (!%p467_p9), 31744   ;;  %vm671_vm2 = vcmask (!%p467_p9), 64512   ;;  %vm2028_vm3 = vcmask (!%p467_p9), 1040384  }
  0x1d   : > { %v652_v4 = vshrl.u32 (!%p467_p9), %v651_v0, 7  ;;  %s10331_s5 = sld [smem:[#allocation13_spill]] (!%p467_p9)  ;;  %s10332_s4 = sld [smem:[#allocation12_spill]] (!%p467_p9)  ;;  %vm2038_vm4 = vcmask (!%p467_p9), 286720   ;;  %vm3269_vm5 = vcmask (!%p467_p9), 1043456   ;;  %vm7863_vm6 = vmmov (!%p467_p9), 0  }
  0x1e   : > { %v765_v5 = vunpack.c.0.s8 (!%p467_p9), %v764_v2  ;;  %s10333_s6 = sld [smem:[#allocation14_spill]] (!%p467_p9)  ;;  %s10334_s7 = sld [smem:[#allocation15_spill]] (!%p467_p9)  ;;  %vm3658_vm7 = vcmask (!%p467_p9), 293888  }
  0x1f   : > { %v653_v7 = vsub.s32 (!%p467_p9), 0, %v652_v4  ;;  %s10336_s1 = sld [smem:[#allocation9_spill]] (!%p467_p9)  ;;  %s10338_s8 = sld [smem:[#allocation16_spill]] (!%p467_p9) }
  0x20   : > { %v8008_v8 = vsub.s32 (!%p467_p9), %v765_v5, %v652_v4  ;;  %s10337_s9 = sld [smem:[#allocation17_spill]] (!%p467_p9)  ;;  %s10351_s10 = sld [smem:[#allocation18_spill]] (!%p467_p9) }
  0x21   : > { %s10352_s3 = sld [smem:[#allocation11_spill]] (!%p467_p9) }
  0x23   : > { %s7998_s30 = scalar_select %p524_p10, %s7967_s22, 1  ;;  %v6865_v17 = vld [vmem:[%s10331_s5] sm:$0xff]   ;;  %v6896_v23 = vld [vmem:[%s10331_s5 + $0x8] sm:$0xff]   ;;  %v6897_v24 = vld [vmem:[%s10331_s5 + $0x10] sm:$0xff]  }
  0x24   : > { %v6866_v19 = vunpack.c.l.bf16 %v6865_v17  ;;  %v6867_v22 = vunpack.c.h.bf16 %v6865_v17  ;;  %v6898_v25 = vld [vmem:[%s10331_s5 + $0x18] sm:$0xff]   ;;  %v8055_v26 = vld [vmem:[%s10332_s4] sm:$0xff]   ;;  %v6870_v29 = vunpack.c.l.bf16 %v6896_v23  ;;  %v6871_v30 = vunpack.c.h.bf16 %v6896_v23  ;;  %v6900_v36 = vld [vmem:[%s10331_s5 + $0x28] sm:$0xff]  }
  0x25   : > { %s10297_s16 = smul.u32 12, %s7998_s30  ;;  %s8005_s25 = scalar_lea.vmem %s10329_s2, %s7998_s30  ;;  %v6899_v31 = vld [vmem:[%s10331_s5 + $0x20] sm:$0xff]   ;;  %v6874_v34 = vunpack.c.l.bf16 %v6897_v24  ;;  %v6875_v35 = vunpack.c.h.bf16 %v6897_v24  ;;  %v8074_v37 = vld [vmem:[%s10332_s4 + $0x8] sm:$0xff]   ;;  %v6878_v40 = vunpack.c.l.bf16 %v6898_v25  ;;  %v6879_v41 = vunpack.c.h.bf16 %v6898_v25  ;;  %v6901_v42 = vld [vmem:[%s10331_s5 + $0x30] sm:$0xff]  }
  0x26   : > { %v648_v6 = vld [vmem:[%s8005_s25] sm:$0x1]  ;;  %v6902_v47 = vld [vmem:[%s10331_s5 + $0x38] sm:$0xff]   ;;  %v6882_v54 = vunpack.c.l.bf16 %v6899_v31  ;;  %v6883_v55 = vunpack.c.h.bf16 %v6899_v31  ;;  %v6886_v58 = vunpack.c.l.bf16 %v6900_v36  ;;  %v6887_v59 = vunpack.c.h.bf16 %v6900_v36 }
  0x27   : > { %s8015_s20 = scalar_lea.vmem %s10330_s0, %s10297_s16  ;;  %v650_v9 = vunpack.c.l.bf16 %v648_v6  ;;  %v6890_v62 = vunpack.c.l.bf16 %v6901_v42  ;;  %v6891_v63 = vunpack.c.h.bf16 %v6901_v42  ;;  %v6894_v2 = vunpack.c.l.bf16 %v6902_v47  ;;  %v7509_v25 = vld [vmem:[%s10332_s4 + $0x20] sm:$0xff]   ;;  %s10335_s0 = smul.u32 12, %s7998_s30 }
  0x28   : > { %v644_v10 = vld [vmem:[%s8015_s20] sm:$0xff]  ;;  %v6343_v18 = vld.sshfl [vmem:[%s8015_s20 + $0x8] sm:$0x33 pattern:$0x76325410]  ;;  %v6895_v4 = vunpack.c.h.bf16 %v6902_v47 }
  0x29   : > { %v762_v11 = vcombine.high %v644_v10, %v644_v10  ;;  %v8019_v12 = vrot.slane %v644_v10, %v8008_v8  ;;  %v8021_v13 = vrot.slane %v650_v9, %v653_v7  ;;  %v8036_v20 = vcombine.high %v6343_v18, %v6343_v18  ;;  %v7507_v10 = vld [vmem:[%s10332_s4 + $0x10] sm:$0xff]   ;;  %s8456_s16 = scalar_lea.vmem %s10336_s1, %s10335_s0 }
  0x2a   : > { %v8039_v21 = vsel %vm812_vm0, %v6343_v18, 0 }
  0x2b   : > { %v8024_v14 = vrot.slane %v762_v11, %v8008_v8  ;;  %v8028_v15 = vcombine.high %v8019_v12, %v8019_v12  ;;  %v814_v16 = vsel %vm812_vm0, %v8019_v12, 0  ;;  %v655_v32 = vmul.f32 %v6866_v19, %v8021_v13 }
  0x2c   : > { %v656_v33 = vmul.f32 %v6867_v22, %v8021_v13  ;;  %v657_v38 = vmul.f32 %v6870_v29, %v8021_v13  ;;  %v658_v39 = vmul.f32 %v6871_v30, %v8021_v13  ;;  %v659_v45 = vmul.f32 %v6874_v34, %v8021_v13  ;;  %v7511_v29 = vld [vmem:[%s10332_s4 + $0x30] sm:$0xff]   ;;  %v7512_v30 = vld [vmem:[%s10332_s4 + $0x38] sm:$0xff]  }
  0x2d   : > { %6344 = vmatprep.subr.msk.bf16.mxu0 %vm812_vm0, %v8028_v15  ;;  %v8059_v27 = vcombine.high %v8024_v14, %v8024_v14  ;;  %v820_v28 = vsel %vm812_vm0, %v8024_v14, 0  ;;  %v672_v43 = vsel %vm671_vm2, %v655_v32, 0.0  ;;  %v660_v46 = vmul.f32 %v6875_v35, %v8021_v13 }
  0x2e   : > { %832 = vmatpush1.bf16.msra.mxu0 %v814_v16  ;;  %v675_v44 = vsel %vm671_vm2, %v656_v33, 0.0  ;;  %673 = vadd.xlane.f32.xlu0 %v672_v43  ;;  %v678_v48 = vsel %vm671_vm2, %v657_v38, 0.0  ;;  %v681_v49 = vsel %vm671_vm2, %v658_v39, 0.0  ;;  %v661_v50 = vmul.f32 %v6878_v40, %v8021_v13 }
  0x2f   : > { %6353 = vmatprep.subr.msk.bf16.mxu0 %vm812_vm0, %v8059_v27  ;;  %7395 = vmatprep.subr.msk.bf16.mxu1 %vm812_vm0, %v8059_v27  ;;  %v662_v51 = vmul.f32 %v6879_v41, %v8021_v13  ;;  %v684_v52 = vsel %vm671_vm2, %v659_v45, 0.0  ;;  %v687_v53 = vsel %vm671_vm2, %v660_v46, 0.0  ;;  %v663_v60 = vmul.f32 %v6882_v54, %v8021_v13 }
  0x30   : > { %7396 = vmatpush1.bf16.msra.mxu1 %v820_v28  ;;  %v690_v56 = vsel %vm671_vm2, %v661_v50, 0.0  ;;  %679 = vadd.xlane.f32.xlu1 %v678_v48  ;;  %v664_v61 = vmul.f32 %v6883_v55, %v8021_v13  ;;  %v665_v0 = vmul.f32 %v6886_v58, %v8021_v13  ;;  %v666_v1 = vmul.f32 %v6887_v59, %v8021_v13 }
  0x31   : > { %6345 = vmatmul.mubr.msk.bf16.vlgmr.msra.gmra.mrb[0].mxu0 %vm787_vm1, %v8055_v26  ;;  %v693_v57 = vsel %vm671_vm2, %v662_v51, 0.0  ;;  %v696_v5 = vsel %vm671_vm2, %v663_v60, 0.0  ;;  %v667_v7 = vmul.f32 %v6890_v62, %v8021_v13  ;;  %v668_v9 = vmul.f32 %v6891_v63, %v8021_v13 }
  0x32   : > { %873 = vmatprep.mubr.bf16.mxu0 %v7861_v3  ;;  %945 = vmatpush1.bf16.msra.mxu0 %v820_v28  ;;  %v699_v6 = vsel %vm671_vm2, %v664_v61, 0.0  ;;  %v702_v11 = vsel %vm671_vm2, %v665_v0, 0.0  ;;  %v705_v16 = vsel %vm671_vm2, %v666_v1, 0.0  ;;  %v669_v17 = vmul.f32 %v6894_v2, %v8021_v13  ;;  %v7510_v28 = vld [vmem:[%s10332_s4 + $0x28] sm:$0xff]  }
  0x33   : > { %6355 = vmatmul.mubr.msk.bf16.vlgmr.msra.gmra.mrb[0].mxu1 %vm787_vm1, %v8074_v37  ;;  %6362 = vmatprep.subr.msk.bf16.mxu0 %vm812_vm0, %v8036_v20  ;;  %v670_v18 = vmul.f32 %v6895_v4, %v8021_v13  ;;  %v708_v19 = vsel %vm671_vm2, %v667_v7, 0.0  ;;  %v711_v22 = vsel %vm671_vm2, %v668_v9, 0.0  ;;  %v7508_v13 = vld [vmem:[%s10332_s4 + $0x18] sm:$0xff]  }
  0x34   : > { %996 = vmatprep.mubr.bf16.mxu1 %v7861_v3  ;;  %676 = vadd.xlane.f32.xlu0 %v675_v44  ;;  %v714_v23 = vsel %vm671_vm2, %v669_v17, 0.0 }
  0x35   : > { %682 = vadd.xlane.f32.xlu1 %v681_v49  ;;  %v717_v24 = vsel %vm671_vm2, %v670_v18, 0.0 }
  0x38   : > { %685 = vadd.xlane.f32.xlu0 %v684_v52 }
  0x39   : > { %6346 = vmatmul.mubr.msk.bf16.gmra.mrb[4].mxu0 %vm787_vm1, %v8074_v37  ;;  %688 = vadd.xlane.f32.xlu1 %v687_v53 }
  0x3a   : > { %883 = vmatprep.mubr.bf16.mxu0 %v7861_v3 }
  0x3b   : > { %6356 = vmatmul.mubr.msk.bf16.gmra.mrb[4].mxu1 %vm787_vm1, %v7507_v10 }
  0x3c   : > { %1006 = vmatprep.mubr.bf16.mxu1 %v7861_v3  ;;  %691 = vadd.xlane.f32.xlu0 %v690_v56 }
  0x3d   : > { %694 = vadd.xlane.f32.xlu1 %v693_v57 }
  0x40   : > { %697 = vadd.xlane.f32.xlu0 %v696_v5 }
  0x41   : > { %6347 = vmatmul.mubr.msk.bf16.gmra.mrb[8].mxu0 %vm787_vm1, %v7507_v10  ;;  %700 = vadd.xlane.f32.xlu1 %v699_v6 }
  0x42   : > { %893 = vmatprep.mubr.bf16.mxu0 %v7861_v3 }
  0x43   : > { %6357 = vmatmul.mubr.msk.bf16.gmra.mrb[8].mxu1 %vm787_vm1, %v7508_v13 }
  0x44   : > { %1016 = vmatprep.mubr.bf16.mxu1 %v7861_v3  ;;  %703 = vadd.xlane.f32.xlu0 %v702_v11 }
  0x45   : > { %706 = vadd.xlane.f32.xlu1 %v705_v16 }
  0x48   : > { %709 = vadd.xlane.f32.xlu0 %v708_v19 }
  0x49   : > { %6348 = vmatmul.mubr.msk.bf16.gmra.mrb[12].mxu0 %vm787_vm1, %v7508_v13  ;;  %712 = vadd.xlane.f32.xlu1 %v711_v22 }
  0x4a   : > { %903 = vmatprep.mubr.bf16.mxu0 %v7861_v3 }
  0x4b   : > { %6358 = vmatmul.mubr.msk.bf16.gmra.mrb[12].mxu1 %vm787_vm1, %v7509_v25 }
  0x4c   : > { %1026 = vmatprep.mubr.bf16.mxu1 %v7861_v3  ;;  %715 = vadd.xlane.f32.xlu0 %v714_v23 }
  0x4d   : > { %718 = vadd.xlane.f32.xlu1 %v717_v24 }
  0x51   : > { %6349 = vmatmul.mubr.msk.bf16.gmra.mrb[16].mxu0 %vm787_vm1, %v7509_v25 }
  0x52   : > { %913 = vmatprep.mubr.bf16.mxu0 %v7861_v3 }
  0x53   : > { %6359 = vmatmul.mubr.msk.bf16.gmra.mrb[16].mxu1 %vm787_vm1, %v7510_v28 }
  0x54   : > { %1036 = vmatprep.mubr.bf16.mxu1 %v7861_v3 }
  0x59   : > { %6350 = vmatmul.mubr.msk.bf16.gmra.mrb[20].mxu0 %vm787_vm1, %v7510_v28 }
  0x5a   : > { %923 = vmatprep.mubr.bf16.mxu0 %v7861_v3 }
  0x5b   : > { %6360 = vmatmul.mubr.msk.bf16.gmra.mrb[20].mxu1 %vm787_vm1, %v7511_v29 }
  0x5c   : > { %1046 = vmatprep.mubr.bf16.mxu1 %v7861_v3 }
  0x61   : > { %6351 = vmatmul.mubr.msk.bf16.gmra.mrb[24].mxu0 %vm787_vm1, %v7511_v29 }
  0x62   : > { %933 = vmatprep.mubr.bf16.mxu0 %v7861_v3 }
  0x63   : > { %6361 = vmatmul.mubr.msk.bf16.gmra.mrb[24].mxu1 %vm787_vm1, %v7512_v30 }
  0x64   : > { %1394 = vmatprep.mubr.bf16.mxu1 %v7861_v3 }
  0x69   : > { %6352 = vmatmul.mubr.msk.bf16.gmra.mrb[28].mxu0 %vm787_vm1, %v7512_v30 }
  0x6a   : > { %976 = vmatprep.mubr.bf16.mxu0 %v7861_v3 }
  0x71   : > { %6354 = vmatmul.mubr.msk.bf16.vlgmr.msra.gmra.mrb[32].mxu0 %vm787_vm1, %v8055_v26 }
  0x72   : > { %1058 = vmatpush1.bf16.msra.mxu0 %v8039_v21  ;;  %1089 = vmatprep.mubr.bf16.mxu0 %v7861_v3 }
  0x79   : > { %6363 = vmatmul.mubr.msk.bf16.vlgmr.msra.gmra.mrb[36].mxu0 %vm787_vm1, %v8055_v26 }
  0x7a   : > { %1099 = vmatprep.mubr.bf16.mxu0 %v7861_v3 }
  0x81   : > { %6364 = vmatmul.mubr.msk.bf16.gmra.mrb[40].mxu0 %vm787_vm1, %v8074_v37 }
  0x82   : > { %1109 = vmatprep.mubr.bf16.mxu0 %v7861_v3 }
  0x89   : > { %6365 = vmatmul.mubr.msk.bf16.gmra.mrb[44].mxu0 %vm787_vm1, %v7507_v10 }
  0x8a   : > { %1119 = vmatprep.mubr.bf16.mxu0 %v7861_v3 }
  0x91   : > { %6366 = vmatmul.mubr.msk.bf16.gmra.mrb[48].mxu0 %vm787_vm1, %v7508_v13 }
  0x92   : > { %1129 = vmatprep.mubr.bf16.mxu0 %v7861_v3 }
  0x99   : > { %6367 = vmatmul.mubr.msk.bf16.gmra.mrb[52].mxu0 %vm787_vm1, %v7509_v25 }
  0x9a   : > { %1139 = vmatprep.mubr.bf16.mxu0 %v7861_v3 }
  0xa1   : > { %6368 = vmatmul.mubr.msk.bf16.gmra.mrb[56].mxu0 %vm787_vm1, %v7510_v28 }
  0xa2   : > { %1149 = vmatprep.mubr.bf16.mxu0 %v7861_v3 }
  0xa9   : > { %6369 = vmatmul.mubr.msk.bf16.gmra.mrb[60].mxu0 %vm787_vm1, %v7511_v29 }
  0xaa   : > { %1159 = vmatprep.mubr.bf16.mxu0 %v7861_v3 }
  0xb1   : > { %6370 = vmatmul.mubr.msk.bf16.gmra.mrb[64].mxu0 %vm787_vm1, %v7512_v30 }
  0xb2   : > { %1507 = vmatprep.mubr.bf16.mxu0 %v7861_v3 }
  0xbb   : > { %v8191_v21 = vpop.xlane.xlu0 %673 }
  0xbd   : > { %v8193_v26 = vpop.xlane.xlu1 %679 }
  0xc1   : > { %v8195_v32 = vpop.xlane.xlu0 %676 }
  0xc2   : > { %v8202_v43 = vpop.xlane.xlu1 %682 }
  0xc5   : > { %v8208_v62 = vpop.xlane.xlu0 %685 }
  0xc6   : > { %v8218_v11 = vpop.xlane.xlu1 %688 }
 0x104   : > { %v865_v31 = vpop.f32.mrb[0].mxu0 }
 0x105   : > { %v866_v33 = vadd.f32 %v865_v31, %v8191_v21  ;;  %v867_v34 = vpop.f32.mrb[1].mxu0 }
 0x106   : > { %v868_v35 = vadd.f32 %v867_v34, %v8191_v21  ;;  %v869_v36 = vpop.f32.mrb[2].mxu0  ;;  %v988_v37 = vpop.f32.mrb[0].mxu1 }
 0x107   : > { %v870_v38 = vadd.f32 %v869_v36, %v8195_v32  ;;  %v871_v39 = vpop.f32.mrb[3].mxu0  ;;  %v989_v40 = vadd.f32 %v988_v37, %v8193_v26  ;;  %v990_v41 = vpop.f32.mrb[1].mxu1  ;;  %v1170_v46 = vmax.f32 %v866_v33, 0.0 }
 0x108   : > { %v872_v42 = vadd.f32 %v871_v39, %v8195_v32  ;;  %v991_v44 = vadd.f32 %v990_v41, %v8193_v26  ;;  %v992_v45 = vpop.f32.mrb[2].mxu1  ;;  %v1171_v51 = vmax.f32 %v868_v35, 0.0 }
 0x109   : > { %v1176_v47 = vmax.f32 %v870_v38, 0.0  ;;  %v1184_v48 = vmax.f32 %v989_v40, 0.0  ;;  %v993_v49 = vadd.f32 %v992_v45, %v8202_v43  ;;  %v994_v50 = vpop.f32.mrb[3].mxu1  ;;  %v8224_v38 = vpop.xlane.xlu0 %691 }
 0x10a   : > { %v1177_v52 = vmax.f32 %v872_v42, 0.0  ;;  %v1185_v53 = vmax.f32 %v991_v44, 0.0  ;;  %v995_v54 = vadd.f32 %v994_v50, %v8202_v43  ;;  %v8234_v50 = vpop.xlane.xlu1 %694 }
 0x10b   : > { %v1266_v55 = vpack.c.bf16 %v1176_v47, %v1170_v46  ;;  %v1190_v56 = vmax.f32 %v993_v49, 0.0 }
 0x10c   : > { %v875_v57 = vpop.f32.mrb[4].mxu0  ;;  %v1267_v58 = vpack.c.bf16 %v1177_v52, %v1171_v51  ;;  %v1191_v59 = vmax.f32 %v995_v54, 0.0 }
 0x10d   : > { %v876_v60 = vadd.f32 %v875_v57, %v8193_v26  ;;  %v877_v61 = vpop.f32.mrb[5].mxu0  ;;  %v8210_v63 = vpack.c.bf16 %v1190_v56, %v1184_v48 }
 0x10e   : > { %v878_v0 = vadd.f32 %v877_v61, %v8193_v26  ;;  %v879_v1 = vpop.f32.mrb[6].mxu0  ;;  %1362 = vmatprep.subr.bf16.mxu1 %v1267_v58  ;;  %v8213_v2 = vpack.c.bf16 %v1191_v59, %v1185_v53  ;;  %v998_v4 = vpop.f32.mrb[4].mxu1 }
 0x10f   : > { %v880_v5 = vadd.f32 %v879_v1, %v8202_v43  ;;  %v881_v6 = vpop.f32.mrb[7].mxu0  ;;  %1363 = vmatpush1.bf16.msra.mxu1 %v1266_v55  ;;  %v999_v7 = vadd.f32 %v998_v4, %v8208_v62  ;;  %v1000_v9 = vpop.f32.mrb[5].mxu1  ;;  %v1182_v18 = vmax.f32 %v876_v60, 0.0 }
 0x110   : > { %v882_v10 = vadd.f32 %v881_v6, %v8202_v43  ;;  %v1001_v16 = vadd.f32 %v1000_v9, %v8208_v62  ;;  %v1002_v17 = vpop.f32.mrb[6].mxu1  ;;  %v1183_v13 = vmax.f32 %v878_v0, 0.0 }
 0x111   : > { %v1188_v19 = vmax.f32 %v880_v5, 0.0  ;;  %v1196_v22 = vmax.f32 %v999_v7, 0.0  ;;  %v1003_v23 = vadd.f32 %v1002_v17, %v8218_v11  ;;  %v1004_v24 = vpop.f32.mrb[7].mxu1 }
 0x112   : > { %v1189_v25 = vmax.f32 %v882_v10, 0.0  ;;  %v1197_v28 = vmax.f32 %v1001_v16, 0.0  ;;  %v1005_v29 = vadd.f32 %v1004_v24, %v8218_v11  ;;  %v8240_v10 = vpop.xlane.xlu0 %697 }
 0x113   : > { %v1272_v30 = vpack.c.bf16 %v1188_v19, %v1182_v18  ;;  %v1202_v31 = vmax.f32 %v1003_v23, 0.0 }
 0x114   : > { %v885_v33 = vpop.f32.mrb[8].mxu0  ;;  %v1273_v34 = vpack.c.bf16 %v1189_v25, %v1183_v13  ;;  %v1203_v35 = vmax.f32 %v1005_v29, 0.0  ;;  %v8250_v29 = vpop.xlane.xlu1 %700 }
 0x115   : > { %v886_v36 = vadd.f32 %v885_v33, %v8208_v62  ;;  %v887_v37 = vpop.f32.mrb[9].mxu0  ;;  %v8226_v39 = vpack.c.bf16 %v1202_v31, %v1196_v22 }
 0x116   : > { %v888_v40 = vadd.f32 %v887_v37, %v8208_v62  ;;  %v889_v41 = vpop.f32.mrb[10].mxu0  ;;  %1364 = vmatprep.subr.bf16.mxu1 %v1273_v34  ;;  %v8229_v42 = vpack.c.bf16 %v1203_v35, %v1197_v28  ;;  %v1008_v44 = vpop.f32.mrb[8].mxu1 }
 0x117   : > { %v890_v45 = vadd.f32 %v889_v41, %v8218_v11  ;;  %v891_v46 = vpop.f32.mrb[11].mxu0  ;;  %1365 = vmatpush1.bf16.msra.mxu1 %v1272_v30  ;;  %v1009_v47 = vadd.f32 %v1008_v44, %v8224_v38  ;;  %v1010_v48 = vpop.f32.mrb[9].mxu1  ;;  %v1194_v53 = vmax.f32 %v886_v36, 0.0 }
 0x118   : > { %v892_v49 = vadd.f32 %v891_v46, %v8218_v11  ;;  %v1011_v51 = vadd.f32 %v1010_v48, %v8224_v38  ;;  %v1012_v52 = vpop.f32.mrb[10].mxu1  ;;  %v1195_v58 = vmax.f32 %v888_v40, 0.0 }
 0x119   : > { %v1200_v54 = vmax.f32 %v890_v45, 0.0  ;;  %v1208_v55 = vmax.f32 %v1009_v47, 0.0  ;;  %v1013_v56 = vadd.f32 %v1012_v52, %v8234_v50  ;;  %v1014_v57 = vpop.f32.mrb[11].mxu1 }
 0x11a   : > { %v1201_v59 = vmax.f32 %v892_v49, 0.0  ;;  %v1209_v60 = vmax.f32 %v1011_v51, 0.0  ;;  %v1015_v61 = vadd.f32 %v1014_v57, %v8234_v50 }
 0x11b   : > { %v1278_v0 = vpack.c.bf16 %v1200_v54, %v1194_v53  ;;  %v1214_v1 = vmax.f32 %v1013_v56, 0.0  ;;  %v8256_v54 = vpop.xlane.xlu0 %703 }
 0x11c   : > { %v895_v4 = vpop.f32.mrb[12].mxu0  ;;  %v1279_v5 = vpack.c.bf16 %v1201_v59, %v1195_v58  ;;  %v1215_v6 = vmax.f32 %v1015_v61, 0.0 }
 0x11d   : > { %v896_v7 = vadd.f32 %v895_v4, %v8224_v38  ;;  %v897_v9 = vpop.f32.mrb[13].mxu0  ;;  %v8242_v16 = vpack.c.bf16 %v1214_v1, %v1208_v55 }
 0x11e   : > { %v898_v17 = vadd.f32 %v897_v9, %v8224_v38  ;;  %v899_v18 = vpop.f32.mrb[14].mxu0  ;;  %1366 = vmatprep.subr.bf16.mxu1 %v1279_v5  ;;  %v8245_v19 = vpack.c.bf16 %v1215_v6, %v1209_v60  ;;  %v1018_v22 = vpop.f32.mrb[12].mxu1 }
 0x11f   : > { %v900_v23 = vadd.f32 %v899_v18, %v8234_v50  ;;  %v901_v24 = vpop.f32.mrb[15].mxu0  ;;  %1367 = vmatpush1.bf16.msra.mxu1 %v1278_v0  ;;  %v1019_v13 = vadd.f32 %v1018_v22, %v8240_v10  ;;  %v1020_v25 = vpop.f32.mrb[13].mxu1  ;;  %v1206_v33 = vmax.f32 %v896_v7, 0.0 }
 0x120   : > { %v902_v28 = vadd.f32 %v901_v24, %v8234_v50  ;;  %v1021_v30 = vadd.f32 %v1020_v25, %v8240_v10  ;;  %v1022_v31 = vpop.f32.mrb[14].mxu1  ;;  %v1207_v40 = vmax.f32 %v898_v17, 0.0  ;;  %v8266_v5 = vpop.xlane.xlu1 %706 }
 0x121   : > { %v1212_v34 = vmax.f32 %v900_v23, 0.0  ;;  %v1220_v35 = vmax.f32 %v1019_v13, 0.0  ;;  %v1023_v36 = vadd.f32 %v1022_v31, %v8250_v29  ;;  %v1024_v37 = vpop.f32.mrb[15].mxu1 }
 0x122   : > { %v1213_v41 = vmax.f32 %v902_v28, 0.0  ;;  %v1221_v44 = vmax.f32 %v1021_v30, 0.0  ;;  %v1025_v45 = vadd.f32 %v1024_v37, %v8250_v29 }
 0x123   : > { %v1284_v46 = vpack.c.bf16 %v1212_v34, %v1206_v33  ;;  %v1226_v47 = vmax.f32 %v1023_v36, 0.0 }
 0x124   : > { %v905_v48 = vpop.f32.mrb[16].mxu0  ;;  %v1285_v49 = vpack.c.bf16 %v1213_v41, %v1207_v40  ;;  %v1227_v51 = vmax.f32 %v1025_v45, 0.0  ;;  %v8272_v40 = vpop.xlane.xlu0 %709 }
 0x125   : > { %v906_v52 = vadd.f32 %v905_v48, %v8240_v10  ;;  %v907_v53 = vpop.f32.mrb[17].mxu0  ;;  %v8258_v55 = vpack.c.bf16 %v1226_v47, %v1220_v35 }
 0x126   : > { %v908_v56 = vadd.f32 %v907_v53, %v8240_v10  ;;  %v909_v57 = vpop.f32.mrb[18].mxu0  ;;  %1368 = vmatprep.subr.bf16.mxu1 %v1285_v49  ;;  %v8261_v58 = vpack.c.bf16 %v1227_v51, %v1221_v44  ;;  %v1028_v59 = vpop.f32.mrb[16].mxu1 }
 0x127   : > { %v910_v60 = vadd.f32 %v909_v57, %v8250_v29  ;;  %v911_v61 = vpop.f32.mrb[19].mxu0  ;;  %1369 = vmatpush1.bf16.msra.mxu1 %v1284_v46  ;;  %v1029_v0 = vadd.f32 %v1028_v59, %v8256_v54  ;;  %v1030_v1 = vpop.f32.mrb[17].mxu1  ;;  %v1218_v9 = vmax.f32 %v906_v52, 0.0 }
 0x128   : > { %v912_v4 = vadd.f32 %v911_v61, %v8250_v29  ;;  %v1031_v6 = vadd.f32 %v1030_v1, %v8256_v54  ;;  %v1032_v7 = vpop.f32.mrb[18].mxu1  ;;  %v1219_v24 = vmax.f32 %v908_v56, 0.0  ;;  %v8282_v56 = vpop.xlane.xlu1 %712 }
 0x129   : > { %v1224_v17 = vmax.f32 %v910_v60, 0.0  ;;  %v1232_v18 = vmax.f32 %v1029_v0, 0.0  ;;  %v1033_v22 = vadd.f32 %v1032_v7, %v8266_v5  ;;  %v1034_v23 = vpop.f32.mrb[19].mxu1 }
 0x12a   : > { %v1225_v13 = vmax.f32 %v912_v4, 0.0  ;;  %v1233_v25 = vmax.f32 %v1031_v6, 0.0  ;;  %v1035_v28 = vadd.f32 %v1034_v23, %v8266_v5 }
 0x12b   : > { %v1290_v30 = vpack.c.bf16 %v1224_v17, %v1218_v9  ;;  %v1238_v31 = vmax.f32 %v1033_v22, 0.0 }
 0x12c   : > { %v915_v33 = vpop.f32.mrb[20].mxu0  ;;  %v1291_v34 = vpack.c.bf16 %v1225_v13, %v1219_v24  ;;  %v1239_v35 = vmax.f32 %v1035_v28, 0.0 }
 0x12d   : > { %v916_v36 = vadd.f32 %v915_v33, %v8256_v54  ;;  %v917_v37 = vpop.f32.mrb[21].mxu0  ;;  %v8274_v41 = vpack.c.bf16 %v1238_v31, %v1232_v18 }
 0x12e   : > { %v918_v44 = vadd.f32 %v917_v37, %v8256_v54  ;;  %v919_v45 = vpop.f32.mrb[22].mxu0  ;;  %1370 = vmatprep.subr.bf16.mxu1 %v1291_v34  ;;  %v8277_v46 = vpack.c.bf16 %v1239_v35, %v1233_v25  ;;  %v1038_v47 = vpop.f32.mrb[20].mxu1 }
 0x12f   : > { %v920_v48 = vadd.f32 %v919_v45, %v8266_v5  ;;  %v921_v49 = vpop.f32.mrb[23].mxu0  ;;  %1371 = vmatpush1.bf16.msra.mxu1 %v1290_v30  ;;  %v1039_v51 = vadd.f32 %v1038_v47, %v8272_v40  ;;  %v1040_v52 = vpop.f32.mrb[21].mxu1  ;;  %v1230_v60 = vmax.f32 %v916_v36, 0.0 }
 0x130   : > { %v922_v53 = vadd.f32 %v921_v49, %v8266_v5  ;;  %v1041_v57 = vadd.f32 %v1040_v52, %v8272_v40  ;;  %v1042_v59 = vpop.f32.mrb[22].mxu1  ;;  %v1231_v6 = vmax.f32 %v918_v44, 0.0  ;;  %v8288_v30 = vpop.xlane.xlu0 %715 }
 0x131   : > { %v1236_v61 = vmax.f32 %v920_v48, 0.0  ;;  %v1244_v0 = vmax.f32 %v1039_v51, 0.0  ;;  %v1043_v1 = vadd.f32 %v1042_v59, %v8282_v56  ;;  %v1044_v4 = vpop.f32.mrb[23].mxu1  ;;  %v8298_v49 = vpop.xlane.xlu1 %718 }
 0x132   : > { %v1237_v7 = vmax.f32 %v922_v53, 0.0  ;;  %v1245_v9 = vmax.f32 %v1041_v57, 0.0  ;;  %v1045_v17 = vadd.f32 %v1044_v4, %v8282_v56 }
 0x133   : > { %v1296_v18 = vpack.c.bf16 %v1236_v61, %v1230_v60  ;;  %v1250_v22 = vmax.f32 %v1043_v1, 0.0 }
 0x134   : > { %v1297_v23 = vpack.c.bf16 %v1237_v7, %v1231_v6  ;;  %v925_v24 = vpop.f32.mrb[24].mxu0  ;;  %v1251_v13 = vmax.f32 %v1045_v17, 0.0 }
 0x135   : > { %v926_v25 = vadd.f32 %v925_v24, %v8272_v40  ;;  %v927_v28 = vpop.f32.mrb[25].mxu0  ;;  %v8290_v31 = vpack.c.bf16 %v1250_v22, %v1244_v0 }
 0x136   : > { %v928_v33 = vadd.f32 %v927_v28, %v8272_v40  ;;  %v929_v34 = vpop.f32.mrb[26].mxu0  ;;  %1372 = vmatprep.subr.bf16.mxu1 %v1297_v23  ;;  %v8293_v35 = vpack.c.bf16 %v1251_v13, %v1245_v9  ;;  %v1048_v36 = vpop.f32.mrb[24].mxu1 }
 0x137   : > { %v930_v37 = vadd.f32 %v929_v34, %v8282_v56  ;;  %v931_v44 = vpop.f32.mrb[27].mxu0  ;;  %1373 = vmatpush1.bf16.msra.mxu1 %v1296_v18  ;;  %v1049_v45 = vadd.f32 %v1048_v36, %v8288_v30  ;;  %v1050_v47 = vpop.f32.mrb[25].mxu1  ;;  %v1242_v53 = vmax.f32 %v926_v25, 0.0 }
 0x138   : > { %v932_v48 = vadd.f32 %v931_v44, %v8282_v56  ;;  %v1051_v51 = vadd.f32 %v1050_v47, %v8288_v30  ;;  %v1052_v52 = vpop.f32.mrb[26].mxu1  ;;  %v1243_v0 = vmax.f32 %v928_v33, 0.0 }
 0x139   : > { %v1248_v57 = vmax.f32 %v930_v37, 0.0  ;;  %v1256_v59 = vmax.f32 %v1049_v45, 0.0  ;;  %v1053_v60 = vadd.f32 %v1052_v52, %v8298_v49  ;;  %v1054_v61 = vpop.f32.mrb[27].mxu1 }
 0x13a   : > { %v1249_v1 = vmax.f32 %v932_v48, 0.0  ;;  %v1257_v4 = vmax.f32 %v1051_v51, 0.0  ;;  %v1055_v6 = vadd.f32 %v1054_v61, %v8298_v49 }
 0x13b   : > { %v1302_v7 = vpack.c.bf16 %v1248_v57, %v1242_v53  ;;  %v1262_v9 = vmax.f32 %v1053_v60, 0.0 }
 0x13c   : > { %v1303_v17 = vpack.c.bf16 %v1249_v1, %v1243_v0  ;;  %v935_v18 = vpop.f32.mrb[28].mxu0  ;;  %v1263_v22 = vmax.f32 %v1055_v6, 0.0  ;;  %v8316_v0 = vld [vmem:[%s10333_s6] sm:$0xff]  }
 0x13d   : > { %v936_v23 = vadd.f32 %v935_v18, %v8288_v30  ;;  %v937_v24 = vpop.f32.mrb[29].mxu0  ;;  %v8304_v13 = vpack.c.bf16 %v1262_v9, %v1256_v59 }
 0x13e   : > { %v938_v25 = vadd.f32 %v937_v24, %v8288_v30  ;;  %v939_v28 = vpop.f32.mrb[30].mxu0  ;;  %1374 = vmatprep.subr.bf16.mxu1 %v1303_v17  ;;  %v8307_v34 = vpack.c.bf16 %v1263_v22, %v1257_v4 }
 0x13f   : > { %v940_v33 = vadd.f32 %v939_v28, %v8298_v49  ;;  %v941_v36 = vpop.f32.mrb[31].mxu0  ;;  %1375 = vmatpush1.bf16.msra.mxu1 %v1302_v7  ;;  %v1254_v44 = vmax.f32 %v936_v23, 0.0 }
 0x140   : > { %v942_v37 = vadd.f32 %v941_v36, %v8298_v49  ;;  %v1255_v47 = vmax.f32 %v938_v25, 0.0 }
 0x141   : > { %v1260_v45 = vmax.f32 %v940_v33, 0.0 }
 0x142   : > { %v1261_v48 = vmax.f32 %v942_v37, 0.0  ;;  %v8327_v37 = vld [vmem:[%s10333_s6 + $0x8] sm:$0xff]  }
 0x143   : > { %v1308_v51 = vpack.c.bf16 %v1260_v45, %v1254_v44 }
 0x144   : > { %v1309_v52 = vpack.c.bf16 %v1261_v48, %v1255_v47  ;;  %v978_v53 = vpop.f32.mrb[32].mxu0 }
 0x145   : > { %v979_v57 = vadd.f32 %v978_v53, %v8191_v21  ;;  %v980_v59 = vpop.f32.mrb[33].mxu0 }
 0x146   : > { %v981_v60 = vadd.f32 %v980_v59, %v8191_v21  ;;  %v982_v61 = vpop.f32.mrb[34].mxu0  ;;  %1376 = vmatprep.subr.bf16.mxu1 %v1309_v52 }
 0x147   : > { %v983_v1 = vadd.f32 %v982_v61, %v8195_v32  ;;  %v984_v4 = vpop.f32.mrb[35].mxu0  ;;  %1377 = vmatpush1.bf16.msra.mxu1 %v1308_v51  ;;  %v1172_v7 = vmax.f32 %v979_v57, 0.0 }
 0x148   : > { %v985_v6 = vadd.f32 %v984_v4, %v8195_v32  ;;  %v1173_v17 = vmax.f32 %v981_v60, 0.0 }
 0x149   : > { %v1178_v9 = vmax.f32 %v983_v1, 0.0 }
 0x14a   : > { %v1179_v18 = vmax.f32 %v985_v6, 0.0  ;;  %1395 = vmatmul.mubr.bf16.vlgmr.msra.gmra.mrb[28].mxu1 %v8316_v0  ;;  %v8341_v6 = vld [vmem:[%s10333_s6 + $0x10] sm:$0xff]  }
 0x14b   : > { %v1268_v22 = vpack.c.bf16 %v1178_v9, %v1172_v7  ;;  %1404 = vmatprep.mubr.bf16.mxu1 %v7861_v3 }
 0x14c   : > { %v1269_v23 = vpack.c.bf16 %v1179_v18, %v1173_v17  ;;  %v1091_v24 = vpop.f32.mrb[36].mxu0 }
 0x14d   : > { %v1092_v25 = vadd.f32 %v1091_v24, %v8191_v21  ;;  %v1093_v28 = vpop.f32.mrb[37].mxu0 }
 0x14e   : > { %v1094_v33 = vadd.f32 %v1093_v28, %v8191_v21  ;;  %v1095_v36 = vpop.f32.mrb[38].mxu0  ;;  %1475 = vmatprep.subr.bf16.mxu0 %v1269_v23 }
 0x14f   : > { %v1096_v44 = vadd.f32 %v1095_v36, %v8195_v32  ;;  %v1097_v45 = vpop.f32.mrb[39].mxu0  ;;  %1476 = vmatpush1.bf16.msra.mxu0 %v1268_v22  ;;  %v1174_v48 = vmax.f32 %v1092_v25, 0.0  ;;  %v8356_v36 = vld [vmem:[%s10333_s6 + $0x18] sm:$0xff]  }
 0x150   : > { %v1098_v47 = vadd.f32 %v1097_v45, %v8195_v32  ;;  %1477 = vmatprep.subr.bf16.mxu0 %v8213_v2  ;;  %v1175_v52 = vmax.f32 %v1094_v33, 0.0 }
 0x151   : > { %v1180_v51 = vmax.f32 %v1096_v44, 0.0 }
 0x152   : > { %v1181_v53 = vmax.f32 %v1098_v47, 0.0  ;;  %1405 = vmatmul.mubr.bf16.gmra.mrb[32].mxu1 %v8327_v37 }
 0x153   : > { %v1270_v57 = vpack.c.bf16 %v1180_v51, %v1174_v48  ;;  %1478 = vmatpush1.bf16.msra.mxu0 %v8210_v63  ;;  %1414 = vmatprep.mubr.bf16.mxu1 %v7861_v3 }
 0x154   : > { %v1271_v59 = vpack.c.bf16 %v1181_v53, %v1175_v52  ;;  %v1101_v60 = vpop.f32.mrb[40].mxu0  ;;  %1479 = vmatprep.subr.bf16.mxu0 %v8229_v42 }
 0x155   : > { %v1102_v61 = vadd.f32 %v1101_v60, %v8193_v26  ;;  %v1103_v1 = vpop.f32.mrb[41].mxu0 }
 0x156   : > { %v1104_v2 = vadd.f32 %v1103_v1, %v8193_v26  ;;  %v1105_v4 = vpop.f32.mrb[42].mxu0  ;;  %1588 = vmatprep.subr.bf16.mxu1 %v1271_v59 }
 0x157   : > { %v1106_v63 = vadd.f32 %v1105_v4, %v8202_v43  ;;  %v1107_v7 = vpop.f32.mrb[43].mxu0  ;;  %1480 = vmatpush1.bf16.msra.mxu0 %v8226_v39  ;;  %1589 = vmatpush1.bf16.msra.mxu1 %v1270_v57  ;;  %v1186_v9 = vmax.f32 %v1102_v61, 0.0  ;;  %v8371_v61 = vld [vmem:[%s10333_s6 + $0x20] sm:$0xff]  }
 0x158   : > { %v1108_v42 = vadd.f32 %v1107_v7, %v8202_v43  ;;  %1481 = vmatprep.subr.bf16.mxu0 %v8245_v19  ;;  %v1187_v18 = vmax.f32 %v1104_v2, 0.0 }
 0x159   : > { %v1192_v17 = vmax.f32 %v1106_v63, 0.0 }
 0x15a   : > { %v1193_v22 = vmax.f32 %v1108_v42, 0.0  ;;  %1415 = vmatmul.mubr.bf16.gmra.mrb[36].mxu1 %v8341_v6 }
 0x15b   : > { %v1276_v23 = vpack.c.bf16 %v1192_v17, %v1186_v9  ;;  %1482 = vmatpush1.bf16.msra.mxu0 %v8242_v16  ;;  %1424 = vmatprep.mubr.bf16.mxu1 %v7861_v3 }
 0x15c   : > { %v1277_v24 = vpack.c.bf16 %v1193_v22, %v1187_v18  ;;  %v1111_v25 = vpop.f32.mrb[44].mxu0  ;;  %1483 = vmatprep.subr.bf16.mxu0 %v8261_v58 }
 0x15d   : > { %v1112_v39 = vadd.f32 %v1111_v25, %v8208_v62  ;;  %v1113_v28 = vpop.f32.mrb[45].mxu0 }
 0x15e   : > { %v1114_v19 = vadd.f32 %v1113_v28, %v8208_v62  ;;  %v1115_v33 = vpop.f32.mrb[46].mxu0  ;;  %1590 = vmatprep.subr.bf16.mxu1 %v1277_v24 }
 0x15f   : > { %v1116_v16 = vadd.f32 %v1115_v33, %v8218_v11  ;;  %v1117_v44 = vpop.f32.mrb[47].mxu0  ;;  %1484 = vmatpush1.bf16.msra.mxu0 %v8258_v55  ;;  %1591 = vmatpush1.bf16.msra.mxu1 %v1276_v23  ;;  %v1198_v45 = vmax.f32 %v1112_v39, 0.0 }
 0x160   : > { %v1118_v58 = vadd.f32 %v1117_v44, %v8218_v11  ;;  %1485 = vmatprep.subr.bf16.mxu0 %v8277_v46  ;;  %v1199_v48 = vmax.f32 %v1114_v19, 0.0 }
 0x161   : > { %v1204_v47 = vmax.f32 %v1116_v16, 0.0 }
 0x162   : > { %v1205_v51 = vmax.f32 %v1118_v58, 0.0  ;;  %1425 = vmatmul.mubr.bf16.gmra.mrb[40].mxu1 %v8356_v36 }
 0x163   : > { %v1282_v52 = vpack.c.bf16 %v1204_v47, %v1198_v45  ;;  %1486 = vmatpush1.bf16.msra.mxu0 %v8274_v41  ;;  %1434 = vmatprep.mubr.bf16.mxu1 %v7861_v3 }
 0x164   : > { %v1283_v53 = vpack.c.bf16 %v1205_v51, %v1199_v48  ;;  %v1121_v57 = vpop.f32.mrb[48].mxu0  ;;  %1487 = vmatprep.subr.bf16.mxu0 %v8293_v35 }
 0x165   : > { %v1122_v55 = vadd.f32 %v1121_v57, %v8224_v38  ;;  %v1123_v59 = vpop.f32.mrb[49].mxu0 }
 0x166   : > { %v1124_v46 = vadd.f32 %v1123_v59, %v8224_v38  ;;  %v1125_v60 = vpop.f32.mrb[50].mxu0  ;;  %1592 = vmatprep.subr.bf16.mxu1 %v1283_v53 }
 0x167   : > { %v1126_v41 = vadd.f32 %v1125_v60, %v8234_v50  ;;  %v1127_v1 = vpop.f32.mrb[51].mxu0  ;;  %1488 = vmatpush1.bf16.msra.mxu0 %v8290_v31  ;;  %1593 = vmatpush1.bf16.msra.mxu1 %v1282_v52  ;;  %v1210_v2 = vmax.f32 %v1122_v55, 0.0  ;;  %v8399_v52 = vld [vmem:[%s10333_s6 + $0x30] sm:$0xff]  }
 0x168   : > { %v1128_v35 = vadd.f32 %v1127_v1, %v8234_v50  ;;  %1489 = vmatprep.subr.bf16.mxu0 %v8307_v34  ;;  %v1211_v63 = vmax.f32 %v1124_v46, 0.0  ;;  %v8386_v34 = vld [vmem:[%s10333_s6 + $0x28] sm:$0xff]  }
 0x169   : > { %v1216_v4 = vmax.f32 %v1126_v41, 0.0 }
 0x16a   : > { %v1217_v7 = vmax.f32 %v1128_v35, 0.0  ;;  %1435 = vmatmul.mubr.bf16.gmra.mrb[44].mxu1 %v8371_v61 }
 0x16b   : > { %v1288_v42 = vpack.c.bf16 %v1216_v4, %v1210_v2  ;;  %1490 = vmatpush1.bf16.msra.mxu0 %v8304_v13  ;;  %1444 = vmatprep.mubr.bf16.mxu1 %v7861_v3 }
 0x16c   : > { %v1289_v9 = vpack.c.bf16 %v1217_v7, %v1211_v63  ;;  %v1131_v17 = vpop.f32.mrb[52].mxu0 }
 0x16d   : > { %v1132_v31 = vadd.f32 %v1131_v17, %v8240_v10  ;;  %v1133_v18 = vpop.f32.mrb[53].mxu0 }
 0x16e   : > { %v1134_v22 = vadd.f32 %v1133_v18, %v8240_v10  ;;  %v1135_v23 = vpop.f32.mrb[54].mxu0  ;;  %1508 = vmatmul.mubr.bf16.vlgmr.msra.gmra.mrb[68].mxu0 %v8316_v0  ;;  %1594 = vmatprep.subr.bf16.mxu1 %v1289_v9  ;;  %v7520_v9 = vld [vmem:[%s10333_s6 + $0x38] sm:$0xff]  }
 0x16f   : > { %v1136_v13 = vadd.f32 %v1135_v23, %v8250_v29  ;;  %v1137_v24 = vpop.f32.mrb[55].mxu0  ;;  %1595 = vmatpush1.bf16.msra.mxu1 %v1288_v42  ;;  %1517 = vmatprep.mubr.bf16.mxu0 %v7861_v3  ;;  %v1222_v39 = vmax.f32 %v1132_v31, 0.0 }
 0x170   : > { %v1138_v25 = vadd.f32 %v1137_v24, %v8250_v29  ;;  %v1223_v19 = vmax.f32 %v1134_v22, 0.0 }
 0x171   : > { %v1228_v28 = vmax.f32 %v1136_v13, 0.0 }
 0x172   : > { %v1229_v33 = vmax.f32 %v1138_v25, 0.0  ;;  %1445 = vmatmul.mubr.bf16.gmra.mrb[48].mxu1 %v8386_v34 }
 0x173   : > { %v1294_v16 = vpack.c.bf16 %v1228_v28, %v1222_v39  ;;  %1454 = vmatprep.mubr.bf16.mxu1 %v7861_v3 }
 0x174   : > { %v1295_v44 = vpack.c.bf16 %v1229_v33, %v1223_v19  ;;  %v1141_v58 = vpop.f32.mrb[56].mxu0 }
 0x175   : > { %v1142_v45 = vadd.f32 %v1141_v58, %v8256_v54  ;;  %v1143_v47 = vpop.f32.mrb[57].mxu0 }
 0x176   : > { %v1144_v48 = vadd.f32 %v1143_v47, %v8256_v54  ;;  %v1145_v51 = vpop.f32.mrb[58].mxu0  ;;  %1518 = vmatmul.mubr.bf16.gmra.mrb[72].mxu0 %v8327_v37  ;;  %1596 = vmatprep.subr.bf16.mxu1 %v1295_v44 }
 0x177   : > { %v1146_v53 = vadd.f32 %v1145_v51, %v8266_v5  ;;  %v1147_v57 = vpop.f32.mrb[59].mxu0  ;;  %1597 = vmatpush1.bf16.msra.mxu1 %v1294_v16  ;;  %1527 = vmatprep.mubr.bf16.mxu0 %v7861_v3  ;;  %v1234_v59 = vmax.f32 %v1142_v45, 0.0 }
 0x178   : > { %v1148_v55 = vadd.f32 %v1147_v57, %v8266_v5  ;;  %v1235_v60 = vmax.f32 %v1144_v48, 0.0 }
 0x179   : > { %v1240_v46 = vmax.f32 %v1146_v53, 0.0 }
 0x17a   : > { %v1241_v41 = vmax.f32 %v1148_v55, 0.0  ;;  %1455 = vmatmul.mubr.bf16.gmra.mrb[52].mxu1 %v8399_v52 }
 0x17b   : > { %v1300_v1 = vpack.c.bf16 %v1240_v46, %v1234_v59  ;;  %1464 = vmatprep.mubr.bf16.mxu1 %v7861_v3 }
 0x17c   : > { %v1301_v35 = vpack.c.bf16 %v1241_v41, %v1235_v60  ;;  %v1151_v2 = vpop.f32.mrb[60].mxu0 }
 0x17d   : > { %v1152_v4 = vadd.f32 %v1151_v2, %v8272_v40  ;;  %v1153_v63 = vpop.f32.mrb[61].mxu0 }
 0x17e   : > { %v1154_v7 = vadd.f32 %v1153_v63, %v8272_v40  ;;  %v1155_v42 = vpop.f32.mrb[62].mxu0  ;;  %1528 = vmatmul.mubr.bf16.gmra.mrb[76].mxu0 %v8341_v6  ;;  %1598 = vmatprep.subr.bf16.mxu1 %v1301_v35 }
 0x17f   : > { %v1156_v17 = vadd.f32 %v1155_v42, %v8282_v56  ;;  %v1157_v31 = vpop.f32.mrb[63].mxu0  ;;  %1599 = vmatpush1.bf16.msra.mxu1 %v1300_v1  ;;  %1537 = vmatprep.mubr.bf16.mxu0 %v7861_v3  ;;  %v1246_v22 = vmax.f32 %v1152_v4, 0.0 }
 0x180   : > { %v1158_v18 = vadd.f32 %v1157_v31, %v8282_v56  ;;  %v1247_v13 = vmax.f32 %v1154_v7, 0.0 }
 0x181   : > { %v1252_v23 = vmax.f32 %v1156_v17, 0.0 }
 0x182   : > { %v1253_v24 = vmax.f32 %v1158_v18, 0.0  ;;  %1465 = vmatmul.mubr.bf16.gmra.mrb[56].mxu1 %v7520_v9 }
 0x183   : > { %v1306_v25 = vpack.c.bf16 %v1252_v23, %v1246_v22  ;;  %1620 = vmatprep.mubr.bf16.mxu1 %v7861_v3 }
 0x184   : > { %v1307_v39 = vpack.c.bf16 %v1253_v24, %v1247_v13  ;;  %v1161_v28 = vpop.f32.mrb[64].mxu0 }
 0x185   : > { %v1162_v19 = vadd.f32 %v1161_v28, %v8288_v30  ;;  %v1163_v33 = vpop.f32.mrb[65].mxu0 }
 0x186   : > { %v1164_v16 = vadd.f32 %v1163_v33, %v8288_v30  ;;  %v1165_v44 = vpop.f32.mrb[66].mxu0  ;;  %1538 = vmatmul.mubr.bf16.gmra.mrb[80].mxu0 %v8356_v36  ;;  %1600 = vmatprep.subr.bf16.mxu1 %v1307_v39 }
 0x187   : > { %v1166_v58 = vadd.f32 %v1165_v44, %v8298_v49  ;;  %v1167_v45 = vpop.f32.mrb[67].mxu0  ;;  %1601 = vmatpush1.bf16.msra.mxu1 %v1306_v25  ;;  %1547 = vmatprep.mubr.bf16.mxu0 %v7861_v3  ;;  %v1258_v48 = vmax.f32 %v1162_v19, 0.0 }
 0x188   : > { %v1168_v47 = vadd.f32 %v1167_v45, %v8298_v49  ;;  %v1259_v53 = vmax.f32 %v1164_v16, 0.0 }
 0x189   : > { %v1264_v51 = vmax.f32 %v1166_v58, 0.0 }
 0x18a   : > { %v1265_v57 = vmax.f32 %v1168_v47, 0.0 }
 0x18b   : > { %v1312_v55 = vpack.c.bf16 %v1264_v51, %v1258_v48 }
 0x18c   : > { %v1313_v59 = vpack.c.bf16 %v1265_v57, %v1259_v53 }
 0x18e   : > { %1548 = vmatmul.mubr.bf16.gmra.mrb[84].mxu0 %v8371_v61  ;;  %1602 = vmatprep.subr.bf16.mxu1 %v1313_v59 }
 0x18f   : > { %1603 = vmatpush1.bf16.msra.mxu1 %v1312_v55  ;;  %1557 = vmatprep.mubr.bf16.mxu0 %v7861_v3 }
 0x192   : > { %1621 = vmatmul.mubr.bf16.vlgmr.msra.gmra.mrb[60].mxu1 %v8316_v0 }
 0x193   : > { %1630 = vmatprep.mubr.bf16.mxu1 %v7861_v3 }
 0x196   : > { %1558 = vmatmul.mubr.bf16.gmra.mrb[88].mxu0 %v8386_v34 }
 0x197   : > { %1567 = vmatprep.mubr.bf16.mxu0 %v7861_v3 }
 0x19a   : > { %1631 = vmatmul.mubr.bf16.gmra.mrb[64].mxu1 %v8327_v37 }
 0x19b   : > { %1640 = vmatprep.mubr.bf16.mxu1 %v7861_v3 }
 0x19e   : > { %1568 = vmatmul.mubr.bf16.gmra.mrb[92].mxu0 %v8399_v52 }
 0x19f   : > { %1577 = vmatprep.mubr.bf16.mxu0 %v7861_v3 }
 0x1a2   : > { %1641 = vmatmul.mubr.bf16.gmra.mrb[68].mxu1 %v8341_v6 }
 0x1a3   : > { %1650 = vmatprep.mubr.bf16.mxu1 %v7861_v3 }
 0x1a6   : > { %1578 = vmatmul.mubr.bf16.gmra.mrb[96].mxu0 %v7520_v9 }
 0x1a7   : > { %1877 = vmatprep.mubr.bf16.mxu0 %v7861_v3 }
 0x1aa   : > { %1651 = vmatmul.mubr.bf16.gmra.mrb[72].mxu1 %v8356_v36 }
 0x1ab   : > { %1660 = vmatprep.mubr.bf16.mxu1 %v7861_v3 }
 0x1b2   : > { %1661 = vmatmul.mubr.bf16.gmra.mrb[76].mxu1 %v8371_v61 }
 0x1b3   : > { %1670 = vmatprep.mubr.bf16.mxu1 %v7861_v3 }
 0x1ba   : > { %1671 = vmatmul.mubr.bf16.gmra.mrb[80].mxu1 %v8386_v34 }
 0x1bb   : > { %1680 = vmatprep.mubr.bf16.mxu1 %v7861_v3 }
 0x1c2   : > { %1681 = vmatmul.mubr.bf16.gmra.mrb[84].mxu1 %v8399_v52 }
 0x1c3   : > { %1690 = vmatprep.mubr.bf16.mxu1 %v7861_v3 }
 0x1ca   : > { %1691 = vmatmul.mubr.bf16.gmra.mrb[88].mxu1 %v7520_v9 }
 0x1cb   : > { %1918 = vmatprep.mubr.bf16.mxu1 %v7861_v3 }
 0x21d   : > { %v1396_v0 = vpop.f32.mrb[28].mxu1 }
 0x21e   : > { %v1701_v37 = vmax.f32 %v1396_v0, 0.0  ;;  %v1398_v6 = vpop.f32.mrb[29].mxu1 }
 0x21f   : > { %v1702_v36 = vmax.f32 %v1398_v6, 0.0  ;;  %v1400_v46 = vpop.f32.mrb[30].mxu1 }
 0x220   : > { %v1707_v60 = vmax.f32 %v1400_v46, 0.0  ;;  %v1402_v61 = vpop.f32.mrb[31].mxu1 }
 0x221   : > { %v1708_v41 = vmax.f32 %v1402_v61, 0.0 }
 0x222   : > { %v1797_v1 = vpack.c.bf16 %v1707_v60, %v1701_v37 }
 0x223   : > { %v1798_v35 = vpack.c.bf16 %v1708_v41, %v1702_v36 }
 0x225   : > { %v1406_v34 = vpop.f32.mrb[32].mxu1  ;;  %1845 = vmatprep.subr.bf16.mxu0 %v1798_v35 }
 0x226   : > { %v1713_v2 = vmax.f32 %v1406_v34, 0.0  ;;  %v1408_v4 = vpop.f32.mrb[33].mxu1  ;;  %1846 = vmatpush1.bf16.msra.mxu0 %v1797_v1 }
 0x227   : > { %v1714_v52 = vmax.f32 %v1408_v4, 0.0  ;;  %v1410_v63 = vpop.f32.mrb[34].mxu1 }
 0x228   : > { %v1719_v7 = vmax.f32 %v1410_v63, 0.0  ;;  %v1412_v42 = vpop.f32.mrb[35].mxu1 }
 0x229   : > { %v1720_v9 = vmax.f32 %v1412_v42, 0.0 }
 0x22a   : > { %v1803_v17 = vpack.c.bf16 %v1719_v7, %v1713_v2 }
 0x22b   : > { %v1804_v31 = vpack.c.bf16 %v1720_v9, %v1714_v52 }
 0x22d   : > { %v1416_v18 = vpop.f32.mrb[36].mxu1  ;;  %1847 = vmatprep.subr.bf16.mxu0 %v1804_v31 }
 0x22e   : > { %v1725_v22 = vmax.f32 %v1416_v18, 0.0  ;;  %v1418_v23 = vpop.f32.mrb[37].mxu1  ;;  %1848 = vmatpush1.bf16.msra.mxu0 %v1803_v17 }
 0x22f   : > { %v1726_v13 = vmax.f32 %v1418_v23, 0.0  ;;  %v1420_v24 = vpop.f32.mrb[38].mxu1 }
 0x230   : > { %v1731_v25 = vmax.f32 %v1420_v24, 0.0  ;;  %v1422_v39 = vpop.f32.mrb[39].mxu1 }
 0x231   : > { %v1732_v28 = vmax.f32 %v1422_v39, 0.0 }
 0x232   : > { %v1809_v19 = vpack.c.bf16 %v1731_v25, %v1725_v22 }
 0x233   : > { %v1810_v33 = vpack.c.bf16 %v1732_v28, %v1726_v13 }
 0x235   : > { %v1426_v16 = vpop.f32.mrb[40].mxu1  ;;  %1849 = vmatprep.subr.bf16.mxu0 %v1810_v33 }
 0x236   : > { %v1737_v44 = vmax.f32 %v1426_v16, 0.0  ;;  %v1428_v58 = vpop.f32.mrb[41].mxu1  ;;  %1850 = vmatpush1.bf16.msra.mxu0 %v1809_v19 }
 0x237   : > { %v1738_v45 = vmax.f32 %v1428_v58, 0.0  ;;  %v1430_v47 = vpop.f32.mrb[42].mxu1 }
 0x238   : > { %v1743_v48 = vmax.f32 %v1430_v47, 0.0  ;;  %v1432_v51 = vpop.f32.mrb[43].mxu1 }
 0x239   : > { %v1744_v53 = vmax.f32 %v1432_v51, 0.0 }
 0x23a   : > { %v1815_v57 = vpack.c.bf16 %v1743_v48, %v1737_v44 }
 0x23b   : > { %v1816_v55 = vpack.c.bf16 %v1744_v53, %v1738_v45 }
 0x23d   : > { %v1436_v59 = vpop.f32.mrb[44].mxu1  ;;  %1851 = vmatprep.subr.bf16.mxu0 %v1816_v55 }
 0x23e   : > { %v1749_v0 = vmax.f32 %v1436_v59, 0.0  ;;  %v1438_v37 = vpop.f32.mrb[45].mxu1  ;;  %1852 = vmatpush1.bf16.msra.mxu0 %v1815_v57 }
 0x23f   : > { %v1750_v6 = vmax.f32 %v1438_v37, 0.0  ;;  %v1440_v36 = vpop.f32.mrb[46].mxu1 }
 0x240   : > { %v1755_v46 = vmax.f32 %v1440_v36, 0.0  ;;  %v1442_v60 = vpop.f32.mrb[47].mxu1 }
 0x241   : > { %v1509_v61 = vpop.f32.mrb[68].mxu0  ;;  %v1756_v41 = vmax.f32 %v1442_v60, 0.0 }
 0x242   : > { %v1511_v1 = vpop.f32.mrb[69].mxu0  ;;  %v1821_v35 = vpack.c.bf16 %v1755_v46, %v1749_v0  ;;  %v1703_v4 = vmax.f32 %v1509_v61, 0.0 }
 0x243   : > { %v1513_v34 = vpop.f32.mrb[70].mxu0  ;;  %v1822_v2 = vpack.c.bf16 %v1756_v41, %v1750_v6  ;;  %v1704_v7 = vmax.f32 %v1511_v1, 0.0 }
 0x244   : > { %v1709_v52 = vmax.f32 %v1513_v34, 0.0  ;;  %v1515_v63 = vpop.f32.mrb[71].mxu0 }
 0x245   : > { %v1710_v42 = vmax.f32 %v1515_v63, 0.0  ;;  %v1446_v9 = vpop.f32.mrb[48].mxu1  ;;  %1853 = vmatprep.subr.bf16.mxu0 %v1822_v2 }
 0x246   : > { %v1799_v17 = vpack.c.bf16 %v1709_v52, %v1703_v4  ;;  %v1761_v31 = vmax.f32 %v1446_v9, 0.0  ;;  %v1448_v18 = vpop.f32.mrb[49].mxu1  ;;  %1854 = vmatpush1.bf16.msra.mxu0 %v1821_v35 }
 0x247   : > { %v1800_v22 = vpack.c.bf16 %v1710_v42, %v1704_v7  ;;  %v1762_v23 = vmax.f32 %v1448_v18, 0.0  ;;  %v1450_v13 = vpop.f32.mrb[50].mxu1 }
 0x248   : > { %v1767_v24 = vmax.f32 %v1450_v13, 0.0  ;;  %v1452_v25 = vpop.f32.mrb[51].mxu1 }
 0x249   : > { %v1519_v39 = vpop.f32.mrb[72].mxu0  ;;  %1886 = vmatprep.subr.bf16.mxu1 %v1800_v22  ;;  %v1768_v28 = vmax.f32 %v1452_v25, 0.0 }
 0x24a   : > { %v1521_v19 = vpop.f32.mrb[73].mxu0  ;;  %1887 = vmatpush1.bf16.msra.mxu1 %v1799_v17  ;;  %v1827_v33 = vpack.c.bf16 %v1767_v24, %v1761_v31  ;;  %v1715_v58 = vmax.f32 %v1519_v39, 0.0 }
 0x24b   : > { %v1523_v16 = vpop.f32.mrb[74].mxu0  ;;  %v1828_v44 = vpack.c.bf16 %v1768_v28, %v1762_v23  ;;  %v1716_v48 = vmax.f32 %v1521_v19, 0.0 }
 0x24c   : > { %v1721_v45 = vmax.f32 %v1523_v16, 0.0  ;;  %v1525_v47 = vpop.f32.mrb[75].mxu0 }
 0x24d   : > { %v1722_v51 = vmax.f32 %v1525_v47, 0.0  ;;  %v1456_v53 = vpop.f32.mrb[52].mxu1  ;;  %1855 = vmatprep.subr.bf16.mxu0 %v1828_v44 }
 0x24e   : > { %v1805_v57 = vpack.c.bf16 %v1721_v45, %v1715_v58  ;;  %v1773_v55 = vmax.f32 %v1456_v53, 0.0  ;;  %v1458_v59 = vpop.f32.mrb[53].mxu1  ;;  %1856 = vmatpush1.bf16.msra.mxu0 %v1827_v33  ;;  %v8447_v53 = vld [vmem:[%s10334_s7] sm:$0x1] }
 0x24f   : > { %v1806_v0 = vpack.c.bf16 %v1722_v51, %v1716_v48  ;;  %v1774_v37 = vmax.f32 %v1458_v59, 0.0  ;;  %v1460_v6 = vpop.f32.mrb[54].mxu1 }
 0x250   : > { %v1779_v36 = vmax.f32 %v1460_v6, 0.0  ;;  %v1462_v46 = vpop.f32.mrb[55].mxu1 }
 0x251   : > { %v1529_v60 = vpop.f32.mrb[76].mxu0  ;;  %1888 = vmatprep.subr.bf16.mxu1 %v1806_v0  ;;  %v1780_v61 = vmax.f32 %v1462_v46, 0.0 }
 0x252   : > { %v1531_v41 = vpop.f32.mrb[77].mxu0  ;;  %1889 = vmatpush1.bf16.msra.mxu1 %v1805_v57  ;;  %v1833_v1 = vpack.c.bf16 %v1779_v36, %v1773_v55  ;;  %v1727_v2 = vmax.f32 %v1529_v60, 0.0 }
 0x253   : > { %v1533_v35 = vpop.f32.mrb[78].mxu0  ;;  %v1834_v34 = vpack.c.bf16 %v1780_v61, %v1774_v37  ;;  %v1728_v63 = vmax.f32 %v1531_v41, 0.0 }
 0x254   : > { %v1733_v4 = vmax.f32 %v1533_v35, 0.0  ;;  %v1535_v52 = vpop.f32.mrb[79].mxu0 }
 0x255   : > { %v1734_v7 = vmax.f32 %v1535_v52, 0.0  ;;  %v1466_v42 = vpop.f32.mrb[56].mxu1  ;;  %1857 = vmatprep.subr.bf16.mxu0 %v1834_v34 }
 0x256   : > { %v1811_v9 = vpack.c.bf16 %v1733_v4, %v1727_v2  ;;  %v1785_v17 = vmax.f32 %v1466_v42, 0.0  ;;  %v1468_v31 = vpop.f32.mrb[57].mxu1  ;;  %1858 = vmatpush1.bf16.msra.mxu0 %v1833_v1 }
 0x257   : > { %v1812_v18 = vpack.c.bf16 %v1734_v7, %v1728_v63  ;;  %v1786_v22 = vmax.f32 %v1468_v31, 0.0  ;;  %v1470_v23 = vpop.f32.mrb[58].mxu1 }
 0x258   : > { %v1791_v13 = vmax.f32 %v1470_v23, 0.0  ;;  %v1472_v24 = vpop.f32.mrb[59].mxu1 }
 0x259   : > { %v1539_v25 = vpop.f32.mrb[80].mxu0  ;;  %1890 = vmatprep.subr.bf16.mxu1 %v1812_v18  ;;  %v1792_v39 = vmax.f32 %v1472_v24, 0.0 }
 0x25a   : > { %v1541_v28 = vpop.f32.mrb[81].mxu0  ;;  %1891 = vmatpush1.bf16.msra.mxu1 %v1811_v9  ;;  %v1839_v19 = vpack.c.bf16 %v1791_v13, %v1785_v17  ;;  %v1739_v44 = vmax.f32 %v1539_v25, 0.0 }
 0x25b   : > { %v1543_v33 = vpop.f32.mrb[82].mxu0  ;;  %v1840_v16 = vpack.c.bf16 %v1792_v39, %v1786_v22  ;;  %v1740_v47 = vmax.f32 %v1541_v28, 0.0 }
 0x25c   : > { %v1745_v58 = vmax.f32 %v1543_v33, 0.0  ;;  %v1545_v45 = vpop.f32.mrb[83].mxu0 }
 0x25d   : > { %v1746_v48 = vmax.f32 %v1545_v45, 0.0  ;;  %1859 = vmatprep.subr.bf16.mxu0 %v1840_v16 }
 0x25e   : > { %v1817_v51 = vpack.c.bf16 %v1745_v58, %v1739_v44  ;;  %1860 = vmatpush1.bf16.msra.mxu0 %v1839_v19 }
 0x25f   : > { %v1818_v57 = vpack.c.bf16 %v1746_v48, %v1740_v47 }
 0x261   : > { %v1549_v55 = vpop.f32.mrb[84].mxu0  ;;  %1892 = vmatprep.subr.bf16.mxu1 %v1818_v57  ;;  %1878 = vmatmul.mubr.bf16.vlgmr.msra.gmra.mrb[100].mxu0 %v8447_v53 }
 0x262   : > { %v1551_v59 = vpop.f32.mrb[85].mxu0  ;;  %1893 = vmatpush1.bf16.msra.mxu1 %v1817_v51  ;;  %1959 = vmatprep.mubr.bf16.mxu0 %v7861_v3  ;;  %v1751_v37 = vmax.f32 %v1549_v55, 0.0 }
 0x263   : > { %v1553_v0 = vpop.f32.mrb[86].mxu0  ;;  %v1752_v46 = vmax.f32 %v1551_v59, 0.0 }
 0x264   : > { %v1757_v6 = vmax.f32 %v1553_v0, 0.0  ;;  %v1555_v36 = vpop.f32.mrb[87].mxu0 }
 0x265   : > { %v1758_v60 = vmax.f32 %v1555_v36, 0.0  ;;  %v1622_v61 = vpop.f32.mrb[60].mxu1 }
 0x266   : > { %v1823_v41 = vpack.c.bf16 %v1757_v6, %v1751_v37  ;;  %v1705_v1 = vmax.f32 %v1622_v61, 0.0  ;;  %v1624_v35 = vpop.f32.mrb[61].mxu1 }
 0x267   : > { %v1824_v34 = vpack.c.bf16 %v1758_v60, %v1752_v46  ;;  %v1706_v2 = vmax.f32 %v1624_v35, 0.0  ;;  %v1626_v4 = vpop.f32.mrb[62].mxu1 }
 0x268   : > { %v1711_v52 = vmax.f32 %v1626_v4, 0.0  ;;  %v1628_v63 = vpop.f32.mrb[63].mxu1 }
 0x269   : > { %v1559_v7 = vpop.f32.mrb[88].mxu0  ;;  %1894 = vmatprep.subr.bf16.mxu1 %v1824_v34  ;;  %v1712_v42 = vmax.f32 %v1628_v63, 0.0 }
 0x26a   : > { %v1561_v9 = vpop.f32.mrb[89].mxu0  ;;  %1895 = vmatpush1.bf16.msra.mxu1 %v1823_v41  ;;  %v1801_v17 = vpack.c.bf16 %v1711_v52, %v1705_v1  ;;  %v1763_v22 = vmax.f32 %v1559_v7, 0.0  ;;  %v8459_v52 = vld [vmem:[%s8456_s16] sm:$0xff] }
 0x26b   : > { %v1563_v31 = vpop.f32.mrb[90].mxu0  ;;  %v1802_v18 = vpack.c.bf16 %v1712_v42, %v1706_v2  ;;  %v1764_v24 = vmax.f32 %v1561_v9, 0.0 }
 0x26c   : > { %v1769_v23 = vmax.f32 %v1563_v31, 0.0  ;;  %v1565_v13 = vpop.f32.mrb[91].mxu0 }
 0x26d   : > { %v1770_v25 = vmax.f32 %v1565_v13, 0.0  ;;  %v1632_v39 = vpop.f32.mrb[64].mxu1  ;;  %1927 = vmatprep.subr.bf16.mxu0 %v1802_v18 }
 0x26e   : > { %v1829_v28 = vpack.c.bf16 %v1769_v23, %v1763_v22  ;;  %v1717_v19 = vmax.f32 %v1632_v39, 0.0  ;;  %v1634_v33 = vpop.f32.mrb[65].mxu1  ;;  %1928 = vmatpush1.bf16.msra.mxu0 %v1801_v17  ;;  %v8463_v22 = vrot.slane %v8459_v52, %v8008_v8 }
 0x26f   : > { %v1830_v16 = vpack.c.bf16 %v1770_v25, %v1764_v24  ;;  %v1718_v44 = vmax.f32 %v1634_v33, 0.0  ;;  %v1636_v58 = vpop.f32.mrb[66].mxu1 }
 0x270   : > { %v1723_v45 = vmax.f32 %v1636_v58, 0.0  ;;  %v1638_v47 = vpop.f32.mrb[67].mxu1 }
 0x271   : > { %v1569_v48 = vpop.f32.mrb[92].mxu0  ;;  %1896 = vmatprep.subr.bf16.mxu1 %v1830_v16  ;;  %v1724_v51 = vmax.f32 %v1638_v47, 0.0 }
 0x272   : > { %v1571_v57 = vpop.f32.mrb[93].mxu0  ;;  %1897 = vmatpush1.bf16.msra.mxu1 %v1829_v28  ;;  %v1807_v55 = vpack.c.bf16 %v1723_v45, %v1717_v19  ;;  %v1775_v37 = vmax.f32 %v1569_v48, 0.0  ;;  %v8467_v45 = vcombine.high %v8463_v22, %v8463_v22 }
 0x273   : > { %v1573_v59 = vpop.f32.mrb[94].mxu0  ;;  %v1808_v0 = vpack.c.bf16 %v1724_v51, %v1718_v44  ;;  %v1776_v46 = vmax.f32 %v1571_v57, 0.0 }
 0x274   : > { %v1781_v6 = vmax.f32 %v1573_v59, 0.0  ;;  %v1575_v36 = vpop.f32.mrb[95].mxu0 }
 0x275   : > { %v1782_v60 = vmax.f32 %v1575_v36, 0.0  ;;  %v1642_v61 = vpop.f32.mrb[68].mxu1  ;;  %1929 = vmatprep.subr.bf16.mxu0 %v1808_v0 }
 0x276   : > { %v1835_v41 = vpack.c.bf16 %v1781_v6, %v1775_v37  ;;  %v1729_v1 = vmax.f32 %v1642_v61, 0.0  ;;  %v1644_v35 = vpop.f32.mrb[69].mxu1  ;;  %1930 = vmatpush1.bf16.msra.mxu0 %v1807_v55  ;;  %v6379_v55 = vld.sshfl [vmem:[%s8456_s16 + $0x8] sm:$0x33 pattern:$0x76325410] }
 0x277   : > { %v1836_v34 = vpack.c.bf16 %v1782_v60, %v1776_v46  ;;  %v1730_v2 = vmax.f32 %v1644_v35, 0.0  ;;  %v1646_v4 = vpop.f32.mrb[70].mxu1  ;;  %v2078_v37 = vsel %vm812_vm0, %v8463_v22, 0  ;;  %v8474_v36 = vcombine.high %v6379_v55, %v6379_v55 }
 0x278   : > { %v1735_v63 = vmax.f32 %v1646_v4, 0.0  ;;  %v1648_v7 = vpop.f32.mrb[71].mxu1 }
 0x279   : > { %v1579_v42 = vpop.f32.mrb[96].mxu0  ;;  %1898 = vmatprep.subr.bf16.mxu1 %v1836_v34  ;;  %v1736_v9 = vmax.f32 %v1648_v7, 0.0  ;;  %v2090_v7 = vsel %vm812_vm0, %v6379_v55, 0 }
 0x27a   : > { %v1581_v17 = vpop.f32.mrb[97].mxu0  ;;  %1899 = vmatpush1.bf16.msra.mxu1 %v1835_v41  ;;  %v1813_v31 = vpack.c.bf16 %v1735_v63, %v1729_v1  ;;  %v1787_v13 = vmax.f32 %v1579_v42, 0.0  ;;  %v8484_v42 = vld [vmem:[%s10332_s4] sm:$0xff]  }
 0x27b   : > { %v1583_v18 = vpop.f32.mrb[98].mxu0  ;;  %v1814_v23 = vpack.c.bf16 %v1736_v9, %v1730_v2  ;;  %v1788_v39 = vmax.f32 %v1581_v17, 0.0 }
 0x27c   : > { %v1793_v24 = vmax.f32 %v1583_v18, 0.0  ;;  %v1585_v25 = vpop.f32.mrb[99].mxu0 }
 0x27d   : > { %v1794_v28 = vmax.f32 %v1585_v25, 0.0  ;;  %v1652_v19 = vpop.f32.mrb[72].mxu1  ;;  %1931 = vmatprep.subr.bf16.mxu0 %v1814_v23 }
 0x27e   : > { %v1841_v33 = vpack.c.bf16 %v1793_v24, %v1787_v13  ;;  %v1741_v16 = vmax.f32 %v1652_v19, 0.0  ;;  %v1654_v44 = vpop.f32.mrb[73].mxu1  ;;  %1932 = vmatpush1.bf16.msra.mxu0 %v1813_v31  ;;  %v8492_v19 = vld [vmem:[%s10332_s4 + $0x8] sm:$0xff]  }
 0x27f   : > { %v1842_v58 = vpack.c.bf16 %v1794_v28, %v1788_v39  ;;  %v1742_v47 = vmax.f32 %v1654_v44, 0.0  ;;  %v1656_v48 = vpop.f32.mrb[74].mxu1 }
 0x280   : > { %v1747_v51 = vmax.f32 %v1656_v48, 0.0  ;;  %v1658_v57 = vpop.f32.mrb[75].mxu1 }
 0x281   : > { %1900 = vmatprep.subr.bf16.mxu1 %v1842_v58  ;;  %v1748_v59 = vmax.f32 %v1658_v57, 0.0 }
 0x282   : > { %1901 = vmatpush1.bf16.msra.mxu1 %v1841_v33  ;;  %v1819_v0 = vpack.c.bf16 %v1747_v51, %v1741_v16 }
 0x283   : > { %6380 = vmatprep.subr.msk.bf16.mxu1 %vm812_vm0, %v8467_v45  ;;  %v1820_v6 = vpack.c.bf16 %v1748_v59, %v1742_v47 }
 0x285   : > { %1919 = vmatmul.mubr.bf16.vlgmr.msra.gmra.mrb[92].mxu1 %v8447_v53  ;;  %v1662_v46 = vpop.f32.mrb[76].mxu1  ;;  %1933 = vmatprep.subr.bf16.mxu0 %v1820_v6  ;;  %v7776_v6 = vld [vmem:[%s10332_s4 + $0x10] sm:$0xff]  }
 0x286   : > { %2096 = vmatpush1.bf16.msra.mxu1 %v2078_v37  ;;  %2127 = vmatprep.mubr.bf16.mxu1 %v7861_v3  ;;  %v1753_v60 = vmax.f32 %v1662_v46, 0.0  ;;  %v1664_v61 = vpop.f32.mrb[77].mxu1 }
 0x287   : > { %v1754_v41 = vmax.f32 %v1664_v61, 0.0  ;;  %v1666_v1 = vpop.f32.mrb[78].mxu1  ;;  %1934 = vmatpush1.bf16.msra.mxu0 %v1819_v0  ;;  %6398 = vmatprep.subr.msk.bf16.mxu1 %vm812_vm0, %v8474_v36  ;;  %v2052_v0 = vcombine.high %v8459_v52, %v8459_v52 }
 0x288   : > { %v1759_v35 = vmax.f32 %v1666_v1, 0.0  ;;  %v1668_v34 = vpop.f32.mrb[79].mxu1 }
 0x289   : > { %v1760_v2 = vmax.f32 %v1668_v34, 0.0  ;;  %v8505_v1 = vrot.slane %v2052_v0, %v8008_v8 }
 0x28a   : > { %v1825_v4 = vpack.c.bf16 %v1759_v35, %v1753_v60 }
 0x28b   : > { %v1826_v63 = vpack.c.bf16 %v1760_v2, %v1754_v41  ;;  %v2084_v8 = vsel %vm812_vm0, %v8505_v1, 0 }
 0x28d   : > { %6381 = vmatmul.mubr.msk.bf16.vlgmr.msra.gmra.mrb[96].mxu1 %vm787_vm1, %v8484_v42  ;;  %v1672_v9 = vpop.f32.mrb[80].mxu1  ;;  %1935 = vmatprep.subr.bf16.mxu0 %v1826_v63  ;;  %v8509_v63 = vcombine.high %v8505_v1, %v8505_v1 }
 0x28e   : > { %2137 = vmatprep.mubr.bf16.mxu1 %v7861_v3  ;;  %v1765_v17 = vmax.f32 %v1672_v9, 0.0  ;;  %v1674_v31 = vpop.f32.mrb[81].mxu1  ;;  %1936 = vmatpush1.bf16.msra.mxu0 %v1825_v4  ;;  %v7778_v9 = vld [vmem:[%s10332_s4 + $0x20] sm:$0xff]  }
 0x28f   : > { %v1766_v18 = vmax.f32 %v1674_v31, 0.0  ;;  %v1676_v23 = vpop.f32.mrb[82].mxu1  ;;  %2322 = vmatpush1.bf16.msra.mxu1 %v2090_v7  ;;  %v7777_v7 = vld [vmem:[%s10332_s4 + $0x18] sm:$0xff]  }
 0x290   : > { %v1771_v13 = vmax.f32 %v1676_v23, 0.0  ;;  %v1678_v24 = vpop.f32.mrb[83].mxu1  ;;  %v7781_v31 = vld [vmem:[%s10332_s4 + $0x38] sm:$0xff]  }
 0x291   : > { %v1772_v25 = vmax.f32 %v1678_v24, 0.0 }
 0x292   : > { %v1831_v39 = vpack.c.bf16 %v1771_v13, %v1765_v17  ;;  %v7780_v17 = vld [vmem:[%s10332_s4 + $0x30] sm:$0xff]  }
 0x293   : > { %v1832_v28 = vpack.c.bf16 %v1772_v25, %v1766_v18 }
 0x295   : > { %6382 = vmatmul.mubr.msk.bf16.gmra.mrb[100].mxu1 %vm787_vm1, %v8492_v19  ;;  %v1682_v33 = vpop.f32.mrb[84].mxu1  ;;  %1937 = vmatprep.subr.bf16.mxu0 %v1832_v28 }
 0x296   : > { %v1777_v16 = vmax.f32 %v1682_v33, 0.0  ;;  %v1684_v44 = vpop.f32.mrb[85].mxu1  ;;  %2147 = vmatprep.mubr.bf16.mxu1 %v7861_v3  ;;  %1938 = vmatpush1.bf16.msra.mxu0 %v1831_v39 }
 0x297   : > { %v1778_v58 = vmax.f32 %v1684_v44, 0.0  ;;  %v1686_v47 = vpop.f32.mrb[86].mxu1 }
 0x298   : > { %v1783_v48 = vmax.f32 %v1686_v47, 0.0  ;;  %v1688_v51 = vpop.f32.mrb[87].mxu1 }
 0x299   : > { %v1784_v57 = vmax.f32 %v1688_v51, 0.0 }
 0x29a   : > { %v1837_v55 = vpack.c.bf16 %v1783_v48, %v1777_v16 }
 0x29b   : > { %v1838_v59 = vpack.c.bf16 %v1784_v57, %v1778_v58 }
 0x29d   : > { %v1692_v37 = vpop.f32.mrb[88].mxu1  ;;  %6383 = vmatmul.mubr.msk.bf16.gmra.mrb[104].mxu1 %vm787_vm1, %v7776_v6  ;;  %1939 = vmatprep.subr.bf16.mxu0 %v1838_v59 }
 0x29e   : > { %v1789_v46 = vmax.f32 %v1692_v37, 0.0  ;;  %v1694_v60 = vpop.f32.mrb[89].mxu1  ;;  %1940 = vmatpush1.bf16.msra.mxu0 %v1837_v55  ;;  %2157 = vmatprep.mubr.bf16.mxu1 %v7861_v3 }
 0x29f   : > { %v1790_v61 = vmax.f32 %v1694_v60, 0.0  ;;  %v1696_v41 = vpop.f32.mrb[90].mxu1 }
 0x2a0   : > { %v1795_v35 = vmax.f32 %v1696_v41, 0.0  ;;  %v1698_v52 = vpop.f32.mrb[91].mxu1 }
 0x2a1   : > { %v1796_v34 = vmax.f32 %v1698_v52, 0.0 }
 0x2a2   : > { %v1843_v2 = vpack.c.bf16 %v1795_v35, %v1789_v46 }
 0x2a3   : > { %v1844_v4 = vpack.c.bf16 %v1796_v34, %v1790_v61 }
 0x2a5   : > { %1941 = vmatprep.subr.bf16.mxu0 %v1844_v4  ;;  %6384 = vmatmul.mubr.msk.bf16.gmra.mrb[108].mxu1 %vm787_vm1, %v7777_v7 }
 0x2a6   : > { %1942 = vmatpush1.bf16.msra.mxu0 %v1843_v2  ;;  %2167 = vmatprep.mubr.bf16.mxu1 %v7861_v3 }
 0x2a7   : > { %6389 = vmatprep.subr.msk.bf16.mxu0 %vm812_vm0, %v8509_v63 }
 0x2a9   : > { %1960 = vmatmul.mubr.bf16.vlgmr.msra.gmra.mrb[104].mxu0 %v8447_v53  ;;  %v7779_v53 = vld [vmem:[%s10332_s4 + $0x28] sm:$0xff]  }
 0x2aa   : > { %2209 = vmatpush1.bf16.msra.mxu0 %v2084_v8  ;;  %2240 = vmatprep.mubr.bf16.mxu0 %v7861_v3 }
 0x2ad   : > { %6385 = vmatmul.mubr.msk.bf16.gmra.mrb[112].mxu1 %vm787_vm1, %v7778_v9 }
 0x2ae   : > { %2177 = vmatprep.mubr.bf16.mxu1 %v7861_v3 }
 0x2b1   : > { %6390 = vmatmul.mubr.msk.bf16.vlgmr.msra.gmra.mrb[108].mxu0 %vm787_vm1, %v8484_v42 }
 0x2b2   : > { %2250 = vmatprep.mubr.bf16.mxu0 %v7861_v3 }
 0x2b5   : > { %6386 = vmatmul.mubr.msk.bf16.gmra.mrb[116].mxu1 %vm787_vm1, %v7779_v53 }
 0x2b6   : > { %2187 = vmatprep.mubr.bf16.mxu1 %v7861_v3 }
 0x2b9   : > { %6391 = vmatmul.mubr.msk.bf16.gmra.mrb[112].mxu0 %vm787_vm1, %v8492_v19 }
 0x2ba   : > { %2260 = vmatprep.mubr.bf16.mxu0 %v7861_v3 }
 0x2bd   : > { %6387 = vmatmul.mubr.msk.bf16.gmra.mrb[120].mxu1 %vm787_vm1, %v7780_v17 }
 0x2be   : > { %2197 = vmatprep.mubr.bf16.mxu1 %v7861_v3 }
 0x2c1   : > { %6392 = vmatmul.mubr.msk.bf16.gmra.mrb[116].mxu0 %vm787_vm1, %v7776_v6 }
 0x2c2   : > { %2270 = vmatprep.mubr.bf16.mxu0 %v7861_v3 }
 0x2c5   : > { %6388 = vmatmul.mubr.msk.bf16.gmra.mrb[124].mxu1 %vm787_vm1, %v7781_v31 }
 0x2c6   : > { %2353 = vmatprep.mubr.bf16.mxu1 %v7861_v3 }
 0x2c9   : > { %6393 = vmatmul.mubr.msk.bf16.gmra.mrb[120].mxu0 %vm787_vm1, %v7777_v7 }
 0x2ca   : > { %2280 = vmatprep.mubr.bf16.mxu0 %v7861_v3 }
 0x2cd   : > { %6399 = vmatmul.mubr.msk.bf16.vlgmr.msra.gmra.mrb[128].mxu1 %vm787_vm1, %v8484_v42 }
 0x2ce   : > { %2363 = vmatprep.mubr.bf16.mxu1 %v7861_v3 }
 0x2d1   : > { %6394 = vmatmul.mubr.msk.bf16.gmra.mrb[124].mxu0 %vm787_vm1, %v7778_v9 }
 0x2d2   : > { %2290 = vmatprep.mubr.bf16.mxu0 %v7861_v3 }
 0x2d5   : > { %6400 = vmatmul.mubr.msk.bf16.gmra.mrb[132].mxu1 %vm787_vm1, %v8492_v19 }
 0x2d6   : > { %2373 = vmatprep.mubr.bf16.mxu1 %v7861_v3 }
 0x2d9   : > { %6395 = vmatmul.mubr.msk.bf16.gmra.mrb[128].mxu0 %vm787_vm1, %v7779_v53 }
 0x2da   : > { %2300 = vmatprep.mubr.bf16.mxu0 %v7861_v3 }
 0x2dd   : > { %6401 = vmatmul.mubr.msk.bf16.gmra.mrb[136].mxu1 %vm787_vm1, %v7776_v6 }
 0x2de   : > { %2383 = vmatprep.mubr.bf16.mxu1 %v7861_v3 }
 0x2e1   : > { %6396 = vmatmul.mubr.msk.bf16.gmra.mrb[132].mxu0 %vm787_vm1, %v7780_v17 }
 0x2e2   : > { %2310 = vmatprep.mubr.bf16.mxu0 %v7861_v3 }
 0x2e5   : > { %6402 = vmatmul.mubr.msk.bf16.gmra.mrb[140].mxu1 %vm787_vm1, %v7777_v7 }
 0x2e6   : > { %2393 = vmatprep.mubr.bf16.mxu1 %v7861_v3 }
 0x2e9   : > { %6397 = vmatmul.mubr.msk.bf16.gmra.mrb[136].mxu0 %vm787_vm1, %v7781_v31 }
 0x2ea   : > { %2610 = vmatprep.mubr.bf16.mxu0 %v7861_v3 }
 0x2ed   : > { %6403 = vmatmul.mubr.msk.bf16.gmra.mrb[144].mxu1 %vm787_vm1, %v7778_v9 }
 0x2ee   : > { %2403 = vmatprep.mubr.bf16.mxu1 %v7861_v3 }
 0x2f5   : > { %6404 = vmatmul.mubr.msk.bf16.gmra.mrb[148].mxu1 %vm787_vm1, %v7779_v53 }
 0x2f6   : > { %2413 = vmatprep.mubr.bf16.mxu1 %v7861_v3 }
 0x2fd   : > { %6405 = vmatmul.mubr.msk.bf16.gmra.mrb[152].mxu1 %vm787_vm1, %v7780_v17 }
 0x2fe   : > { %2423 = vmatprep.mubr.bf16.mxu1 %v7861_v3 }
 0x305   : > { %6406 = vmatmul.mubr.msk.bf16.gmra.mrb[156].mxu1 %vm787_vm1, %v7781_v31 }
 0x306   : > { %2723 = vmatprep.mubr.bf16.mxu1 %v7861_v3 }
 0x334   : > { %v1879_v42 = vpop.f32.mrb[100].mxu0 }
 0x335   : > { %v1968_v18 = vsub.f32 0.0, %v1879_v42  ;;  %v1881_v23 = vpop.f32.mrb[101].mxu0 }
 0x336   : > { %v1969_v13 = vsub.f32 0.0, %v1881_v23  ;;  %v1883_v24 = vpop.f32.mrb[102].mxu0 }
 0x337   : > { %v1980_v25 = vand.u32 2147483647, %v1968_v18  ;;  %v1884_v39 = vpop.f32.mrb[103].mxu0  ;;  %v1974_v57 = vmax.f32 %v1968_v18, 0.0 }
 0x338   : > { %v1981_v28 = vand.u32 2147483647, %v1969_v13  ;;  %v1975_v59 = vmax.f32 %v1969_v13, 0.0 }
 0x339   : > { %v1986_v19 = vsub.f32 0.0, %v1980_v25 }
 0x33a   : > { %v1987_v33 = vsub.f32 0.0, %v1981_v28 }
 0x33b   : > { %v1992_v16 = vmul.f32 1.442695, %v1986_v19 }
 0x33c   : > { %v1994_v44 = vmul.f32 1.442695, %v1987_v33 }
 0x33d   : > { %7710 = vpow2.f32 %v1992_v16 }
 0x33e   : > { %7712 = vpow2.f32 %v1994_v44 }
 0x347   : > { %v7711_v58 = vpop.eup %7710 }
 0x348   : > { %v7713_v47 = vpop.eup %7712  ;;  %v2004_v48 = vadd.f32 1.0, %v7711_v58 }
 0x349   : > { %v2005_v51 = vadd.f32 1.0, %v7713_v47 }
 0x34a   : > { %7714 = vlog2.f32 %v2004_v48 }
 0x34b   : > { %7716 = vlog2.f32 %v2005_v51 }
 0x354   : > { %v7715_v55 = vpop.eup %7714 }
 0x355   : > { %v7717_v0 = vpop.eup %7716  ;;  %v2011_v37 = vmul.f32 0.6931472, %v7715_v55 }
 0x356   : > { %v2013_v6 = vmul.f32 0.6931472, %v7717_v0 }
 0x357   : > { %v2022_v46 = vadd.f32 %v2011_v37, %v1974_v57 }
 0x358   : > { %v2023_v60 = vadd.f32 %v2013_v6, %v1975_v59  ;;  %v8578_v61 = vpop.f32.mrb[92].mxu1 }
 0x359   : > { %v2029_v41 = vsel %vm2028_vm3, %v2022_v46, 0.0  ;;  %v1970_v35 = vsub.f32 0.0, %v8578_v61  ;;  %v8582_v52 = vpop.f32.mrb[93].mxu1 }
 0x35a   : > { %v2030_v34 = vsel %vm2028_vm3, %v2023_v60, 0.0  ;;  %v1971_v2 = vsub.f32 0.0, %v8582_v52  ;;  %v1924_v4 = vpop.f32.mrb[94].mxu1 }
 0x35b   : > { %v8586_v7 = vadd.f32 %v2030_v34, %v2029_v41  ;;  %v1982_v8 = vand.u32 2147483647, %v1970_v35  ;;  %v1925_v9 = vpop.f32.mrb[95].mxu1 }
 0x35c   : > { %v1983_v53 = vand.u32 2147483647, %v1971_v2 }
 0x35d   : > { %v1988_v17 = vsub.f32 0.0, %v1982_v8 }
 0x35e   : > { %v1989_v31 = vsub.f32 0.0, %v1983_v53 }
 0x35f   : > { %v1996_v42 = vmul.f32 1.442695, %v1988_v17 }
 0x360   : > { %v1998_v18 = vmul.f32 1.442695, %v1989_v31  ;;  %v2129_v23 = vpop.f32.mrb[96].mxu1 }
 0x361   : > { %7718 = vpow2.f32 %v1996_v42  ;;  %v2130_v13 = vadd.f32 %v2129_v23, %v8191_v21  ;;  %v2131_v24 = vpop.f32.mrb[97].mxu1 }
 0x362   : > { %7720 = vpow2.f32 %v1998_v18  ;;  %v2132_v25 = vadd.f32 %v2131_v24, %v8191_v21  ;;  %v2133_v39 = vpop.f32.mrb[98].mxu1 }
 0x363   : > { %v2134_v28 = vadd.f32 %v2133_v39, %v8195_v32  ;;  %v2135_v19 = vpop.f32.mrb[99].mxu1  ;;  %v2434_v16 = vmax.f32 %v2130_v13, 0.0 }
 0x364   : > { %v2136_v33 = vadd.f32 %v2135_v19, %v8195_v32  ;;  %v2435_v58 = vmax.f32 %v2132_v25, 0.0 }
 0x365   : > { %v2440_v44 = vmax.f32 %v2134_v28, 0.0 }
 0x366   : > { %v2441_v47 = vmax.f32 %v2136_v33, 0.0 }
 0x367   : > { %v2530_v48 = vpack.c.bf16 %v2440_v44, %v2434_v16 }
 0x368   : > { %v2531_v51 = vpack.c.bf16 %v2441_v47, %v2435_v58  ;;  %v2139_v57 = vpop.f32.mrb[100].mxu1 }
 0x369   : > { %v2140_v55 = vadd.f32 %v2139_v57, %v8193_v26  ;;  %v2141_v59 = vpop.f32.mrb[101].mxu1 }
 0x36a   : > { %v2142_v0 = vadd.f32 %v2141_v59, %v8193_v26  ;;  %v2143_v37 = vpop.f32.mrb[102].mxu1  ;;  %2578 = vmatprep.subr.bf16.mxu0 %v2531_v51 }
 0x36b   : > { %v7719_v6 = vpop.eup %7718  ;;  %v2144_v46 = vadd.f32 %v2143_v37, %v8202_v43  ;;  %v2145_v60 = vpop.f32.mrb[103].mxu1  ;;  %2579 = vmatpush1.bf16.msra.mxu0 %v2530_v48  ;;  %v2446_v9 = vmax.f32 %v2140_v55, 0.0 }
 0x36c   : > { %v7721_v41 = vpop.eup %7720  ;;  %v2006_v34 = vadd.f32 1.0, %v7719_v6  ;;  %v2146_v4 = vadd.f32 %v2145_v60, %v8202_v43  ;;  %v2447_v17 = vmax.f32 %v2142_v0, 0.0  ;;  %v1976_v0 = vmax.f32 %v1970_v35, 0.0 }
 0x36d   : > { %v2007_v8 = vadd.f32 1.0, %v7721_v41  ;;  %v2452_v53 = vmax.f32 %v2144_v46, 0.0  ;;  %v1977_v60 = vmax.f32 %v1971_v2, 0.0 }
 0x36e   : > { %7722 = vlog2.f32 %v2006_v34  ;;  %v2453_v31 = vmax.f32 %v2146_v4, 0.0 }
 0x36f   : > { %7724 = vlog2.f32 %v2007_v8  ;;  %v2536_v42 = vpack.c.bf16 %v2452_v53, %v2446_v9 }
 0x370   : > { %v2537_v18 = vpack.c.bf16 %v2453_v31, %v2447_v17  ;;  %v2149_v23 = vpop.f32.mrb[104].mxu1 }
 0x371   : > { %v2150_v13 = vadd.f32 %v2149_v23, %v8208_v62  ;;  %v2151_v24 = vpop.f32.mrb[105].mxu1 }
 0x372   : > { %v2152_v25 = vadd.f32 %v2151_v24, %v8208_v62  ;;  %v2153_v39 = vpop.f32.mrb[106].mxu1  ;;  %2580 = vmatprep.subr.bf16.mxu0 %v2537_v18 }
 0x373   : > { %v2154_v28 = vadd.f32 %v2153_v39, %v8218_v11  ;;  %v2155_v19 = vpop.f32.mrb[107].mxu1  ;;  %2581 = vmatpush1.bf16.msra.mxu0 %v2536_v42  ;;  %v2458_v16 = vmax.f32 %v2150_v13, 0.0 }
 0x374   : > { %v2156_v33 = vadd.f32 %v2155_v19, %v8218_v11  ;;  %v2459_v58 = vmax.f32 %v2152_v25, 0.0 }
 0x375   : > { %v2464_v44 = vmax.f32 %v2154_v28, 0.0 }
 0x376   : > { %v2465_v47 = vmax.f32 %v2156_v33, 0.0 }
 0x377   : > { %v2542_v48 = vpack.c.bf16 %v2464_v44, %v2458_v16 }
 0x378   : > { %v7723_v51 = vpop.eup %7722  ;;  %v2543_v57 = vpack.c.bf16 %v2465_v47, %v2459_v58  ;;  %v2159_v55 = vpop.f32.mrb[108].mxu1 }
 0x379   : > { %v7725_v59 = vpop.eup %7724  ;;  %v2015_v37 = vmul.f32 0.6931472, %v7723_v51  ;;  %v2160_v6 = vadd.f32 %v2159_v55, %v8224_v38  ;;  %v2161_v46 = vpop.f32.mrb[109].mxu1 }
 0x37a   : > { %v2017_v41 = vmul.f32 0.6931472, %v7725_v59  ;;  %v2162_v34 = vadd.f32 %v2161_v46, %v8224_v38  ;;  %v2163_v4 = vpop.f32.mrb[110].mxu1  ;;  %2582 = vmatprep.subr.bf16.mxu0 %v2543_v57 }
 0x37b   : > { %v2024_v8 = vadd.f32 %v2015_v37, %v1976_v0  ;;  %v2164_v9 = vadd.f32 %v2163_v4, %v8234_v50  ;;  %v2165_v53 = vpop.f32.mrb[111].mxu1  ;;  %2583 = vmatpush1.bf16.msra.mxu0 %v2542_v48  ;;  %v2470_v61 = vmax.f32 %v2160_v6, 0.0 }
 0x37c   : > { %v2025_v17 = vadd.f32 %v2017_v41, %v1977_v60  ;;  %v2166_v35 = vadd.f32 %v2165_v53, %v8234_v50  ;;  %v8612_v31 = vpop.f32.mrb[104].mxu0  ;;  %v2471_v52 = vmax.f32 %v2162_v34, 0.0 }
 0x37d   : > { %v2032_v42 = vsel %vm2028_vm3, %v2024_v8, 0.0  ;;  %v2476_v2 = vmax.f32 %v2164_v9, 0.0  ;;  %v1972_v18 = vsub.f32 0.0, %v8612_v31  ;;  %v8616_v23 = vpop.f32.mrb[105].mxu0 }
 0x37e   : > { %v2477_v13 = vmax.f32 %v2166_v35, 0.0  ;;  %v1973_v24 = vsub.f32 0.0, %v8616_v23  ;;  %v1965_v25 = vpop.f32.mrb[106].mxu0  ;;  %v2033_v39 = vadd.f32 %v2032_v42, %v8586_v7  ;;  %v2034_v28 = vsel %vm2028_vm3, %v2025_v17, 0.0 }
 0x37f   : > { %v2548_v19 = vpack.c.bf16 %v2476_v2, %v2470_v61  ;;  %v1984_v33 = vand.u32 2147483647, %v1972_v18  ;;  %v1966_v16 = vpop.f32.mrb[107].mxu0 }
 0x380   : > { %v2549_v44 = vpack.c.bf16 %v2477_v13, %v2471_v52  ;;  %v1985_v58 = vand.u32 2147483647, %v1973_v24  ;;  %v2169_v47 = vpop.f32.mrb[112].mxu1  ;;  %v8625_v48 = vadd.f32 %v2034_v28, %v2033_v39 }
 0x381   : > { %v1990_v51 = vsub.f32 0.0, %v1984_v33  ;;  %v2170_v57 = vadd.f32 %v2169_v47, %v8240_v10  ;;  %v2171_v55 = vpop.f32.mrb[113].mxu1 }
 0x382   : > { %v1991_v59 = vsub.f32 0.0, %v1985_v58  ;;  %v2172_v7 = vadd.f32 %v2171_v55, %v8240_v10  ;;  %v2173_v0 = vpop.f32.mrb[114].mxu1  ;;  %2584 = vmatprep.subr.bf16.mxu0 %v2549_v44 }
 0x383   : > { %v2000_v37 = vmul.f32 1.442695, %v1990_v51  ;;  %v2174_v6 = vadd.f32 %v2173_v0, %v8250_v29  ;;  %v2175_v46 = vpop.f32.mrb[115].mxu1  ;;  %2585 = vmatpush1.bf16.msra.mxu0 %v2548_v19  ;;  %v2482_v4 = vmax.f32 %v2170_v57, 0.0 }
 0x384   : > { %v2002_v60 = vmul.f32 1.442695, %v1991_v59  ;;  %v2176_v41 = vadd.f32 %v2175_v46, %v8250_v29  ;;  %v2242_v34 = vpop.f32.mrb[108].mxu0  ;;  %v2483_v17 = vmax.f32 %v2172_v7, 0.0 }
 0x385   : > { %7726 = vpow2.f32 %v2000_v37  ;;  %v2488_v8 = vmax.f32 %v2174_v6, 0.0  ;;  %v2243_v9 = vadd.f32 %v2242_v34, %v8191_v21  ;;  %v2244_v53 = vpop.f32.mrb[109].mxu0 }
 0x386   : > { %7728 = vpow2.f32 %v2002_v60  ;;  %v2489_v61 = vmax.f32 %v2176_v41, 0.0  ;;  %v2245_v35 = vadd.f32 %v2244_v53, %v8191_v21  ;;  %v2246_v42 = vpop.f32.mrb[110].mxu0 }
 0x387   : > { %v2554_v52 = vpack.c.bf16 %v2488_v8, %v2482_v4  ;;  %v2247_v2 = vadd.f32 %v2246_v42, %v8195_v32  ;;  %v2248_v13 = vpop.f32.mrb[111].mxu0  ;;  %v2436_v19 = vmax.f32 %v2243_v9, 0.0 }
 0x388   : > { %v2555_v25 = vpack.c.bf16 %v2489_v61, %v2483_v17  ;;  %v2249_v39 = vadd.f32 %v2248_v13, %v8195_v32  ;;  %v2179_v28 = vpop.f32.mrb[116].mxu1  ;;  %v2437_v58 = vmax.f32 %v2245_v35, 0.0 }
 0x389   : > { %v2442_v33 = vmax.f32 %v2247_v2, 0.0  ;;  %v2180_v16 = vadd.f32 %v2179_v28, %v8256_v54  ;;  %v2181_v44 = vpop.f32.mrb[117].mxu1 }
 0x38a   : > { %v2443_v47 = vmax.f32 %v2249_v39, 0.0  ;;  %v2182_v51 = vadd.f32 %v2181_v44, %v8256_v54  ;;  %v2183_v57 = vpop.f32.mrb[118].mxu1  ;;  %2586 = vmatprep.subr.bf16.mxu0 %v2555_v25 }
 0x38b   : > { %v2532_v55 = vpack.c.bf16 %v2442_v33, %v2436_v19  ;;  %v2184_v59 = vadd.f32 %v2183_v57, %v8266_v5  ;;  %v2185_v7 = vpop.f32.mrb[119].mxu1  ;;  %2587 = vmatpush1.bf16.msra.mxu0 %v2554_v52  ;;  %v2494_v46 = vmax.f32 %v2180_v16, 0.0 }
 0x38c   : > { %v2533_v0 = vpack.c.bf16 %v2443_v47, %v2437_v58  ;;  %v2186_v37 = vadd.f32 %v2185_v7, %v8266_v5  ;;  %v2252_v6 = vpop.f32.mrb[112].mxu0  ;;  %v2495_v4 = vmax.f32 %v2182_v51, 0.0 }
 0x38d   : > { %v2500_v60 = vmax.f32 %v2184_v59, 0.0  ;;  %v2253_v41 = vadd.f32 %v2252_v6, %v8193_v26  ;;  %v2254_v34 = vpop.f32.mrb[113].mxu0 }
 0x38e   : > { %v2501_v8 = vmax.f32 %v2186_v37, 0.0  ;;  %v2255_v9 = vadd.f32 %v2254_v34, %v8193_v26  ;;  %v2256_v53 = vpop.f32.mrb[114].mxu0  ;;  %2691 = vmatprep.subr.bf16.mxu1 %v2533_v0 }
 0x38f   : > { %v7727_v17 = vpop.eup %7726  ;;  %v2560_v61 = vpack.c.bf16 %v2500_v60, %v2494_v46  ;;  %v2257_v35 = vadd.f32 %v2256_v53, %v8202_v43  ;;  %v2258_v42 = vpop.f32.mrb[115].mxu0  ;;  %2692 = vmatpush1.bf16.msra.mxu1 %v2532_v55  ;;  %v2448_v19 = vmax.f32 %v2253_v41, 0.0 }
 0x390   : > { %v7729_v52 = vpop.eup %7728  ;;  %v2008_v2 = vadd.f32 1.0, %v7727_v17  ;;  %v2561_v13 = vpack.c.bf16 %v2501_v8, %v2495_v4  ;;  %v2259_v25 = vadd.f32 %v2258_v42, %v8202_v43  ;;  %v2189_v39 = vpop.f32.mrb[120].mxu1  ;;  %v2449_v58 = vmax.f32 %v2255_v9, 0.0 }
 0x391   : > { %v2009_v28 = vadd.f32 1.0, %v7729_v52  ;;  %v2454_v33 = vmax.f32 %v2257_v35, 0.0  ;;  %v2190_v16 = vadd.f32 %v2189_v39, %v8272_v40  ;;  %v2191_v44 = vpop.f32.mrb[121].mxu1 }
 0x392   : > { %7730 = vlog2.f32 %v2008_v2  ;;  %v2455_v47 = vmax.f32 %v2259_v25, 0.0  ;;  %v2192_v51 = vadd.f32 %v2191_v44, %v8272_v40  ;;  %v2193_v57 = vpop.f32.mrb[122].mxu1  ;;  %2588 = vmatprep.subr.bf16.mxu0 %v2561_v13 }
 0x393   : > { %7732 = vlog2.f32 %v2009_v28  ;;  %v2538_v55 = vpack.c.bf16 %v2454_v33, %v2448_v19  ;;  %v2194_v59 = vadd.f32 %v2193_v57, %v8282_v56  ;;  %v2195_v7 = vpop.f32.mrb[123].mxu1  ;;  %2589 = vmatpush1.bf16.msra.mxu0 %v2560_v61  ;;  %v2506_v46 = vmax.f32 %v2190_v16, 0.0 }
 0x394   : > { %v2539_v0 = vpack.c.bf16 %v2455_v47, %v2449_v58  ;;  %v2196_v37 = vadd.f32 %v2195_v7, %v8282_v56  ;;  %v2262_v6 = vpop.f32.mrb[116].mxu0  ;;  %v2507_v4 = vmax.f32 %v2192_v51, 0.0  ;;  %v1978_v58 = vmax.f32 %v1972_v18, 0.0 }
 0x395   : > { %v2512_v60 = vmax.f32 %v2194_v59, 0.0  ;;  %v2263_v41 = vadd.f32 %v2262_v6, %v8208_v62  ;;  %v2264_v34 = vpop.f32.mrb[117].mxu0  ;;  %v1979_v59 = vmax.f32 %v1973_v24, 0.0 }
 0x396   : > { %v2513_v8 = vmax.f32 %v2196_v37, 0.0  ;;  %v2265_v9 = vadd.f32 %v2264_v34, %v8208_v62  ;;  %v2266_v53 = vpop.f32.mrb[118].mxu0  ;;  %2693 = vmatprep.subr.bf16.mxu1 %v2539_v0 }
 0x397   : > { %v2566_v17 = vpack.c.bf16 %v2512_v60, %v2506_v46  ;;  %v2267_v35 = vadd.f32 %v2266_v53, %v8218_v11  ;;  %v2268_v42 = vpop.f32.mrb[119].mxu0  ;;  %2694 = vmatpush1.bf16.msra.mxu1 %v2538_v55  ;;  %v2460_v13 = vmax.f32 %v2263_v41, 0.0 }
 0x398   : > { %v2567_v61 = vpack.c.bf16 %v2513_v8, %v2507_v4  ;;  %v2269_v52 = vadd.f32 %v2268_v42, %v8218_v11  ;;  %v2199_v2 = vpop.f32.mrb[124].mxu1  ;;  %v2461_v19 = vmax.f32 %v2265_v9, 0.0 }
 0x399   : > { %v2466_v25 = vmax.f32 %v2267_v35, 0.0  ;;  %v2200_v39 = vadd.f32 %v2199_v2, %v8288_v30  ;;  %v2201_v28 = vpop.f32.mrb[125].mxu1 }
 0x39a   : > { %v2467_v33 = vmax.f32 %v2269_v52, 0.0  ;;  %v2202_v16 = vadd.f32 %v2201_v28, %v8288_v30  ;;  %v2203_v44 = vpop.f32.mrb[126].mxu1  ;;  %2590 = vmatprep.subr.bf16.mxu0 %v2567_v61 }
 0x39b   : > { %v2544_v47 = vpack.c.bf16 %v2466_v25, %v2460_v13  ;;  %v2204_v51 = vadd.f32 %v2203_v44, %v8298_v49  ;;  %v2205_v57 = vpop.f32.mrb[127].mxu1  ;;  %2591 = vmatpush1.bf16.msra.mxu0 %v2566_v17  ;;  %v2518_v60 = vmax.f32 %v2200_v39, 0.0 }
 0x39c   : > { %v7731_v55 = vpop.eup %7730  ;;  %v2545_v7 = vpack.c.bf16 %v2467_v33, %v2461_v19  ;;  %v2206_v0 = vadd.f32 %v2205_v57, %v8298_v49  ;;  %v2272_v37 = vpop.f32.mrb[120].mxu0  ;;  %v2519_v34 = vmax.f32 %v2202_v16, 0.0 }
 0x39d   : > { %v7733_v6 = vpop.eup %7732  ;;  %v2019_v46 = vmul.f32 0.6931472, %v7731_v55  ;;  %v2524_v41 = vmax.f32 %v2204_v51, 0.0  ;;  %v2273_v31 = vadd.f32 %v2272_v37, %v8224_v38  ;;  %v2274_v18 = vpop.f32.mrb[121].mxu0 }
 0x39e   : > { %v2525_v4 = vmax.f32 %v2206_v0, 0.0  ;;  %v2275_v8 = vadd.f32 %v2274_v18, %v8224_v38  ;;  %v2276_v9 = vpop.f32.mrb[122].mxu0  ;;  %2695 = vmatprep.subr.bf16.mxu1 %v2545_v7  ;;  %v2021_v53 = vmul.f32 0.6931472, %v7733_v6 }
 0x39f   : > { %v2026_v23 = vadd.f32 %v2019_v46, %v1978_v58  ;;  %v2572_v24 = vpack.c.bf16 %v2524_v41, %v2518_v60  ;;  %v2277_v17 = vadd.f32 %v2276_v9, %v8234_v50  ;;  %v2278_v35 = vpop.f32.mrb[123].mxu0  ;;  %2696 = vmatpush1.bf16.msra.mxu1 %v2544_v47  ;;  %v2472_v61 = vmax.f32 %v2273_v31, 0.0 }
 0x3a0   : > { %v2573_v42 = vpack.c.bf16 %v2525_v4, %v2519_v34  ;;  %v2279_v52 = vadd.f32 %v2278_v35, %v8234_v50  ;;  %v2355_v2 = vpop.f32.mrb[128].mxu1  ;;  %v2027_v13 = vadd.f32 %v2021_v53, %v1979_v59  ;;  %v2473_v25 = vmax.f32 %v2275_v8, 0.0 }
 0x3a1   : > { %v2478_v39 = vmax.f32 %v2277_v17, 0.0  ;;  %v2356_v28 = vadd.f32 %v2355_v2, %v8191_v21  ;;  %v2357_v19 = vpop.f32.mrb[129].mxu1  ;;  %v2036_v33 = vsel %vm2028_vm3, %v2026_v23, 0.0 }
 0x3a2   : > { %v2479_v16 = vmax.f32 %v2279_v52, 0.0  ;;  %v2358_v44 = vadd.f32 %v2357_v19, %v8191_v21  ;;  %v2359_v58 = vpop.f32.mrb[130].mxu1  ;;  %2592 = vmatprep.subr.bf16.mxu0 %v2573_v42  ;;  %v2037_v47 = vadd.f32 %v2036_v33, %v8625_v48  ;;  %v2039_v51 = vsel %vm2038_vm4, %v2027_v13, 0.0 }
 0x3a3   : > { %v2550_v57 = vpack.c.bf16 %v2478_v39, %v2472_v61  ;;  %v2360_v55 = vadd.f32 %v2359_v58, %v8195_v32  ;;  %v2361_v59 = vpop.f32.mrb[131].mxu1  ;;  %2593 = vmatpush1.bf16.msra.mxu0 %v2572_v24  ;;  %v2438_v46 = vmax.f32 %v2356_v28, 0.0 }
 0x3a4   : > { %v2551_v7 = vpack.c.bf16 %v2479_v16, %v2473_v25  ;;  %v2362_v0 = vadd.f32 %v2361_v59, %v8195_v32  ;;  %v2282_v37 = vpop.f32.mrb[124].mxu0  ;;  %v2040_v6 = vadd.f32 %v2039_v51, %v2037_v47  ;;  %v2439_v31 = vmax.f32 %v2358_v44, 0.0  ;;  %v8676_v32 = vld [vmem:[%s10333_s6] sm:$0xff]  }
 0x3a5   : > { %v2444_v60 = vmax.f32 %v2360_v55, 0.0  ;;  %v2283_v21 = vadd.f32 %v2282_v37, %v8240_v10  ;;  %v2284_v41 = vpop.f32.mrb[125].mxu0 }
 0x3a6   : > { %v2445_v18 = vmax.f32 %v2362_v0, 0.0  ;;  %v2285_v48 = vadd.f32 %v2284_v41, %v8240_v10  ;;  %v2286_v34 = vpop.f32.mrb[126].mxu0  ;;  %2697 = vmatprep.subr.bf16.mxu1 %v2551_v7  ;;  %2041 = vadd.xlane.f32.xlu0 %v2040_v6  ;;  %v8691_v6 = vld [vmem:[%s10333_s6 + $0x8] sm:$0xff]  }
 0x3a7   : > { %v2534_v4 = vpack.c.bf16 %v2444_v60, %v2438_v46  ;;  %v2287_v8 = vadd.f32 %v2286_v34, %v8250_v29  ;;  %2611 = vmatmul.mubr.bf16.vlgmr.msra.gmra.mrb[140].mxu0 %v8676_v32  ;;  %v2288_v9 = vpop.f32.mrb[127].mxu0  ;;  %2698 = vmatpush1.bf16.msra.mxu1 %v2550_v57  ;;  %v2484_v17 = vmax.f32 %v2283_v21, 0.0 }
 0x3a8   : > { %v2535_v53 = vpack.c.bf16 %v2445_v18, %v2439_v31  ;;  %v2289_v23 = vadd.f32 %v2288_v9, %v8250_v29  ;;  %v2365_v24 = vpop.f32.mrb[132].mxu1  ;;  %2620 = vmatprep.mubr.bf16.mxu0 %v7861_v3  ;;  %v2485_v52 = vmax.f32 %v2285_v48, 0.0 }
 0x3a9   : > { %v2490_v35 = vmax.f32 %v2287_v8, 0.0  ;;  %v2366_v42 = vadd.f32 %v2365_v24, %v8193_v26  ;;  %v2367_v61 = vpop.f32.mrb[133].mxu1 }
 0x3aa   : > { %v2491_v2 = vmax.f32 %v2289_v23, 0.0  ;;  %v2368_v13 = vadd.f32 %v2367_v61, %v8193_v26  ;;  %v2369_v25 = vpop.f32.mrb[134].mxu1  ;;  %2804 = vmatprep.subr.bf16.mxu0 %v2535_v53 }
 0x3ab   : > { %v2556_v39 = vpack.c.bf16 %v2490_v35, %v2484_v17  ;;  %v2370_v28 = vadd.f32 %v2369_v25, %v8202_v43  ;;  %v2371_v19 = vpop.f32.mrb[135].mxu1  ;;  %2805 = vmatpush1.bf16.msra.mxu0 %v2534_v4  ;;  %v2450_v58 = vmax.f32 %v2366_v42, 0.0 }
 0x3ac   : > { %v2557_v33 = vpack.c.bf16 %v2491_v2, %v2485_v52  ;;  %v2372_v16 = vadd.f32 %v2371_v19, %v8202_v43  ;;  %v2292_v44 = vpop.f32.mrb[128].mxu0  ;;  %v2451_v55 = vmax.f32 %v2368_v13, 0.0 }
 0x3ad   : > { %v2456_v47 = vmax.f32 %v2370_v28, 0.0  ;;  %v2293_v51 = vadd.f32 %v2292_v44, %v8256_v54  ;;  %v2294_v57 = vpop.f32.mrb[129].mxu0 }
 0x3ae   : > { %v2457_v59 = vmax.f32 %v2372_v16, 0.0  ;;  %v2295_v26 = vadd.f32 %v2294_v57, %v8256_v54  ;;  %v2296_v7 = vpop.f32.mrb[130].mxu0  ;;  %2699 = vmatprep.subr.bf16.mxu1 %v2557_v33  ;;  %v8706_v16 = vld [vmem:[%s10333_s6 + $0x10] sm:$0xff]  }
 0x3af   : > { %v2540_v0 = vpack.c.bf16 %v2456_v47, %v2450_v58  ;;  %v2297_v37 = vadd.f32 %v2296_v7, %v8266_v5  ;;  %2621 = vmatmul.mubr.bf16.gmra.mrb[144].mxu0 %v8691_v6  ;;  %v2298_v43 = vpop.f32.mrb[131].mxu0  ;;  %2700 = vmatpush1.bf16.msra.mxu1 %v2556_v39  ;;  %v2496_v41 = vmax.f32 %v2293_v51, 0.0 }
 0x3b0   : > { %v2541_v46 = vpack.c.bf16 %v2457_v59, %v2451_v55  ;;  %v2299_v60 = vadd.f32 %v2298_v43, %v8266_v5  ;;  %v2375_v21 = vpop.f32.mrb[136].mxu1  ;;  %2630 = vmatprep.mubr.bf16.mxu0 %v7861_v3  ;;  %v2497_v34 = vmax.f32 %v2295_v26, 0.0 }
 0x3b1   : > { %v2502_v31 = vmax.f32 %v2297_v37, 0.0  ;;  %v2376_v18 = vadd.f32 %v2375_v21, %v8208_v62  ;;  %v2377_v48 = vpop.f32.mrb[137].mxu1 }
 0x3b2   : > { %v2503_v4 = vmax.f32 %v2299_v60, 0.0  ;;  %v2378_v8 = vadd.f32 %v2377_v48, %v8208_v62  ;;  %v2379_v9 = vpop.f32.mrb[138].mxu1  ;;  %2806 = vmatprep.subr.bf16.mxu0 %v2541_v46 }
 0x3b3   : > { %v2562_v53 = vpack.c.bf16 %v2502_v31, %v2496_v41  ;;  %v2380_v23 = vadd.f32 %v2379_v9, %v8218_v11  ;;  %v2381_v24 = vpop.f32.mrb[139].mxu1  ;;  %2807 = vmatpush1.bf16.msra.mxu0 %v2540_v0  ;;  %v2462_v61 = vmax.f32 %v2376_v18, 0.0 }
 0x3b4   : > { %v2563_v17 = vpack.c.bf16 %v2503_v4, %v2497_v34  ;;  %v2382_v35 = vadd.f32 %v2381_v24, %v8218_v11  ;;  %v2302_v42 = vpop.f32.mrb[132].mxu0  ;;  %v2463_v25 = vmax.f32 %v2378_v8, 0.0 }
 0x3b5   : > { %v2468_v52 = vmax.f32 %v2380_v23, 0.0  ;;  %v2303_v2 = vadd.f32 %v2302_v42, %v8272_v40  ;;  %v2304_v13 = vpop.f32.mrb[133].mxu0 }
 0x3b6   : > { %v2469_v39 = vmax.f32 %v2382_v35, 0.0  ;;  %v2305_v62 = vadd.f32 %v2304_v13, %v8272_v40  ;;  %v2306_v28 = vpop.f32.mrb[134].mxu0  ;;  %2701 = vmatprep.subr.bf16.mxu1 %v2563_v17  ;;  %v8721_v17 = vld [vmem:[%s10333_s6 + $0x18] sm:$0xff]  }
 0x3b7   : > { %v2546_v19 = vpack.c.bf16 %v2468_v52, %v2462_v61  ;;  %v2307_v33 = vadd.f32 %v2306_v28, %v8282_v56  ;;  %2631 = vmatmul.mubr.bf16.gmra.mrb[148].mxu0 %v8706_v16  ;;  %v2308_v11 = vpop.f32.mrb[135].mxu0  ;;  %2702 = vmatpush1.bf16.msra.mxu1 %v2562_v53  ;;  %v2508_v51 = vmax.f32 %v2303_v2, 0.0 }
 0x3b8   : > { %v2547_v44 = vpack.c.bf16 %v2469_v39, %v2463_v25  ;;  %v2309_v58 = vadd.f32 %v2308_v11, %v8282_v56  ;;  %v2385_v47 = vpop.f32.mrb[140].mxu1  ;;  %2640 = vmatprep.mubr.bf16.mxu0 %v7861_v3  ;;  %v2509_v26 = vmax.f32 %v2305_v62, 0.0 }
 0x3b9   : > { %v2514_v57 = vmax.f32 %v2307_v33, 0.0  ;;  %v2386_v55 = vadd.f32 %v2385_v47, %v8224_v38  ;;  %v2387_v59 = vpop.f32.mrb[141].mxu1 }
 0x3ba   : > { %v2515_v7 = vmax.f32 %v2309_v58, 0.0  ;;  %v2388_v0 = vadd.f32 %v2387_v59, %v8224_v38  ;;  %v2389_v37 = vpop.f32.mrb[142].mxu1  ;;  %2808 = vmatprep.subr.bf16.mxu0 %v2547_v44 }
 0x3bb   : > { %v2568_v43 = vpack.c.bf16 %v2514_v57, %v2508_v51  ;;  %v2390_v46 = vadd.f32 %v2389_v37, %v8234_v50  ;;  %v2391_v60 = vpop.f32.mrb[143].mxu1  ;;  %2809 = vmatpush1.bf16.msra.mxu0 %v2546_v19  ;;  %v2474_v18 = vmax.f32 %v2386_v55, 0.0 }
 0x3bc   : > { %v2569_v21 = vpack.c.bf16 %v2515_v7, %v2509_v26  ;;  %v2392_v41 = vadd.f32 %v2391_v60, %v8234_v50  ;;  %v2312_v31 = vpop.f32.mrb[136].mxu0  ;;  %v2475_v8 = vmax.f32 %v2388_v0, 0.0 }
 0x3bd   : > { %v2480_v48 = vmax.f32 %v2390_v46, 0.0  ;;  %v2313_v34 = vadd.f32 %v2312_v31, %v8288_v30  ;;  %v2314_v4 = vpop.f32.mrb[137].mxu0 }
 0x3be   : > { %v2481_v9 = vmax.f32 %v2392_v41, 0.0  ;;  %v2315_v38 = vadd.f32 %v2314_v4, %v8288_v30  ;;  %v2316_v53 = vpop.f32.mrb[138].mxu0  ;;  %2703 = vmatprep.subr.bf16.mxu1 %v2569_v21 }
 0x3bf   : > { %v2552_v23 = vpack.c.bf16 %v2480_v48, %v2474_v18  ;;  %v2317_v24 = vadd.f32 %v2316_v53, %v8298_v49  ;;  %2641 = vmatmul.mubr.bf16.gmra.mrb[152].mxu0 %v8721_v17  ;;  %v2318_v50 = vpop.f32.mrb[139].mxu0  ;;  %2704 = vmatpush1.bf16.msra.mxu1 %v2568_v43  ;;  %v2520_v52 = vmax.f32 %v2313_v34, 0.0 }
 0x3c0   : > { %v2553_v35 = vpack.c.bf16 %v2481_v9, %v2475_v8  ;;  %v2319_v42 = vadd.f32 %v2318_v50, %v8298_v49  ;;  %v2395_v61 = vpop.f32.mrb[144].mxu1  ;;  %2650 = vmatprep.mubr.bf16.mxu0 %v7861_v3  ;;  %v2521_v39 = vmax.f32 %v2315_v38, 0.0 }
 0x3c1   : > { %v2526_v2 = vmax.f32 %v2317_v24, 0.0  ;;  %v2396_v13 = vadd.f32 %v2395_v61, %v8240_v10  ;;  %v2397_v25 = vpop.f32.mrb[145].mxu1 }
 0x3c2   : > { %v2527_v62 = vmax.f32 %v2319_v42, 0.0  ;;  %v2398_v28 = vadd.f32 %v2397_v25, %v8240_v10  ;;  %v2399_v19 = vpop.f32.mrb[146].mxu1  ;;  %2810 = vmatprep.subr.bf16.mxu0 %v2553_v35  ;;  %v8733_v10 = vld [vmem:[%s10333_s6 + $0x20] sm:$0xff]  }
 0x3c3   : > { %v2574_v33 = vpack.c.bf16 %v2526_v2, %v2520_v52  ;;  %v2400_v11 = vadd.f32 %v2399_v19, %v8250_v29  ;;  %v2401_v44 = vpop.f32.mrb[147].mxu1  ;;  %2811 = vmatpush1.bf16.msra.mxu0 %v2552_v23  ;;  %v2486_v51 = vmax.f32 %v2396_v13, 0.0 }
 0x3c4   : > { %v2575_v58 = vpack.c.bf16 %v2527_v62, %v2521_v39  ;;  %v2402_v47 = vadd.f32 %v2401_v44, %v8250_v29  ;;  %v2487_v55 = vmax.f32 %v2398_v28, 0.0 }
 0x3c5   : > { %v2492_v57 = vmax.f32 %v2400_v11, 0.0 }
 0x3c6   : > { %v2493_v59 = vmax.f32 %v2402_v47, 0.0  ;;  %2705 = vmatprep.subr.bf16.mxu1 %v2575_v58 }
 0x3c7   : > { %v2558_v26 = vpack.c.bf16 %v2492_v57, %v2486_v51  ;;  %2651 = vmatmul.mubr.bf16.gmra.mrb[156].mxu0 %v8733_v10  ;;  %2706 = vmatpush1.bf16.msra.mxu1 %v2574_v33 }
 0x3c8   : > { %v2559_v7 = vpack.c.bf16 %v2493_v59, %v2487_v55  ;;  %v2405_v0 = vpop.f32.mrb[148].mxu1  ;;  %2660 = vmatprep.mubr.bf16.mxu0 %v7861_v3 }
 0x3c9   : > { %v2406_v29 = vadd.f32 %v2405_v0, %v8256_v54  ;;  %v2407_v37 = vpop.f32.mrb[149].mxu1 }
 0x3ca   : > { %v2408_v43 = vadd.f32 %v2407_v37, %v8256_v54  ;;  %v2409_v46 = vpop.f32.mrb[150].mxu1  ;;  %2724 = vmatmul.mubr.bf16.vlgmr.msra.gmra.mrb[160].mxu1 %v8676_v32  ;;  %2812 = vmatprep.subr.bf16.mxu0 %v2559_v7  ;;  %v8746_v54 = vld [vmem:[%s10333_s6 + $0x28] sm:$0xff]  }
 0x3cb   : > { %v2410_v60 = vadd.f32 %v2409_v46, %v8266_v5  ;;  %v2411_v21 = vpop.f32.mrb[151].mxu1  ;;  %2813 = vmatpush1.bf16.msra.mxu0 %v2558_v26  ;;  %2733 = vmatprep.mubr.bf16.mxu1 %v7861_v3  ;;  %v2498_v31 = vmax.f32 %v2406_v29, 0.0 }
 0x3cc   : > { %v2412_v41 = vadd.f32 %v2411_v21, %v8266_v5  ;;  %v2499_v48 = vmax.f32 %v2408_v43, 0.0 }
 0x3cd   : > { %v2504_v18 = vmax.f32 %v2410_v60, 0.0 }
 0x3ce   : > { %v2505_v34 = vmax.f32 %v2412_v41, 0.0 }
 0x3cf   : > { %v2564_v4 = vpack.c.bf16 %v2504_v18, %v2498_v31  ;;  %2661 = vmatmul.mubr.bf16.gmra.mrb[160].mxu0 %v8746_v54 }
 0x3d0   : > { %v2565_v8 = vpack.c.bf16 %v2505_v34, %v2499_v48  ;;  %v2415_v9 = vpop.f32.mrb[152].mxu1  ;;  %2670 = vmatprep.mubr.bf16.mxu0 %v7861_v3 }
 0x3d1   : > { %v2416_v38 = vadd.f32 %v2415_v9, %v8272_v40  ;;  %v2417_v53 = vpop.f32.mrb[153].mxu1 }
 0x3d2   : > { %v2418_v5 = vadd.f32 %v2417_v53, %v8272_v40  ;;  %v2419_v23 = vpop.f32.mrb[154].mxu1  ;;  %2734 = vmatmul.mubr.bf16.gmra.mrb[164].mxu1 %v8691_v6  ;;  %2814 = vmatprep.subr.bf16.mxu0 %v2565_v8  ;;  %v7788_v40 = vld [vmem:[%s10333_s6 + $0x30] sm:$0xff]  }
 0x3d3   : > { %v2420_v24 = vadd.f32 %v2419_v23, %v8282_v56  ;;  %v2421_v50 = vpop.f32.mrb[155].mxu1  ;;  %2815 = vmatpush1.bf16.msra.mxu0 %v2564_v4  ;;  %2743 = vmatprep.mubr.bf16.mxu1 %v7861_v3  ;;  %v2510_v42 = vmax.f32 %v2416_v38, 0.0 }
 0x3d4   : > { %v2422_v35 = vadd.f32 %v2421_v50, %v8282_v56  ;;  %v2511_v52 = vmax.f32 %v2418_v5, 0.0 }
 0x3d5   : > { %v2516_v61 = vmax.f32 %v2420_v24, 0.0 }
 0x3d6   : > { %v2517_v2 = vmax.f32 %v2422_v35, 0.0 }
 0x3d7   : > { %v2570_v13 = vpack.c.bf16 %v2516_v61, %v2510_v42  ;;  %2671 = vmatmul.mubr.bf16.gmra.mrb[164].mxu0 %v7788_v40 }
 0x3d8   : > { %v2571_v25 = vpack.c.bf16 %v2517_v2, %v2511_v52  ;;  %v2425_v39 = vpop.f32.mrb[156].mxu1  ;;  %2680 = vmatprep.mubr.bf16.mxu0 %v7861_v3 }
 0x3d9   : > { %v2426_v62 = vadd.f32 %v2425_v39, %v8288_v30  ;;  %v2427_v28 = vpop.f32.mrb[157].mxu1 }
 0x3da   : > { %v2428_v19 = vadd.f32 %v2427_v28, %v8288_v30  ;;  %v2429_v56 = vpop.f32.mrb[158].mxu1  ;;  %2744 = vmatmul.mubr.bf16.gmra.mrb[168].mxu1 %v8706_v16  ;;  %2816 = vmatprep.subr.bf16.mxu0 %v2571_v25  ;;  %v7789_v30 = vld [vmem:[%s10333_s6 + $0x38] sm:$0xff]  }
 0x3db   : > { %v2430_v33 = vadd.f32 %v2429_v56, %v8298_v49  ;;  %v2431_v11 = vpop.f32.mrb[159].mxu1  ;;  %2817 = vmatpush1.bf16.msra.mxu0 %v2570_v13  ;;  %2753 = vmatprep.mubr.bf16.mxu1 %v7861_v3  ;;  %v2522_v58 = vmax.f32 %v2426_v62, 0.0 }
 0x3dc   : > { %v2432_v44 = vadd.f32 %v2431_v11, %v8298_v49  ;;  %v2523_v51 = vmax.f32 %v2428_v19, 0.0 }
 0x3dd   : > { %v2528_v47 = vmax.f32 %v2430_v33, 0.0 }
 0x3de   : > { %v2529_v57 = vmax.f32 %v2432_v44, 0.0 }
 0x3df   : > { %v2576_v55 = vpack.c.bf16 %v2528_v47, %v2522_v58  ;;  %2681 = vmatmul.mubr.bf16.gmra.mrb[168].mxu0 %v7789_v30 }
 0x3e0   : > { %v2577_v59 = vpack.c.bf16 %v2529_v57, %v2523_v51  ;;  %2836 = vmatprep.mubr.bf16.mxu0 %v7861_v3 }
 0x3e2   : > { %2754 = vmatmul.mubr.bf16.gmra.mrb[172].mxu1 %v8721_v17  ;;  %2818 = vmatprep.subr.bf16.mxu0 %v2577_v59 }
 0x3e3   : > { %2819 = vmatpush1.bf16.msra.mxu0 %v2576_v55  ;;  %2763 = vmatprep.mubr.bf16.mxu1 %v7861_v3 }
 0x3e7   : > { %2837 = vmatmul.mubr.bf16.vlgmr.msra.gmra.mrb[172].mxu0 %v8676_v32 }
 0x3e8   : > { %2846 = vmatprep.mubr.bf16.mxu0 %v7861_v3 }
 0x3ea   : > { %2764 = vmatmul.mubr.bf16.gmra.mrb[176].mxu1 %v8733_v10 }
 0x3eb   : > { %2773 = vmatprep.mubr.bf16.mxu1 %v7861_v3 }
 0x3ef   : > { %2847 = vmatmul.mubr.bf16.gmra.mrb[176].mxu0 %v8691_v6 }
 0x3f0   : > { %2856 = vmatprep.mubr.bf16.mxu0 %v7861_v3 }
 0x3f2   : > { %2774 = vmatmul.mubr.bf16.gmra.mrb[180].mxu1 %v8746_v54 }
 0x3f3   : > { %2783 = vmatprep.mubr.bf16.mxu1 %v7861_v3 }
 0x3f7   : > { %2857 = vmatmul.mubr.bf16.gmra.mrb[180].mxu0 %v8706_v16 }
 0x3f8   : > { %2866 = vmatprep.mubr.bf16.mxu0 %v7861_v3 }
 0x3fa   : > { %2784 = vmatmul.mubr.bf16.gmra.mrb[184].mxu1 %v7788_v40 }
 0x3fb   : > { %2793 = vmatprep.mubr.bf16.mxu1 %v7861_v3 }
 0x3ff   : > { %2867 = vmatmul.mubr.bf16.gmra.mrb[184].mxu0 %v8721_v17 }
 0x400   : > { %2876 = vmatprep.mubr.bf16.mxu0 %v7861_v3 }
 0x402   : > { %2794 = vmatmul.mubr.bf16.gmra.mrb[188].mxu1 %v7789_v30 }
 0x403   : > { %3093 = vmatprep.mubr.bf16.mxu1 %v7861_v3 }
 0x407   : > { %2877 = vmatmul.mubr.bf16.gmra.mrb[188].mxu0 %v8733_v10 }
 0x408   : > { %2886 = vmatprep.mubr.bf16.mxu0 %v7861_v3 }
 0x40f   : > { %2887 = vmatmul.mubr.bf16.gmra.mrb[192].mxu0 %v8746_v54 }
 0x410   : > { %2896 = vmatprep.mubr.bf16.mxu0 %v7861_v3 }
 0x417   : > { %2897 = vmatmul.mubr.bf16.gmra.mrb[196].mxu0 %v7788_v40 }
 0x418   : > { %2906 = vmatprep.mubr.bf16.mxu0 %v7861_v3 }
 0x41f   : > { %2907 = vmatmul.mubr.bf16.gmra.mrb[200].mxu0 %v7789_v30 }
 0x420   : > { %3134 = vmatprep.mubr.bf16.mxu0 %v7861_v3 }
 0x433   : > { %v2042_v49 = vpop.xlane.xlu0 %2041 }
 0x434   : > { %v2043_v32 = vrot.slane %v2042_v49, 4 }
 0x436   : > { %v2044_v6 = vadd.f32 %v2043_v32, %v2042_v49 }
 0x438   : > { %v2045_v16 = vrot.slane %v2044_v6, 2 }
 0x43a   : > { %v2046_v17 = vadd.f32 %v2045_v16, %v2044_v6 }
 0x43c   : > { %v2047_v26 = vrot.slane %v2046_v17, 1 }
 0x43e   : > { %v2048_v7 = vadd.f32 %v2047_v26, %v2046_v17 }
 0x440   : > { %7432 = vpush %v2048_v7 }
 0x471   : > { %s10189_s27 = spop %7432 }
 0x47a   : > { %v2612_v10 = vpop.f32.mrb[140].mxu0 }
 0x47b   : > { %v2614_v0 = vpop.f32.mrb[141].mxu0  ;;  %v2917_v37 = vmax.f32 %v2612_v10, 0.0 }
 0x47c   : > { %v2616_v29 = vpop.f32.mrb[142].mxu0  ;;  %v2918_v60 = vmax.f32 %v2614_v0, 0.0 }
 0x47d   : > { %v2923_v43 = vmax.f32 %v2616_v29, 0.0  ;;  %v2618_v46 = vpop.f32.mrb[143].mxu0 }
 0x47e   : > { %v2924_v21 = vmax.f32 %v2618_v46, 0.0 }
 0x47f   : > { %v3013_v41 = vpack.c.bf16 %v2923_v43, %v2917_v37 }
 0x480   : > { %v3014_v31 = vpack.c.bf16 %v2924_v21, %v2918_v60 }
 0x482   : > { %v2622_v18 = vpop.f32.mrb[144].mxu0  ;;  %3061 = vmatprep.subr.bf16.mxu1 %v3014_v31 }
 0x483   : > { %v2624_v48 = vpop.f32.mrb[145].mxu0  ;;  %3062 = vmatpush1.bf16.msra.mxu1 %v3013_v41  ;;  %v2929_v4 = vmax.f32 %v2622_v18, 0.0 }
 0x484   : > { %v2626_v34 = vpop.f32.mrb[146].mxu0  ;;  %v2930_v9 = vmax.f32 %v2624_v48, 0.0 }
 0x485   : > { %v2935_v54 = vmax.f32 %v2626_v34, 0.0  ;;  %v2628_v8 = vpop.f32.mrb[147].mxu0 }
 0x486   : > { %v2936_v38 = vmax.f32 %v2628_v8, 0.0 }
 0x487   : > { %v3019_v53 = vpack.c.bf16 %v2935_v54, %v2929_v4 }
 0x488   : > { %v3020_v5 = vpack.c.bf16 %v2936_v38, %v2930_v9 }
 0x48a   : > { %v2632_v23 = vpop.f32.mrb[148].mxu0  ;;  %3063 = vmatprep.subr.bf16.mxu1 %v3020_v5 }
 0x48b   : > { %v2634_v24 = vpop.f32.mrb[149].mxu0  ;;  %3064 = vmatpush1.bf16.msra.mxu1 %v3019_v53  ;;  %v2941_v35 = vmax.f32 %v2632_v23, 0.0 }
 0x48c   : > { %v2636_v50 = vpop.f32.mrb[150].mxu0  ;;  %v2942_v52 = vmax.f32 %v2634_v24, 0.0 }
 0x48d   : > { %v2947_v42 = vmax.f32 %v2636_v50, 0.0  ;;  %v2638_v61 = vpop.f32.mrb[151].mxu0 }
 0x48e   : > { %v2948_v2 = vmax.f32 %v2638_v61, 0.0 }
 0x48f   : > { %v3025_v13 = vpack.c.bf16 %v2947_v42, %v2941_v35 }
 0x490   : > { %v3026_v40 = vpack.c.bf16 %v2948_v2, %v2942_v52 }
 0x492   : > { %v2642_v25 = vpop.f32.mrb[152].mxu0  ;;  %3065 = vmatprep.subr.bf16.mxu1 %v3026_v40 }
 0x493   : > { %v2644_v39 = vpop.f32.mrb[153].mxu0  ;;  %3066 = vmatpush1.bf16.msra.mxu1 %v3025_v13  ;;  %v2953_v28 = vmax.f32 %v2642_v25, 0.0 }
 0x494   : > { %v2646_v62 = vpop.f32.mrb[154].mxu0  ;;  %v2954_v33 = vmax.f32 %v2644_v39, 0.0 }
 0x495   : > { %v2959_v19 = vmax.f32 %v2646_v62, 0.0  ;;  %v2648_v56 = vpop.f32.mrb[155].mxu0 }
 0x496   : > { %v2960_v11 = vmax.f32 %v2648_v56, 0.0 }
 0x497   : > { %v3031_v44 = vpack.c.bf16 %v2959_v19, %v2953_v28 }
 0x498   : > { %v3032_v58 = vpack.c.bf16 %v2960_v11, %v2954_v33 }
 0x49a   : > { %v2652_v47 = vpop.f32.mrb[156].mxu0  ;;  %3067 = vmatprep.subr.bf16.mxu1 %v3032_v58 }
 0x49b   : > { %v2654_v51 = vpop.f32.mrb[157].mxu0  ;;  %3068 = vmatpush1.bf16.msra.mxu1 %v3031_v44  ;;  %v2965_v55 = vmax.f32 %v2652_v47, 0.0 }
 0x49c   : > { %v2656_v57 = vpop.f32.mrb[158].mxu0  ;;  %v2966_v32 = vmax.f32 %v2654_v51, 0.0 }
 0x49d   : > { %v2971_v30 = vmax.f32 %v2656_v57, 0.0  ;;  %v2658_v59 = vpop.f32.mrb[159].mxu0  ;;  %v2725_v49 = vpop.f32.mrb[160].mxu1 }
 0x49e   : > { %v2972_v6 = vmax.f32 %v2658_v59, 0.0  ;;  %v2919_v16 = vmax.f32 %v2725_v49, 0.0  ;;  %v2727_v17 = vpop.f32.mrb[161].mxu1 }
 0x49f   : > { %v3037_v26 = vpack.c.bf16 %v2971_v30, %v2965_v55  ;;  %v2920_v7 = vmax.f32 %v2727_v17, 0.0  ;;  %v2729_v10 = vpop.f32.mrb[162].mxu1 }
 0x4a0   : > { %v3038_v0 = vpack.c.bf16 %v2972_v6, %v2966_v32  ;;  %v2925_v29 = vmax.f32 %v2729_v10, 0.0  ;;  %v2731_v37 = vpop.f32.mrb[163].mxu1 }
 0x4a1   : > { %v2926_v43 = vmax.f32 %v2731_v37, 0.0 }
 0x4a2   : > { %v3015_v46 = vpack.c.bf16 %v2925_v29, %v2919_v16  ;;  %v2662_v60 = vpop.f32.mrb[160].mxu0  ;;  %3069 = vmatprep.subr.bf16.mxu1 %v3038_v0 }
 0x4a3   : > { %v3016_v21 = vpack.c.bf16 %v2926_v43, %v2920_v7  ;;  %v2664_v41 = vpop.f32.mrb[161].mxu0  ;;  %3070 = vmatpush1.bf16.msra.mxu1 %v3037_v26  ;;  %v2977_v48 = vmax.f32 %v2662_v60, 0.0 }
 0x4a4   : > { %v2666_v31 = vpop.f32.mrb[162].mxu0  ;;  %v2978_v9 = vmax.f32 %v2664_v41, 0.0 }
 0x4a5   : > { %v2735_v18 = vpop.f32.mrb[164].mxu1  ;;  %v2983_v34 = vmax.f32 %v2666_v31, 0.0  ;;  %v2668_v4 = vpop.f32.mrb[163].mxu0  ;;  %3102 = vmatprep.subr.bf16.mxu0 %v3016_v21 }
 0x4a6   : > { %v2931_v54 = vmax.f32 %v2735_v18, 0.0  ;;  %v2737_v8 = vpop.f32.mrb[165].mxu1  ;;  %v2984_v38 = vmax.f32 %v2668_v4, 0.0  ;;  %3103 = vmatpush1.bf16.msra.mxu0 %v3015_v46 }
 0x4a7   : > { %v2932_v53 = vmax.f32 %v2737_v8, 0.0  ;;  %v2739_v5 = vpop.f32.mrb[166].mxu1  ;;  %v3043_v23 = vpack.c.bf16 %v2983_v34, %v2977_v48 }
 0x4a8   : > { %v2937_v24 = vmax.f32 %v2739_v5, 0.0  ;;  %v2741_v50 = vpop.f32.mrb[167].mxu1  ;;  %v3044_v35 = vpack.c.bf16 %v2984_v38, %v2978_v9 }
 0x4a9   : > { %v2938_v42 = vmax.f32 %v2741_v50, 0.0 }
 0x4aa   : > { %v3021_v61 = vpack.c.bf16 %v2937_v24, %v2931_v54  ;;  %v2672_v52 = vpop.f32.mrb[164].mxu0  ;;  %3071 = vmatprep.subr.bf16.mxu1 %v3044_v35 }
 0x4ab   : > { %v3022_v2 = vpack.c.bf16 %v2938_v42, %v2932_v53  ;;  %v2674_v13 = vpop.f32.mrb[165].mxu0  ;;  %3072 = vmatpush1.bf16.msra.mxu1 %v3043_v23  ;;  %v2989_v39 = vmax.f32 %v2672_v52, 0.0 }
 0x4ac   : > { %v2676_v40 = vpop.f32.mrb[166].mxu0  ;;  %v2990_v33 = vmax.f32 %v2674_v13, 0.0 }
 0x4ad   : > { %v2745_v25 = vpop.f32.mrb[168].mxu1  ;;  %3104 = vmatprep.subr.bf16.mxu0 %v3022_v2  ;;  %v2995_v62 = vmax.f32 %v2676_v40, 0.0  ;;  %v2678_v28 = vpop.f32.mrb[167].mxu0 }
 0x4ae   : > { %v2943_v19 = vmax.f32 %v2745_v25, 0.0  ;;  %v2747_v56 = vpop.f32.mrb[169].mxu1  ;;  %3105 = vmatpush1.bf16.msra.mxu0 %v3021_v61  ;;  %v2996_v11 = vmax.f32 %v2678_v28, 0.0  ;;  %v8795_v61 = vld [vmem:[%s10334_s7] sm:$0x1] }
 0x4af   : > { %v2944_v44 = vmax.f32 %v2747_v56, 0.0  ;;  %v2749_v58 = vpop.f32.mrb[170].mxu1  ;;  %v3049_v47 = vpack.c.bf16 %v2995_v62, %v2989_v39 }
 0x4b0   : > { %v2949_v51 = vmax.f32 %v2749_v58, 0.0  ;;  %v2751_v57 = vpop.f32.mrb[171].mxu1  ;;  %v3050_v55 = vpack.c.bf16 %v2996_v11, %v2990_v33 }
 0x4b1   : > { %v2950_v30 = vmax.f32 %v2751_v57, 0.0 }
 0x4b2   : > { %v3027_v59 = vpack.c.bf16 %v2949_v51, %v2943_v19  ;;  %v2682_v49 = vpop.f32.mrb[168].mxu0  ;;  %3073 = vmatprep.subr.bf16.mxu1 %v3050_v55 }
 0x4b3   : > { %v3028_v32 = vpack.c.bf16 %v2950_v30, %v2944_v44  ;;  %v2684_v6 = vpop.f32.mrb[169].mxu0  ;;  %3074 = vmatpush1.bf16.msra.mxu1 %v3049_v47  ;;  %v3001_v26 = vmax.f32 %v2682_v49, 0.0 }
 0x4b4   : > { %v2686_v16 = vpop.f32.mrb[170].mxu0  ;;  %v3002_v37 = vmax.f32 %v2684_v6, 0.0 }
 0x4b5   : > { %v2755_v17 = vpop.f32.mrb[172].mxu1  ;;  %3106 = vmatprep.subr.bf16.mxu0 %v3028_v32  ;;  %v3007_v7 = vmax.f32 %v2686_v16, 0.0  ;;  %v2688_v10 = vpop.f32.mrb[171].mxu0 }
 0x4b6   : > { %v2955_v0 = vmax.f32 %v2755_v17, 0.0  ;;  %v2757_v29 = vpop.f32.mrb[173].mxu1  ;;  %3107 = vmatpush1.bf16.msra.mxu0 %v3027_v59  ;;  %v3008_v43 = vmax.f32 %v2688_v10, 0.0 }
 0x4b7   : > { %v2956_v46 = vmax.f32 %v2757_v29, 0.0  ;;  %v2759_v60 = vpop.f32.mrb[174].mxu1  ;;  %v3055_v21 = vpack.c.bf16 %v3007_v7, %v3001_v26 }
 0x4b8   : > { %v2961_v41 = vmax.f32 %v2759_v60, 0.0  ;;  %v2761_v31 = vpop.f32.mrb[175].mxu1  ;;  %v3056_v18 = vpack.c.bf16 %v3008_v43, %v3002_v37 }
 0x4b9   : > { %v2962_v48 = vmax.f32 %v2761_v31, 0.0 }
 0x4ba   : > { %v3033_v34 = vpack.c.bf16 %v2961_v41, %v2955_v0  ;;  %v2838_v4 = vpop.f32.mrb[172].mxu0  ;;  %3075 = vmatprep.subr.bf16.mxu1 %v3056_v18 }
 0x4bb   : > { %v3034_v54 = vpack.c.bf16 %v2962_v48, %v2956_v46  ;;  %v2840_v8 = vpop.f32.mrb[173].mxu0  ;;  %3076 = vmatpush1.bf16.msra.mxu1 %v3055_v21  ;;  %v2921_v53 = vmax.f32 %v2838_v4, 0.0 }
 0x4bc   : > { %v2842_v9 = vpop.f32.mrb[174].mxu0  ;;  %v2922_v35 = vmax.f32 %v2840_v8, 0.0 }
 0x4bd   : > { %v2765_v38 = vpop.f32.mrb[176].mxu1  ;;  %3108 = vmatprep.subr.bf16.mxu0 %v3034_v54  ;;  %v2927_v5 = vmax.f32 %v2842_v9, 0.0  ;;  %v2844_v23 = vpop.f32.mrb[175].mxu0 }
 0x4be   : > { %v2967_v24 = vmax.f32 %v2765_v38, 0.0  ;;  %v2767_v50 = vpop.f32.mrb[177].mxu1  ;;  %3109 = vmatpush1.bf16.msra.mxu0 %v3033_v34  ;;  %v2928_v42 = vmax.f32 %v2844_v23, 0.0  ;;  %3094 = vmatmul.mubr.bf16.vlgmr.msra.gmra.mrb[192].mxu1 %v8795_v61 }
 0x4bf   : > { %v2968_v52 = vmax.f32 %v2767_v50, 0.0  ;;  %v2769_v2 = vpop.f32.mrb[178].mxu1  ;;  %v3017_v13 = vpack.c.bf16 %v2927_v5, %v2921_v53  ;;  %3175 = vmatprep.mubr.bf16.mxu1 %v7861_v3 }
 0x4c0   : > { %v2973_v40 = vmax.f32 %v2769_v2, 0.0  ;;  %v2771_v25 = vpop.f32.mrb[179].mxu1  ;;  %v3018_v39 = vpack.c.bf16 %v2928_v42, %v2922_v35 }
 0x4c1   : > { %v2974_v62 = vmax.f32 %v2771_v25, 0.0 }
 0x4c2   : > { %v3039_v28 = vpack.c.bf16 %v2973_v40, %v2967_v24  ;;  %v2848_v19 = vpop.f32.mrb[176].mxu0  ;;  %3143 = vmatprep.subr.bf16.mxu1 %v3018_v39 }
 0x4c3   : > { %v3040_v56 = vpack.c.bf16 %v2974_v62, %v2968_v52  ;;  %v2850_v33 = vpop.f32.mrb[177].mxu0  ;;  %3144 = vmatpush1.bf16.msra.mxu1 %v3017_v13  ;;  %v2933_v58 = vmax.f32 %v2848_v19, 0.0 }
 0x4c4   : > { %v2852_v11 = vpop.f32.mrb[178].mxu0  ;;  %v2934_v30 = vmax.f32 %v2850_v33, 0.0 }
 0x4c5   : > { %v2775_v44 = vpop.f32.mrb[180].mxu1  ;;  %3110 = vmatprep.subr.bf16.mxu0 %v3040_v56  ;;  %v2939_v47 = vmax.f32 %v2852_v11, 0.0  ;;  %v2854_v51 = vpop.f32.mrb[179].mxu0 }
 0x4c6   : > { %v2979_v57 = vmax.f32 %v2775_v44, 0.0  ;;  %v2777_v55 = vpop.f32.mrb[181].mxu1  ;;  %3111 = vmatpush1.bf16.msra.mxu0 %v3039_v28  ;;  %v2940_v59 = vmax.f32 %v2854_v51, 0.0 }
 0x4c7   : > { %v2980_v49 = vmax.f32 %v2777_v55, 0.0  ;;  %v2779_v32 = vpop.f32.mrb[182].mxu1  ;;  %v3023_v6 = vpack.c.bf16 %v2939_v47, %v2933_v58 }
 0x4c8   : > { %v2985_v16 = vmax.f32 %v2779_v32, 0.0  ;;  %v2781_v17 = vpop.f32.mrb[183].mxu1  ;;  %v3024_v26 = vpack.c.bf16 %v2940_v59, %v2934_v30  ;;  %v606_v59 = vld [vmem:[%s10337_s9] sm:$0xf] }
 0x4c9   : > { %v2986_v7 = vmax.f32 %v2781_v17, 0.0 }
 0x4ca   : > { %v3045_v10 = vpack.c.bf16 %v2985_v16, %v2979_v57  ;;  %v2858_v0 = vpop.f32.mrb[180].mxu0  ;;  %3145 = vmatprep.subr.bf16.mxu1 %v3024_v26 }
 0x4cb   : > { %v3046_v29 = vpack.c.bf16 %v2986_v7, %v2980_v49  ;;  %v2860_v37 = vpop.f32.mrb[181].mxu0  ;;  %3146 = vmatpush1.bf16.msra.mxu1 %v3023_v6  ;;  %v2945_v60 = vmax.f32 %v2858_v0, 0.0  ;;  %v10302_v7 = vmov 0.0  }
 0x4cc   : > { %v2862_v43 = vpop.f32.mrb[182].mxu0  ;;  %v2946_v48 = vmax.f32 %v2860_v37, 0.0 }
 0x4cd   : > { %v2785_v46 = vpop.f32.mrb[184].mxu1  ;;  %3112 = vmatprep.subr.bf16.mxu0 %v3046_v29  ;;  %v2951_v21 = vmax.f32 %v2862_v43, 0.0  ;;  %v2864_v41 = vpop.f32.mrb[183].mxu0  ;;  %v8807_v29 = vld [vmem:[%s10338_s8 + $0xc0] sm:$0xff]  }
 0x4ce   : > { %v2991_v31 = vmax.f32 %v2785_v46, 0.0  ;;  %v2787_v18 = vpop.f32.mrb[185].mxu1  ;;  %3113 = vmatpush1.bf16.msra.mxu0 %v3045_v10  ;;  %v2952_v34 = vmax.f32 %v2864_v41, 0.0  ;;  %v3271_v10 = vsel %vm3269_vm5, %v606_v59, 0 }
 0x4cf   : > { %v2992_v4 = vmax.f32 %v2787_v18, 0.0  ;;  %v2789_v54 = vpop.f32.mrb[186].mxu1  ;;  %v3029_v8 = vpack.c.bf16 %v2951_v21, %v2945_v60  ;;  %v8816_v18 = vld [vmem:[%s10338_s8 + $0x80] sm:$0xff]  }
 0x4d0   : > { %v2997_v9 = vmax.f32 %v2789_v54, 0.0  ;;  %v2791_v38 = vpop.f32.mrb[187].mxu1  ;;  %v3030_v53 = vpack.c.bf16 %v2952_v34, %v2946_v48  ;;  %v8821_v54 = vld [vmem:[%s10338_s8 + $0xc8] sm:$0xff]  }
 0x4d1   : > { %v2998_v5 = vmax.f32 %v2791_v38, 0.0 }
 0x4d2   : > { %v3051_v23 = vpack.c.bf16 %v2997_v9, %v2991_v31  ;;  %v2868_v24 = vpop.f32.mrb[184].mxu0  ;;  %3147 = vmatprep.subr.bf16.mxu1 %v3030_v53  ;;  %v7791_v9 = vld [vmem:[%s8005_s25] sm:$0x1]  ;;  %v8829_v53 = vld [vmem:[%s10338_s8 + $0x88] sm:$0xff]  }
 0x4d3   : > { %v3052_v50 = vpack.c.bf16 %v2998_v5, %v2992_v4  ;;  %v2870_v35 = vpop.f32.mrb[185].mxu0  ;;  %3148 = vmatpush1.bf16.msra.mxu1 %v3029_v8  ;;  %v2957_v2 = vmax.f32 %v2868_v24, 0.0 }
 0x4d4   : > { %v2872_v42 = vpop.f32.mrb[186].mxu0  ;;  %v2958_v62 = vmax.f32 %v2870_v35, 0.0 }
 0x4d5   : > { %v2795_v52 = vpop.f32.mrb[188].mxu1  ;;  %3114 = vmatprep.subr.bf16.mxu0 %v3052_v50  ;;  %v2963_v13 = vmax.f32 %v2872_v42, 0.0  ;;  %v2874_v40 = vpop.f32.mrb[187].mxu0 }
 0x4d6   : > { %v3003_v25 = vmax.f32 %v2795_v52, 0.0  ;;  %v2797_v39 = vpop.f32.mrb[189].mxu1  ;;  %3115 = vmatpush1.bf16.msra.mxu0 %v3051_v23  ;;  %v2964_v28 = vmax.f32 %v2874_v40, 0.0  ;;  %v8835_v23 = vld [vmem:[%s10338_s8 + $0xd0] sm:$0xff]  }
 0x4d7   : > { %v3004_v19 = vmax.f32 %v2797_v39, 0.0  ;;  %v2799_v56 = vpop.f32.mrb[190].mxu1  ;;  %v3035_v33 = vpack.c.bf16 %v2963_v13, %v2957_v2  ;;  %v8842_v13 = vld [vmem:[%s10338_s8 + $0x90] sm:$0xff]  }
 0x4d8   : > { %v3009_v11 = vmax.f32 %v2799_v56, 0.0  ;;  %v2801_v44 = vpop.f32.mrb[191].mxu1  ;;  %v3036_v58 = vpack.c.bf16 %v2964_v28, %v2958_v62  ;;  %v8854_v28 = vld [vmem:[%s10338_s8 + $0x98] sm:$0xff]   ;;  %v8860_v56 = vld [vmem:[%s10338_s8 + $0xe0] sm:$0xff]  }
 0x4d9   : > { %v3010_v47 = vmax.f32 %v2801_v44, 0.0 }
 0x4da   : > { %v3057_v51 = vpack.c.bf16 %v3009_v11, %v3003_v25  ;;  %v2878_v57 = vpop.f32.mrb[188].mxu0  ;;  %3149 = vmatprep.subr.bf16.mxu1 %v3036_v58  ;;  %v8848_v25 = vld [vmem:[%s10338_s8 + $0xd8] sm:$0xff]  }
 0x4db   : > { %v3058_v55 = vpack.c.bf16 %v3010_v47, %v3004_v19  ;;  %v2880_v30 = vpop.f32.mrb[189].mxu0  ;;  %3150 = vmatpush1.bf16.msra.mxu1 %v3035_v33  ;;  %v2969_v32 = vmax.f32 %v2878_v57, 0.0  ;;  %v8866_v57 = vld [vmem:[%s10338_s8 + $0xa0] sm:$0xff]  }
 0x4dc   : > { %v2882_v49 = vpop.f32.mrb[190].mxu0  ;;  %v2970_v17 = vmax.f32 %v2880_v30, 0.0  ;;  %v8872_v30 = vld [vmem:[%s10338_s8 + $0xe8] sm:$0xff]  }
 0x4dd   : > { %3116 = vmatprep.subr.bf16.mxu0 %v3058_v55  ;;  %v2975_v6 = vmax.f32 %v2882_v49, 0.0  ;;  %v2884_v16 = vpop.f32.mrb[191].mxu0  ;;  %v7533_v49 = vld [vmem:[%s10338_s8 + $0x40] sm:$0xff]  }
 0x4de   : > { %3117 = vmatpush1.bf16.msra.mxu0 %v3057_v51  ;;  %v2976_v26 = vmax.f32 %v2884_v16, 0.0  ;;  %v8890_v16 = vld [vmem:[%s10338_s8 + $0xf0] sm:$0xff]  }
 0x4df   : > { %7297 = vmatprep.subr.bf16.mxu0 %v10302_v7  ;;  %v3041_v0 = vpack.c.bf16 %v2975_v6, %v2969_v32  ;;  %v8881_v32 = vld [vmem:[%s10338_s8 + $0xa8] sm:$0xff]   ;;  %v7535_v6 = vld [vmem:[%s10338_s8] sm:$0xff]  }
 0x4e0   : > { %v3042_v37 = vpack.c.bf16 %v2976_v26, %v2970_v17  ;;  %v7537_v17 = vld [vmem:[%s10338_s8 + $0x48] sm:$0xff]   ;;  %v8900_v26 = vld [vmem:[%s10338_s8 + $0xb0] sm:$0xff]  }
 0x4e1   : > { %3135 = vmatmul.mubr.bf16.vlgmr.msra.gmra.mrb[204].mxu0 %v8795_v61 }
 0x4e2   : > { %7298 = vmatpush3.bf16.msra.mxu0 %v3271_v10  ;;  %7299 = vmatprep.mubr.msk.bf16.mxu0 %vm7863_vm6, %v10302_v7  ;;  %v2888_v43 = vpop.f32.mrb[192].mxu0  ;;  %v7539_v10 = vld [vmem:[%s10338_s8 + $0x8] sm:$0xff]  }
 0x4e3   : > { %6927 = vmatprep.subr.bf16.mxu0 %v8807_v29  ;;  %v2890_v46 = vpop.f32.mrb[193].mxu0  ;;  %3151 = vmatprep.subr.bf16.mxu1 %v3042_v37  ;;  %v2981_v21 = vmax.f32 %v2888_v43, 0.0  ;;  %v8919_v37 = vld [vmem:[%s10338_s8 + $0xb8] sm:$0xff]   ;;  %v7543_v43 = vld [vmem:[%s10338_s8 + $0x10] sm:$0xff]  }
 0x4e4   : > { %v2892_v60 = vpop.f32.mrb[194].mxu0  ;;  %3152 = vmatpush1.bf16.msra.mxu1 %v3041_v0  ;;  %v2982_v48 = vmax.f32 %v2890_v46, 0.0  ;;  %v8909_v0 = vld [vmem:[%s10338_s8 + $0xf8] sm:$0xff]  }
 0x4e5   : > { %v2987_v41 = vmax.f32 %v2892_v60, 0.0  ;;  %v2894_v31 = vpop.f32.mrb[195].mxu0  ;;  %v7544_v46 = vld [vmem:[%s10338_s8 + $0x58] sm:$0xff]  }
 0x4e6   : > { %v2988_v34 = vmax.f32 %v2894_v31, 0.0  ;;  %v7545_v60 = vld [vmem:[%s10338_s8 + $0x18] sm:$0xff]   ;;  %v7548_v31 = vld [vmem:[%s10338_s8 + $0x68] sm:$0xff]  }
 0x4e7   : > { %v3047_v4 = vpack.c.bf16 %v2987_v41, %v2981_v21  ;;  %v7546_v21 = vld [vmem:[%s10338_s8 + $0x60] sm:$0xff]  }
 0x4e8   : > { %v3048_v8 = vpack.c.bf16 %v2988_v34, %v2982_v48  ;;  %v7547_v41 = vld [vmem:[%s10338_s8 + $0x20] sm:$0xff]   ;;  %v7549_v48 = vld [vmem:[%s10338_s8 + $0x28] sm:$0xff]   ;;  %v7550_v34 = vld [vmem:[%s10338_s8 + $0x70] sm:$0xff]  }
 0x4e9   : > { %7300 = vmatmul.mubr.msk.bf16.vlgmr.msra.gmra.mrb[208].mxu0 %vm671_vm2, %v7791_v9  ;;  %v7553_v9 = vld [vmem:[%s10338_s8 + $0x38] sm:$0xff]  }
 0x4ea   : > { %6928 = vmatpush3.bf16.msra.mxu0 %v8816_v18  ;;  %v2898_v38 = vpop.f32.mrb[196].mxu0  ;;  %3153 = vmatprep.subr.bf16.mxu1 %v3048_v8  ;;  %v7552_v8 = vld [vmem:[%s10338_s8 + $0x78] sm:$0xff]  }
 0x4eb   : > { %6929 = vmatprep.subr.bf16.mxu0 %v8821_v54  ;;  %v2900_v5 = vpop.f32.mrb[197].mxu0  ;;  %3154 = vmatpush1.bf16.msra.mxu1 %v3047_v4  ;;  %v2993_v50 = vmax.f32 %v2898_v38, 0.0  ;;  %v7551_v4 = vld [vmem:[%s10338_s8 + $0x30] sm:$0xff]   ;;  %v8961_v38 = vld [vmem:[%s10338_s8 + $0x100] sm:$0xff]  }
 0x4ec   : > { %v2902_v24 = vpop.f32.mrb[198].mxu0  ;;  %3736 = vmatprep.mubr.bf16.mxu0 %v8059_v27  ;;  %v2994_v52 = vmax.f32 %v2900_v5, 0.0  ;;  %v8969_v5 = vld [vmem:[%s10338_s8 + $0x108] sm:$0xff]  }
 0x4ed   : > { %v2999_v35 = vmax.f32 %v2902_v24, 0.0  ;;  %v2904_v42 = vpop.f32.mrb[199].mxu0  ;;  %v8978_v24 = vld [vmem:[%s10338_s8 + $0x110] sm:$0xff]  }
 0x4ee   : > { %6930 = vmatpush3.bf16.msra.mxu0 %v8829_v53  ;;  %v3000_v2 = vmax.f32 %v2904_v42, 0.0  ;;  %v7564_v42 = vld [vmem:[%s10338_s8 + $0x150] ss:$0 sps:$4 sm:$0x33]  }
 0x4ef   : > { %v3053_v40 = vpack.c.bf16 %v2999_v35, %v2993_v50  ;;  %6931 = vmatprep.subr.bf16.mxu0 %v8835_v23  ;;  %v8986_v50 = vld [vmem:[%s10338_s8 + $0x118] sm:$0xff]   ;;  %v9042_v35 = vld [vmem:[%s10338_s8 + $0x148] sm:$0xff]  }
 0x4f0   : > { %v3054_v39 = vpack.c.bf16 %v3000_v2, %v2994_v52  ;;  %v7565_v52 = vld [vmem:[%s10338_s8 + $0x194] sm:$0xff]   ;;  %v9056_v2 = vsel %vm812_vm0, %v7564_v42, 0 }
 0x4f2   : > { %v2908_v62 = vpop.f32.mrb[200].mxu0  ;;  %6932 = vmatpush3.bf16.msra.mxu0 %v8842_v13  ;;  %3155 = vmatprep.subr.bf16.mxu1 %v3054_v39  ;;  %v9070_v39 = vld.sshfl [vmem:[%s8015_s20 + $0x8] sm:$0x33 pattern:$0x76325410] }
 0x4f3   : > { %v2910_v19 = vpop.f32.mrb[201].mxu0  ;;  %6933 = vmatprep.subr.bf16.mxu0 %v8848_v25  ;;  %3156 = vmatpush1.bf16.msra.mxu1 %v3053_v40  ;;  %v3005_v11 = vmax.f32 %v2908_v62, 0.0  ;;  %v7567_v40 = vld [vmem:[%s10338_s8 + $0x19c] sm:$0xff]  }
 0x4f4   : > { %v2912_v33 = vpop.f32.mrb[202].mxu0  ;;  %v3006_v47 = vmax.f32 %v2910_v19, 0.0  ;;  %v7568_v62 = vld [vmem:[%s10338_s8 + $0x15c] sm:$0xff]   ;;  %v7570_v19 = vld [vmem:[%s10338_s8 + $0x164] sm:$0xff]  }
 0x4f5   : > { %v3011_v44 = vmax.f32 %v2912_v33, 0.0  ;;  %v2914_v58 = vpop.f32.mrb[203].mxu0  ;;  %v7572_v33 = vld [vmem:[%s10338_s8 + $0x16c] sm:$0xff]  }
 0x4f6   : > { %v3012_v51 = vmax.f32 %v2914_v58, 0.0  ;;  %6934 = vmatpush3.bf16.msra.mxu0 %v8854_v28  ;;  %v7575_v58 = vld [vmem:[%s10338_s8 + $0x1bc] sm:$0xff]  }
 0x4f7   : > { %v3059_v55 = vpack.c.bf16 %v3011_v44, %v3005_v11  ;;  %6935 = vmatprep.subr.bf16.mxu0 %v8860_v56  ;;  %v7573_v11 = vld [vmem:[%s10338_s8 + $0x1b4] sm:$0xff]  }
 0x4f8   : > { %v3060_v59 = vpack.c.bf16 %v3012_v51, %v3006_v47  ;;  %v7574_v44 = vld [vmem:[%s10338_s8 + $0x174] sm:$0xff]   ;;  %v7576_v47 = vld [vmem:[%s10338_s8 + $0x17c] sm:$0xff]   ;;  %v7577_v51 = vld [vmem:[%s10338_s8 + $0x1c4] sm:$0xff]  }
 0x4fa   : > { %3157 = vmatprep.subr.bf16.mxu1 %v3060_v59  ;;  %6936 = vmatpush3.bf16.msra.mxu0 %v8866_v57  ;;  %v10311_v59 = vshrl.u32 %v8019_v12, 16 }
 0x4fb   : > { %3158 = vmatpush1.bf16.msra.mxu1 %v3059_v55  ;;  %6937 = vmatprep.subr.bf16.mxu0 %v8872_v30  ;;  %v7579_v55 = vld [vmem:[%s10338_s8 + $0x1cc] sm:$0xff]  }
 0x4fc   : > { %6905 = vmatprep.subr.bf16.mxu1 %v7533_v49 }
 0x4fe   : > { %3176 = vmatmul.mubr.bf16.vlgmr.msra.gmra.mrb[196].mxu1 %v8795_v61  ;;  %6938 = vmatpush3.bf16.msra.mxu0 %v8881_v32  ;;  %v7541_v61 = vld [vmem:[%s10338_s8 + $0x50] sm:$0xff]  }
 0x4ff   : > { %6906 = vmatpush3.bf16.msra.mxu1 %v7535_v6  ;;  %6939 = vmatprep.subr.bf16.mxu0 %v8890_v16 }
 0x500   : > { %6907 = vmatprep.subr.bf16.mxu1 %v7537_v17  ;;  %3696 = vmatprep.mubr.bf16.mxu1 %v8028_v15 }
 0x502   : > { %6940 = vmatpush3.bf16.msra.mxu0 %v8900_v26 }
 0x503   : > { %6908 = vmatpush3.bf16.msra.mxu1 %v7539_v10  ;;  %6941 = vmatprep.subr.bf16.mxu0 %v8909_v0 }
 0x504   : > { %6909 = vmatprep.subr.bf16.mxu1 %v7541_v61 }
 0x506   : > { %6942 = vmatpush3.bf16.msra.mxu0 %v8919_v37 }
 0x507   : > { %6910 = vmatpush3.bf16.msra.mxu1 %v7543_v43  ;;  %6949 = vmatprep.subr.bf16.mxu0 %v7533_v49  ;;  %v10308_v49 = vshrl.u32 %v8467_v45, 16 }
 0x508   : > { %6911 = vmatprep.subr.bf16.mxu1 %v7544_v46 }
 0x509   : > { %3737 = vmatmul.mubr.bf16.vlgmr.msra.gmra.mrb[212].mxu0 %v8024_v14 }
 0x50a   : > { %6950 = vmatpush3.bf16.msra.mxu0 %v7535_v6  ;;  %3824 = vmatprep.mubr.bf16.mxu0 %v8467_v45  ;;  %v7582_v6 = vld [vmem:[%s10338_s8 + $0x1d4] sm:$0xff]  }
 0x50b   : > { %6912 = vmatpush3.bf16.msra.mxu1 %v7545_v60  ;;  %6951 = vmatprep.subr.bf16.mxu0 %v7537_v17  ;;  %v10310_v17 = vshrl.u32 %v8059_v27, 16 }
 0x50c   : > { %6913 = vmatprep.subr.bf16.mxu1 %v7546_v21 }
 0x50e   : > { %6952 = vmatpush3.bf16.msra.mxu0 %v7539_v10  ;;  %v7584_v10 = vld [vmem:[%s10338_s8 + $0x1dc] sm:$0xff]  }
 0x50f   : > { %6914 = vmatpush3.bf16.msra.mxu1 %v7547_v41  ;;  %6953 = vmatprep.subr.bf16.mxu0 %v7541_v61  ;;  %v7586_v61 = vld [vmem:[%s10338_s8 + $0x1e4] sm:$0xff]  }
 0x510   : > { %6915 = vmatprep.subr.bf16.mxu1 %v7548_v31 }
 0x512   : > { %6954 = vmatpush3.bf16.msra.mxu0 %v7543_v43  ;;  %v7588_v43 = vld [vmem:[%s10338_s8 + $0x1ec] sm:$0xff]  }
 0x513   : > { %6916 = vmatpush3.bf16.msra.mxu1 %v7549_v48  ;;  %6955 = vmatprep.subr.bf16.mxu0 %v7544_v46  ;;  %v7589_v46 = vld [vmem:[%s10338_s8 + $0x234] sm:$0xff]  }
 0x514   : > { %6917 = vmatprep.subr.bf16.mxu1 %v7550_v34 }
 0x516   : > { %6956 = vmatpush3.bf16.msra.mxu0 %v7545_v60  ;;  %v7590_v60 = vld [vmem:[%s10338_s8 + $0x1f4] sm:$0xff]  }
 0x517   : > { %6918 = vmatpush3.bf16.msra.mxu1 %v7551_v4  ;;  %6957 = vmatprep.subr.bf16.mxu0 %v7546_v21  ;;  %v7591_v21 = vld [vmem:[%s10338_s8 + $0x23c] sm:$0xff]  }
 0x518   : > { %6919 = vmatprep.subr.bf16.mxu1 %v7552_v8 }
 0x51a   : > { %6958 = vmatpush3.bf16.msra.mxu0 %v7547_v41  ;;  %v10306_v41 = vshrl.u32 %v8463_v22, 16 }
 0x51b   : > { %6920 = vmatpush3.bf16.msra.mxu1 %v7553_v9  ;;  %6959 = vmatprep.subr.bf16.mxu0 %v7548_v31  ;;  %v10305_v31 = vshrl.u32 %v8509_v63, 16 }
 0x51c   : > { %3744 = vmatprep.subr.bf16.mxu1 %v7861_v3 }
 0x51e   : > { %6960 = vmatpush3.bf16.msra.mxu0 %v7549_v48  ;;  %3697 = vmatmul.mubr.bf16.vlgmr.msra.gmra.mrb[200].mxu1 %v8019_v12  ;;  %v7592_v48 = vld [vmem:[%s10338_s8 + $0x1fc] sm:$0xff]  }
 0x51f   : > { %3745 = vmatpush1.bf16.msra.mxu1 %v8961_v38  ;;  %6961 = vmatprep.subr.bf16.mxu0 %v7550_v34  ;;  %v7593_v34 = vld [vmem:[%s10338_s8 + $0x244] sm:$0xff]  }
 0x520   : > { %3746 = vmatprep.subr.bf16.mxu1 %v7861_v3  ;;  %6451 = vmatprep.mubr.msk.bf16.mxu1 %vm3658_vm7, %v8036_v20 }
 0x522   : > { %6962 = vmatpush3.bf16.msra.mxu0 %v7551_v4  ;;  %v7594_v4 = vld [vmem:[%s10338_s8 + $0x204] sm:$0xff]  }
 0x523   : > { %3747 = vmatpush1.bf16.msra.mxu1 %v8969_v5  ;;  %6963 = vmatprep.subr.bf16.mxu0 %v7552_v8  ;;  %v7595_v8 = vld [vmem:[%s10338_s8 + $0x24c] sm:$0xff]  }
 0x524   : > { %3748 = vmatprep.subr.bf16.mxu1 %v7861_v3 }
 0x526   : > { %6964 = vmatpush3.bf16.msra.mxu0 %v7553_v9  ;;  %v7596_v9 = vld [vmem:[%s10338_s8 + $0x20c] sm:$0xff]  }
 0x527   : > { %3749 = vmatpush1.bf16.msra.mxu1 %v8978_v24  ;;  %6971 = vmatprep.subr.bf16.mxu0 %v8807_v29  ;;  %v8997_v29 = vld [vmem:[%s10338_s8 + $0x120] sm:$0xff]  }
 0x528   : > { %3750 = vmatprep.subr.bf16.mxu1 %v7861_v3 }
 0x529   : > { %3825 = vmatmul.mubr.bf16.vlgmr.msra.gmra.mrb[216].mxu0 %v8463_v22 }
 0x52a   : > { %6972 = vmatpush3.bf16.msra.mxu0 %v8816_v18  ;;  %3864 = vmatprep.mubr.bf16.mxu0 %v8509_v63  ;;  %v9006_v18 = vld [vmem:[%s10338_s8 + $0x128] sm:$0xff]  }
 0x52b   : > { %3751 = vmatpush1.bf16.msra.mxu1 %v8986_v50  ;;  %6973 = vmatprep.subr.bf16.mxu0 %v8821_v54  ;;  %v9015_v54 = vld [vmem:[%s10338_s8 + $0x130] sm:$0xff]  }
 0x52c   : > { %3752 = vmatprep.subr.bf16.mxu1 %v7861_v3 }
 0x52e   : > { %6974 = vmatpush3.bf16.msra.mxu0 %v8829_v53  ;;  %v9024_v53 = vld [vmem:[%s10338_s8 + $0x138] sm:$0xff]  }
 0x52f   : > { %3753 = vmatpush1.bf16.msra.mxu1 %v8997_v29  ;;  %6975 = vmatprep.subr.bf16.mxu0 %v8835_v23  ;;  %v9033_v23 = vld [vmem:[%s10338_s8 + $0x140] sm:$0xff]  }
 0x530   : > { %3754 = vmatprep.subr.bf16.mxu1 %v7861_v3 }
 0x532   : > { %6976 = vmatpush3.bf16.msra.mxu0 %v8842_v13  ;;  %v7566_v13 = vld [vmem:[%s10338_s8 + $0x154] sm:$0xff]  }
 0x533   : > { %3755 = vmatpush1.bf16.msra.mxu1 %v9006_v18  ;;  %6977 = vmatprep.subr.bf16.mxu0 %v8848_v25  ;;  %v10312_v25 = vshrl.u32 %v8028_v15, 16 }
 0x534   : > { %3756 = vmatprep.subr.bf16.mxu1 %v7861_v3 }
 0x536   : > { %6978 = vmatpush3.bf16.msra.mxu0 %v8854_v28  ;;  %v7569_v28 = vld [vmem:[%s10338_s8 + $0x1a4] sm:$0xff]  }
 0x537   : > { %3757 = vmatpush1.bf16.msra.mxu1 %v9015_v54  ;;  %6979 = vmatprep.subr.bf16.mxu0 %v8860_v56  ;;  %v7571_v56 = vld [vmem:[%s10338_s8 + $0x1ac] sm:$0xff]  }
 0x538   : > { %3758 = vmatprep.subr.bf16.mxu1 %v7861_v3 }
 0x53a   : > { %6980 = vmatpush3.bf16.msra.mxu0 %v8866_v57  ;;  %v7578_v57 = vld [vmem:[%s10338_s8 + $0x184] sm:$0xff]  }
 0x53b   : > { %3759 = vmatpush1.bf16.msra.mxu1 %v9024_v53  ;;  %6981 = vmatprep.subr.bf16.mxu0 %v8872_v30  ;;  %v7580_v30 = vld [vmem:[%s10338_s8 + $0x18c] sm:$0xff]  }
 0x53c   : > { %3760 = vmatprep.subr.bf16.mxu1 %v7861_v3 }
 0x53e   : > { %6982 = vmatpush3.bf16.msra.mxu0 %v8881_v32  ;;  %v7581_v32 = vld [vmem:[%s10338_s8 + $0x214] sm:$0xff]  }
 0x53f   : > { %3761 = vmatpush1.bf16.msra.mxu1 %v9033_v23  ;;  %6983 = vmatprep.subr.bf16.mxu0 %v8890_v16  ;;  %v7583_v16 = vld [vmem:[%s10338_s8 + $0x21c] sm:$0xff]  }
 0x540   : > { %3762 = vmatprep.subr.bf16.mxu1 %v7861_v3 }
 0x542   : > { %6984 = vmatpush3.bf16.msra.mxu0 %v8900_v26  ;;  %v9154_v26 = vld.sshfl [vmem:[%s8456_s16 + $0x8] sm:$0x33 pattern:$0x76325410] }
 0x543   : > { %3763 = vmatpush1.bf16.msra.mxu1 %v9042_v35  ;;  %6985 = vmatprep.subr.bf16.mxu0 %v8909_v0  ;;  %v7585_v0 = vld [vmem:[%s10338_s8 + $0x224] sm:$0xff]  }
 0x544   : > { %3764 = vmatprep.subr.bf16.mxu1 %v7861_v3 }
 0x546   : > { %6986 = vmatpush3.bf16.msra.mxu0 %v8919_v37  ;;  %v7587_v37 = vld [vmem:[%s10338_s8 + $0x22c] sm:$0xff]  }
 0x547   : > { %3765 = vmatpush1.bf16.msra.mxu1 %v9056_v2  ;;  %6993 = vmatprep.subr.bf16.mxu0 %v7565_v52 }
 0x548   : > { %3872 = vmatprep.subr.bf16.mxu1 %v7861_v3 }
 0x549   : > { %3865 = vmatmul.mubr.bf16.vlgmr.msra.gmra.mrb[220].mxu0 %v8505_v1 }
 0x54a   : > { %6994 = vmatpush3.bf16.msra.mxu0 %v7566_v13  ;;  %3777 = vmatmul.mubr.bf16.vlgmr.msra.gmra.mrb[204].mxu1 %v9070_v39 }
 0x54b   : > { %3873 = vmatpush1.bf16.msra.mxu1 %v8961_v38  ;;  %6995 = vmatprep.subr.bf16.mxu0 %v7567_v40 }
 0x54c   : > { %3874 = vmatprep.subr.bf16.mxu1 %v7861_v3  ;;  %4309 = vmatprep.mubr.bf16.mxu0 %v10312_v25 }
 0x54d   : > { %6452 = vmatprep.mubr.msk.bf16.mxu1 %vm3658_vm7, %v8474_v36 }
 0x54e   : > { %6996 = vmatpush3.bf16.msra.mxu0 %v7568_v62 }
 0x54f   : > { %3875 = vmatpush1.bf16.msra.mxu1 %v8969_v5  ;;  %6997 = vmatprep.subr.bf16.mxu0 %v7569_v28  ;;  %v10309_v5 = vshrl.u32 %v8024_v14, 16 }
 0x550   : > { %3876 = vmatprep.subr.bf16.mxu1 %v7861_v3 }
 0x552   : > { %6998 = vmatpush3.bf16.msra.mxu0 %v7570_v19 }
 0x553   : > { %3877 = vmatpush1.bf16.msra.mxu1 %v8978_v24  ;;  %6999 = vmatprep.subr.bf16.mxu0 %v7571_v56 }
 0x554   : > { %3878 = vmatprep.subr.bf16.mxu1 %v7861_v3 }
 0x556   : > { %7000 = vmatpush3.bf16.msra.mxu0 %v7572_v33 }
 0x557   : > { %3879 = vmatpush1.bf16.msra.mxu1 %v8986_v50  ;;  %7001 = vmatprep.subr.bf16.mxu0 %v7573_v11 }
 0x558   : > { %3880 = vmatprep.subr.bf16.mxu1 %v7861_v3 }
 0x55a   : > { %7002 = vmatpush3.bf16.msra.mxu0 %v7574_v44 }
 0x55b   : > { %3881 = vmatpush1.bf16.msra.mxu1 %v8997_v29  ;;  %7003 = vmatprep.subr.bf16.mxu0 %v7575_v58  ;;  %v9213_v29 = vld [vmem:[%s10338_s8 + $0x254] sm:$0xff]  }
 0x55c   : > { %3882 = vmatprep.subr.bf16.mxu1 %v7861_v3 }
 0x55e   : > { %7004 = vmatpush3.bf16.msra.mxu0 %v7576_v47 }
 0x55f   : > { %3883 = vmatpush1.bf16.msra.mxu1 %v9006_v18  ;;  %7005 = vmatprep.subr.bf16.mxu0 %v7577_v51 }
 0x560   : > { %3884 = vmatprep.subr.bf16.mxu1 %v7861_v3 }
 0x562   : > { %7006 = vmatpush3.bf16.msra.mxu0 %v7578_v57 }
 0x563   : > { %3885 = vmatpush1.bf16.msra.mxu1 %v9015_v54  ;;  %7007 = vmatprep.subr.bf16.mxu0 %v7579_v55 }
 0x564   : > { %3886 = vmatprep.subr.bf16.mxu1 %v7861_v3 }
 0x566   : > { %7008 = vmatpush3.bf16.msra.mxu0 %v7580_v30 }
 0x567   : > { %3887 = vmatpush1.bf16.msra.mxu1 %v9024_v53  ;;  %7037 = vmatprep.subr.bf16.mxu0 %v7565_v52 }
 0x568   : > { %3888 = vmatprep.subr.bf16.mxu1 %v7861_v3 }
 0x569   : > { %4310 = vmatmul.mubr.bf16.vlgmr.msra.gmra.mrb[224].mxu0 %v10311_v59 }
 0x56a   : > { %7038 = vmatpush3.bf16.msra.mxu0 %v7566_v13  ;;  %4450 = vmatprep.mubr.bf16.mxu0 %v10308_v49 }
 0x56b   : > { %3889 = vmatpush1.bf16.msra.mxu1 %v9033_v23  ;;  %7039 = vmatprep.subr.bf16.mxu0 %v7567_v40  ;;  %v10307_v23 = vshrl.u32 %v8036_v20, 16 }
 0x56c   : > { %3890 = vmatprep.subr.bf16.mxu1 %v7861_v3 }
 0x56e   : > { %7040 = vmatpush3.bf16.msra.mxu0 %v7568_v62 }
 0x56f   : > { %3891 = vmatpush1.bf16.msra.mxu1 %v9042_v35  ;;  %7041 = vmatprep.subr.bf16.mxu0 %v7569_v28  ;;  %v9238_v28 = vld [vmem:[%s10338_s8 + $0x264] sm:$0xff]  }
 0x570   : > { %3892 = vmatprep.subr.bf16.mxu1 %v7861_v3 }
 0x572   : > { %7042 = vmatpush3.bf16.msra.mxu0 %v7570_v19  ;;  %v9245_v19 = vld [vmem:[%s10338_s8 + $0x26c] sm:$0xff]  }
 0x573   : > { %3893 = vmatpush1.bf16.msra.mxu1 %v9056_v2  ;;  %7043 = vmatprep.subr.bf16.mxu0 %v7571_v56  ;;  %v9228_v2 = vld [vmem:[%s10338_s8 + $0x25c] sm:$0xff]   ;;  %v9252_v56 = vld [vmem:[%s10338_s8 + $0x274] sm:$0xff]  }
 0x574   : > { %7015 = vmatprep.subr.bf16.mxu1 %v7581_v32 }
 0x576   : > { %7044 = vmatpush3.bf16.msra.mxu0 %v7572_v33  ;;  %3905 = vmatmul.mubr.bf16.vlgmr.msra.gmra.mrb[208].mxu1 %v9154_v26  ;;  %v9257_v33 = vld [vmem:[%s10338_s8 + $0x2e8] sm:$0xff]  }
 0x577   : > { %7016 = vmatpush3.bf16.msra.mxu1 %v7582_v6  ;;  %7045 = vmatprep.subr.bf16.mxu0 %v7573_v11 }
 0x578   : > { %7017 = vmatprep.subr.bf16.mxu1 %v7583_v16  ;;  %4349 = vmatprep.mubr.bf16.mxu1 %v10310_v17 }
 0x57a   : > { %7046 = vmatpush3.bf16.msra.mxu0 %v7574_v44 }
 0x57b   : > { %7018 = vmatpush3.bf16.msra.mxu1 %v7584_v10  ;;  %7047 = vmatprep.subr.bf16.mxu0 %v7575_v58  ;;  %v10304_v58 = vshrl.u32 %v8505_v1, 16 }
 0x57c   : > { %7019 = vmatprep.subr.bf16.mxu1 %v7585_v0 }
 0x57e   : > { %7048 = vmatpush3.bf16.msra.mxu0 %v7576_v47 }
 0x57f   : > { %7020 = vmatpush3.bf16.msra.mxu1 %v7586_v61  ;;  %7049 = vmatprep.subr.bf16.mxu0 %v7577_v51  ;;  %v9264_v51 = vld [vmem:[%s10338_s8 + $0x2a8] sm:$0xff]  }
 0x580   : > { %7021 = vmatprep.subr.bf16.mxu1 %v7587_v37 }
 0x582   : > { %7050 = vmatpush3.bf16.msra.mxu0 %v7578_v57 }
 0x583   : > { %7022 = vmatpush3.bf16.msra.mxu1 %v7588_v43  ;;  %7051 = vmatprep.subr.bf16.mxu0 %v7579_v55  ;;  %v4626_v55 = vrot.slane %v8028_v15, 1 }
 0x584   : > { %7023 = vmatprep.subr.bf16.mxu1 %v7589_v46 }
 0x586   : > { %7052 = vmatpush3.bf16.msra.mxu0 %v7580_v30  ;;  %v9272_v30 = vld [vmem:[%s10338_s8 + $0x27c] sm:$0xff]  }
 0x587   : > { %7024 = vmatpush3.bf16.msra.mxu1 %v7590_v60  ;;  %7059 = vmatprep.subr.bf16.mxu0 %v7581_v32  ;;  %v9277_v32 = vld [vmem:[%s10338_s8 + $0x2f0] sm:$0xff]  }
 0x588   : > { %7025 = vmatprep.subr.bf16.mxu1 %v7591_v21 }
 0x589   : > { %4451 = vmatmul.mubr.bf16.vlgmr.msra.gmra.mrb[228].mxu0 %v10306_v41 }
 0x58a   : > { %7060 = vmatpush3.bf16.msra.mxu0 %v7582_v6  ;;  %4490 = vmatprep.mubr.bf16.mxu0 %v10305_v31  ;;  %v9286_v6 = vld [vmem:[%s10338_s8 + $0x2b0] sm:$0xff]  }
 0x58b   : > { %7026 = vmatpush3.bf16.msra.mxu1 %v7592_v48  ;;  %7061 = vmatprep.subr.bf16.mxu0 %v7583_v16  ;;  %v9293_v16 = vld [vmem:[%s10338_s8 + $0x284] sm:$0xff]  }
 0x58c   : > { %7027 = vmatprep.subr.bf16.mxu1 %v7593_v34 }
 0x58e   : > { %7062 = vmatpush3.bf16.msra.mxu0 %v7584_v10  ;;  %v9298_v10 = vld [vmem:[%s10338_s8 + $0x2f8] sm:$0xff]  }
 0x58f   : > { %7028 = vmatpush3.bf16.msra.mxu1 %v7594_v4  ;;  %7063 = vmatprep.subr.bf16.mxu0 %v7585_v0  ;;  %v9305_v0 = vld [vmem:[%s10338_s8 + $0x2b8] sm:$0xff]  }
 0x590   : > { %7029 = vmatprep.subr.bf16.mxu1 %v7595_v8 }
 0x591   : > { %v9204_v38 = vpop.f32.mrb[192].mxu1 }
 0x592   : > { %7064 = vmatpush3.bf16.msra.mxu0 %v7586_v61  ;;  %v3184_v24 = vsub.f32 0.0, %v9204_v38  ;;  %v9208_v50 = vpop.f32.mrb[193].mxu1  ;;  %v9312_v61 = vld [vmem:[%s10338_s8 + $0x28c] sm:$0xff]  }
 0x593   : > { %7030 = vmatpush3.bf16.msra.mxu1 %v7596_v9  ;;  %7065 = vmatprep.subr.bf16.mxu0 %v7587_v37  ;;  %v3185_v18 = vsub.f32 0.0, %v9208_v50  ;;  %v3099_v54 = vpop.f32.mrb[194].mxu1  ;;  %v9317_v37 = vld [vmem:[%s10338_s8 + $0x300] sm:$0xff]  }
 0x594   : > { %4357 = vmatprep.subr.bf16.mxu1 %v7861_v3  ;;  %v3196_v53 = vand.u32 2147483647, %v3184_v24  ;;  %v3100_v35 = vpop.f32.mrb[195].mxu1 }
 0x595   : > { %v3197_v42 = vand.u32 2147483647, %v3185_v18 }
 0x596   : > { %4350 = vmatmul.mubr.bf16.vlgmr.msra.gmra.mrb[212].mxu1 %v10309_v5  ;;  %7066 = vmatpush3.bf16.msra.mxu0 %v7588_v43  ;;  %v3202_v52 = vsub.f32 0.0, %v3196_v53  ;;  %v3190_v43 = vmax.f32 %v3184_v24, 0.0 }
 0x597   : > { %4358 = vmatpush1.bf16.msra.mxu1 %v9213_v29  ;;  %7067 = vmatprep.subr.bf16.mxu0 %v7589_v46  ;;  %v3203_v13 = vsub.f32 0.0, %v3197_v42  ;;  %v9354_v42 = vld [vmem:[%s10338_s8 + $0x2c8] sm:$0xff]  }
 0x598   : > { %4359 = vmatprep.subr.bf16.mxu1 %v7861_v3  ;;  %v3208_v40 = vmul.f32 1.442695, %v3202_v52  ;;  %6581 = vmatprep.mubr.msk.bf16.mxu1 %vm3658_vm7, %v10307_v23 }
 0x599   : > { %v3210_v62 = vmul.f32 1.442695, %v3203_v13 }
 0x59a   : > { %7068 = vmatpush3.bf16.msra.mxu0 %v7590_v60  ;;  %7734 = vpow2.f32 %v3208_v40  ;;  %v3191_v60 = vmax.f32 %v3185_v18, 0.0 }
 0x59b   : > { %4360 = vmatpush1.bf16.msra.mxu1 %v9228_v2  ;;  %7069 = vmatprep.subr.bf16.mxu0 %v7591_v21  ;;  %7736 = vpow2.f32 %v3210_v62  ;;  %v9364_v62 = vld [vmem:[%s10338_s8 + $0x29c] sm:$0xff]  }
 0x59c   : > { %4361 = vmatprep.subr.bf16.mxu1 %v7861_v3 }
 0x59e   : > { %7070 = vmatpush3.bf16.msra.mxu0 %v7592_v48 }
 0x59f   : > { %4362 = vmatpush1.bf16.msra.mxu1 %v9238_v28  ;;  %7071 = vmatprep.subr.bf16.mxu0 %v7593_v34  ;;  %v9328_v34 = vld [vmem:[%s10338_s8 + $0x2c0] sm:$0xff]  }
 0x5a0   : > { %4363 = vmatprep.subr.bf16.mxu1 %v7861_v3 }
 0x5a2   : > { %7072 = vmatpush3.bf16.msra.mxu0 %v7594_v4 }
 0x5a3   : > { %4364 = vmatpush1.bf16.msra.mxu1 %v9245_v19  ;;  %7073 = vmatprep.subr.bf16.mxu0 %v7595_v8  ;;  %v9335_v8 = vld [vmem:[%s10338_s8 + $0x294] sm:$0xff]  }
 0x5a4   : > { %v7735_v11 = vpop.eup %7734  ;;  %4365 = vmatprep.subr.bf16.mxu1 %v7861_v3 }
 0x5a5   : > { %v7737_v44 = vpop.eup %7736  ;;  %v3220_v47 = vadd.f32 1.0, %v7735_v11  ;;  %v9369_v11 = vld [vmem:[%s10338_s8 + $0x310] sm:$0xff]  }
 0x5a6   : > { %7074 = vmatpush3.bf16.msra.mxu0 %v7596_v9  ;;  %v3221_v57 = vadd.f32 1.0, %v7737_v44  ;;  %v9340_v9 = vld [vmem:[%s10338_s8 + $0x308] sm:$0xff]  }
 0x5a7   : > { %4366 = vmatpush1.bf16.msra.mxu1 %v9252_v56  ;;  %7081 = vmatprep.subr.bf16.mxu0 %v9257_v33  ;;  %7738 = vlog2.f32 %v3220_v47 }
 0x5a8   : > { %4367 = vmatprep.subr.bf16.mxu1 %v7861_v3  ;;  %7740 = vlog2.f32 %v3221_v57 }
 0x5a9   : > { %4491 = vmatmul.mubr.bf16.vlgmr.msra.gmra.mrb[232].mxu0 %v10304_v58  ;;  %v9496_v58 = vld [vmem:[%s10338_s8 + $0x388] sm:$0xff]  }
 0x5aa   : > { %7082 = vmatpush3.bf16.msra.mxu0 %v9264_v51  ;;  %4929 = vmatprep.mubr.bf16.mxu0 %v4626_v55  ;;  %v7619_v55 = vld [vmem:[%s10338_s8 + $0x2a4] ss:$0 sps:$4 sm:$0x33]  }
 0x5ab   : > { %4368 = vmatpush1.bf16.msra.mxu1 %v9272_v30  ;;  %7083 = vmatprep.subr.bf16.mxu0 %v9277_v32 }
 0x5ac   : > { %4369 = vmatprep.subr.bf16.mxu1 %v7861_v3 }
 0x5ae   : > { %7084 = vmatpush3.bf16.msra.mxu0 %v9286_v6 }
 0x5af   : > { %4370 = vmatpush1.bf16.msra.mxu1 %v9293_v16  ;;  %7085 = vmatprep.subr.bf16.mxu0 %v9298_v10 }
 0x5b0   : > { %4371 = vmatprep.subr.bf16.mxu1 %v7861_v3 }
 0x5b1   : > { %v7739_v46 = vpop.eup %7738 }
 0x5b2   : > { %v7741_v21 = vpop.eup %7740  ;;  %7086 = vmatpush3.bf16.msra.mxu0 %v9305_v0  ;;  %v3227_v48 = vmul.f32 0.6931472, %v7739_v46 }
 0x5b3   : > { %4372 = vmatpush1.bf16.msra.mxu1 %v9312_v61  ;;  %v3229_v4 = vmul.f32 0.6931472, %v7741_v21  ;;  %7087 = vmatprep.subr.bf16.mxu0 %v9317_v37 }
 0x5b4   : > { %v3238_v38 = vadd.f32 %v3227_v48, %v3190_v43  ;;  %4373 = vmatprep.subr.bf16.mxu1 %v7861_v3  ;;  %v9343_v24 = vpop.f32.mrb[204].mxu0  ;;  %v9390_v48 = vld [vmem:[%s10338_s8 + $0x318] sm:$0xff]  }
 0x5b5   : > { %v3239_v50 = vadd.f32 %v3229_v4, %v3191_v60  ;;  %v3186_v18 = vsub.f32 0.0, %v9343_v24  ;;  %v9346_v54 = vpop.f32.mrb[205].mxu0  ;;  %v9383_v60 = vld [vmem:[%s10338_s8 + $0x2d0] sm:$0xff]  }
 0x5b6   : > { %v3244_v53 = vsel %vm2028_vm3, %v3238_v38, 0.0  ;;  %7088 = vmatpush3.bf16.msra.mxu0 %v9328_v34  ;;  %v3187_v35 = vsub.f32 0.0, %v9346_v54  ;;  %v3140_v52 = vpop.f32.mrb[206].mxu0  ;;  %v9394_v38 = vsel %vm812_vm0, %v7619_v55, 0  ;;  %v10300_v55 = vshrl.u32 %v8474_v36, 16 }
 0x5b7   : > { %v3245_v13 = vsel %vm2028_vm3, %v3239_v50, 0.0  ;;  %v3198_v40 = vand.u32 2147483647, %v3186_v18  ;;  %4374 = vmatpush1.bf16.msra.mxu1 %v9335_v8  ;;  %7089 = vmatprep.subr.bf16.mxu0 %v9340_v9  ;;  %v3141_v44 = vpop.f32.mrb[207].mxu0  ;;  %v9402_v52 = vld [vmem:[%s10338_s8 + $0x2d8] sm:$0xff]  }
 0x5b8   : > { %v9371_v47 = vadd.f32 %v3245_v13, %v3244_v53  ;;  %v3199_v57 = vand.u32 2147483647, %v3187_v35  ;;  %4375 = vmatprep.subr.bf16.mxu1 %v7861_v3  ;;  %v10301_v13 = vshrl.u32 %v9070_v39, 16  ;;  %v9410_v44 = vld [vmem:[%s10338_s8 + $0x320] sm:$0xff]   ;;  %v3193_v23 = vmax.f32 %v3187_v35, 0.0 }
 0x5b9   : > { %v3204_v43 = vsub.f32 0.0, %v3198_v40 }
 0x5ba   : > { %v3205_v46 = vsub.f32 0.0, %v3199_v57  ;;  %7090 = vmatpush3.bf16.msra.mxu0 %v9354_v42 }
 0x5bb   : > { %v3212_v21 = vmul.f32 1.442695, %v3204_v43  ;;  %4376 = vmatpush1.bf16.msra.mxu1 %v9364_v62  ;;  %7091 = vmatprep.subr.bf16.mxu0 %v9369_v11  ;;  %v9420_v43 = vld [vmem:[%s10338_s8 + $0x2e0] sm:$0xff]  }
 0x5bc   : > { %v3214_v4 = vmul.f32 1.442695, %v3205_v46  ;;  %4377 = vmatprep.subr.bf16.mxu1 %v7861_v3  ;;  %v9396_v50 = vpop.f32.mrb[208].mxu0  ;;  %v9427_v46 = vld [vmem:[%s10338_s8 + $0x368] sm:$0xff]  }
 0x5bd   : > { %7742 = vpow2.f32 %v3212_v21  ;;  %v7301_v53 = vpop.f32.mrb[209].mxu0  ;;  %v4625_v21 = vrot.slane %v8019_v12, 1 }
 0x5be   : > { %7744 = vpow2.f32 %v3214_v4  ;;  %7092 = vmatpush3.bf16.msra.mxu0 %v9383_v60  ;;  %v3310_v40 = vpop.f32.mrb[210].mxu0  ;;  %v4628_v4 = vrot.slane %v8059_v27, 1 }
 0x5bf   : > { %4378 = vmatpush1.bf16.msra.mxu1 %v9394_v38  ;;  %7093 = vmatprep.subr.bf16.mxu0 %v9390_v48  ;;  %v7302_v57 = vpop.f32.mrb[211].mxu0  ;;  %v9446_v40 = vld [vmem:[%s10338_s8 + $0x370] sm:$0xff]  }
 0x5c0   : > { %4498 = vmatprep.subr.bf16.mxu1 %v7861_v3 }
 0x5c2   : > { %7094 = vmatpush3.bf16.msra.mxu0 %v9402_v52  ;;  %4390 = vmatmul.mubr.bf16.vlgmr.msra.gmra.mrb[204].mxu1 %v10301_v13 }
 0x5c3   : > { %4499 = vmatpush1.bf16.msra.mxu1 %v9213_v29  ;;  %7095 = vmatprep.subr.bf16.mxu0 %v9410_v44  ;;  %v9438_v29 = vld [vmem:[%s10338_s8 + $0x328] sm:$0xff]  }
 0x5c4   : > { %4500 = vmatprep.subr.bf16.mxu1 %v7861_v3  ;;  %6582 = vmatprep.mubr.msk.bf16.mxu1 %vm3658_vm7, %v10300_v55 }
 0x5c6   : > { %7096 = vmatpush3.bf16.msra.mxu0 %v9420_v43 }
 0x5c7   : > { %v7743_v53 = vpop.eup %7742  ;;  %4501 = vmatpush1.bf16.msra.mxu1 %v9228_v2  ;;  %7103 = vmatprep.subr.bf16.mxu0 %v9427_v46  ;;  %v9453_v2 = vld [vmem:[%s10338_s8 + $0x330] sm:$0xff]  }
 0x5c8   : > { %v7745_v57 = vpop.eup %7744  ;;  %v3222_v55 = vadd.f32 1.0, %v7743_v53  ;;  %4502 = vmatprep.subr.bf16.mxu1 %v7861_v3  ;;  %v9460_v53 = vld [vmem:[%s10338_s8 + $0x378] sm:$0xff]  }
 0x5c9   : > { %v3223_v13 = vadd.f32 1.0, %v7745_v57  ;;  %4930 = vmatmul.mubr.bf16.vlgmr.msra.gmra.mrb[236].mxu0 %v4625_v21  ;;  %v3192_v57 = vmax.f32 %v3186_v18, 0.0 }
 0x5ca   : > { %7746 = vlog2.f32 %v3222_v55  ;;  %7104 = vmatpush3.bf16.msra.mxu0 %v9438_v29  ;;  %4969 = vmatprep.mubr.bf16.mxu0 %v4628_v4  ;;  %v9467_v55 = vld [vmem:[%s10338_s8 + $0x338] sm:$0xff]  }
 0x5cb   : > { %7748 = vlog2.f32 %v3223_v13  ;;  %4503 = vmatpush1.bf16.msra.mxu1 %v9238_v28  ;;  %7105 = vmatprep.subr.bf16.mxu0 %v9446_v40  ;;  %v9474_v28 = vld [vmem:[%s10338_s8 + $0x380] sm:$0xff]  }
 0x5cc   : > { %4504 = vmatprep.subr.bf16.mxu1 %v7861_v3 }
 0x5ce   : > { %7106 = vmatpush3.bf16.msra.mxu0 %v9453_v2 }
 0x5cf   : > { %4505 = vmatpush1.bf16.msra.mxu1 %v9245_v19  ;;  %7107 = vmatprep.subr.bf16.mxu0 %v9460_v53  ;;  %v9486_v19 = vld [vmem:[%s10338_s8 + $0x340] sm:$0xff]  }
 0x5d0   : > { %4506 = vmatprep.subr.bf16.mxu1 %v7861_v3 }
 0x5d1   : > { %v9477_v13 = vpop.f32.mrb[196].mxu1 }
 0x5d2   : > { %v3188_v21 = vsub.f32 0.0, %v9477_v13  ;;  %7108 = vmatpush3.bf16.msra.mxu0 %v9467_v55  ;;  %v9481_v4 = vpop.f32.mrb[197].mxu1 }
 0x5d3   : > { %v3189_v7 = vsub.f32 0.0, %v9481_v4  ;;  %4507 = vmatpush1.bf16.msra.mxu1 %v9252_v56  ;;  %7109 = vmatprep.subr.bf16.mxu0 %v9474_v28  ;;  %v3181_v31 = vpop.f32.mrb[198].mxu1 }
 0x5d4   : > { %v7747_v41 = vpop.eup %7746  ;;  %v3200_v24 = vand.u32 2147483647, %v3188_v21  ;;  %4508 = vmatprep.subr.bf16.mxu1 %v7861_v3  ;;  %v3182_v18 = vpop.f32.mrb[199].mxu1  ;;  %v9509_v31 = vld [vmem:[%s10338_s8 + $0x348] sm:$0xff]  }
 0x5d5   : > { %v7749_v49 = vpop.eup %7748  ;;  %v3231_v56 = vmul.f32 0.6931472, %v7747_v41  ;;  %v3201_v5 = vand.u32 2147483647, %v3189_v7  ;;  %v9516_v41 = vld [vmem:[%s10338_s8 + $0x390] sm:$0xff]  }
 0x5d6   : > { %v3233_v17 = vmul.f32 0.6931472, %v7749_v49  ;;  %v3206_v59 = vsub.f32 0.0, %v3200_v24  ;;  %7110 = vmatpush3.bf16.msra.mxu0 %v9486_v19 }
 0x5d7   : > { %v3240_v54 = vadd.f32 %v3231_v56, %v3192_v57  ;;  %v3207_v35 = vsub.f32 0.0, %v3201_v5  ;;  %4509 = vmatpush1.bf16.msra.mxu1 %v9272_v30  ;;  %7111 = vmatprep.subr.bf16.mxu0 %v9496_v58  ;;  %v9524_v5 = vld [vmem:[%s10338_s8 + $0x350] sm:$0xff]  }
 0x5d8   : > { %v3241_v49 = vadd.f32 %v3233_v17, %v3193_v23  ;;  %v3216_v24 = vmul.f32 1.442695, %v3206_v59  ;;  %4510 = vmatprep.subr.bf16.mxu1 %v7861_v3  ;;  %v9533_v59 = vld [vmem:[%s10338_s8 + $0x398] sm:$0xff]  }
 0x5d9   : > { %v3247_v18 = vsel %vm2028_vm3, %v3240_v54, 0.0  ;;  %v3218_v25 = vmul.f32 1.442695, %v3207_v35  ;;  %v9549_v54 = vld [vmem:[%s10338_s8 + $0x3a0] sm:$0xff]  }
 0x5da   : > { %7750 = vpow2.f32 %v3216_v24  ;;  %7112 = vmatpush3.bf16.msra.mxu0 %v9509_v31  ;;  %v3248_v30 = vadd.f32 %v3247_v18, %v9371_v47  ;;  %v3249_v57 = vsel %vm2028_vm3, %v3241_v49, 0.0  ;;  %v9556_v49 = vld [vmem:[%s10338_s8 + $0x360] sm:$0xff]  }
 0x5db   : > { %7752 = vpow2.f32 %v3218_v25  ;;  %4511 = vmatpush1.bf16.msra.mxu1 %v9293_v16  ;;  %7113 = vmatprep.subr.bf16.mxu0 %v9516_v41  ;;  %v9542_v25 = vld [vmem:[%s10338_s8 + $0x358] sm:$0xff]  }
 0x5dc   : > { %4512 = vmatprep.subr.bf16.mxu1 %v7861_v3  ;;  %v9536_v17 = vadd.f32 %v3249_v57, %v3248_v30  ;;  %v6943_v23 = vpop.f32.mrb[212].mxu0  ;;  %v4627_v30 = vrot.slane %v8024_v14, 1 }
 0x5dd   : > { %v6944_v56 = vpop.f32.mrb[213].mxu0 }
 0x5de   : > { %7114 = vmatpush3.bf16.msra.mxu0 %v9524_v5  ;;  %v6945_v16 = vadd.f32 %v6944_v56, %v6943_v23  ;;  %v6946_v47 = vpop.f32.mrb[214].mxu0  ;;  %v5019_v23 = vrot.slane %v8467_v45, 1  ;;  %v9574_v56 = vld [vmem:[%s10338_s8 + $0x3a8] sm:$0xff]  }
 0x5df   : > { %4513 = vmatpush1.bf16.msra.mxu1 %v9312_v61  ;;  %7115 = vmatprep.subr.bf16.mxu0 %v9533_v59  ;;  %v6947_v35 = vpop.f32.mrb[215].mxu0 }
 0x5e0   : > { %4514 = vmatprep.subr.bf16.mxu1 %v7861_v3 }
 0x5e2   : > { %7116 = vmatpush3.bf16.msra.mxu0 %v9542_v25 }
 0x5e3   : > { %4515 = vmatpush1.bf16.msra.mxu1 %v9335_v8  ;;  %7117 = vmatprep.subr.bf16.mxu0 %v9549_v54  ;;  %v4406_v8 = vshrl.u32 %v9154_v26, 16 }
 0x5e4   : > { %v7751_v61 = vpop.eup %7750  ;;  %4516 = vmatprep.subr.bf16.mxu1 %v7861_v3 }
 0x5e5   : > { %v7753_v24 = vpop.eup %7752  ;;  %v3224_v18 = vadd.f32 1.0, %v7751_v61  ;;  %v9600_v61 = vld [vmem:[%s10338_s8 + $0x3b8] sm:$0xff]  }
 0x5e6   : > { %v3225_v57 = vadd.f32 1.0, %v7753_v24  ;;  %7118 = vmatpush3.bf16.msra.mxu0 %v9556_v49 }
 0x5e7   : > { %7754 = vlog2.f32 %v3224_v18  ;;  %4517 = vmatpush1.bf16.msra.mxu1 %v9364_v62  ;;  %7125 = vmatprep.subr.bf16.mxu0 %v9257_v33  ;;  %v4630_v33 = vrot.slane %v8036_v20, 1 }
 0x5e8   : > { %7756 = vlog2.f32 %v3225_v57  ;;  %4518 = vmatprep.subr.bf16.mxu1 %v7861_v3 }
 0x5e9   : > { %4970 = vmatmul.mubr.bf16.vlgmr.msra.gmra.mrb[240].mxu0 %v4627_v30 }
 0x5ea   : > { %7126 = vmatpush3.bf16.msra.mxu0 %v9264_v51  ;;  %5064 = vmatprep.mubr.bf16.mxu0 %v5019_v23  ;;  %v9586_v51 = vld [vmem:[%s10338_s8 + $0x3b0] sm:$0xff]  }
 0x5eb   : > { %4519 = vmatpush1.bf16.msra.mxu1 %v9394_v38  ;;  %7127 = vmatprep.subr.bf16.mxu0 %v9277_v32 }
 0x5ec   : > { %4977 = vmatprep.subr.bf16.mxu1 %v7861_v3 }
 0x5ee   : > { %7128 = vmatpush3.bf16.msra.mxu0 %v9286_v6  ;;  %4531 = vmatmul.mubr.bf16.vlgmr.msra.gmra.mrb[208].mxu1 %v4406_v8  ;;  %v3194_v6 = vmax.f32 %v3188_v21, 0.0 }
 0x5ef   : > { %4978 = vmatpush1.bf16.msra.mxu1 %v9574_v56  ;;  %7129 = vmatprep.subr.bf16.mxu0 %v9298_v10  ;;  %v3195_v10 = vmax.f32 %v3189_v7, 0.0 }
 0x5f0   : > { %4979 = vmatprep.subr.bf16.mxu1 %v7861_v3  ;;  %6711 = vmatprep.mubr.msk.bf16.mxu1 %vm3658_vm7, %v4630_v33 }
 0x5f1   : > { %v7755_v32 = vpop.eup %7754  ;;  %v6921_v62 = vpop.f32.mrb[200].mxu1 }
 0x5f2   : > { %v7757_v38 = vpop.eup %7756  ;;  %v3235_v47 = vmul.f32 0.6931472, %v7755_v32  ;;  %7130 = vmatpush3.bf16.msra.mxu0 %v9305_v0  ;;  %v6922_v35 = vpop.f32.mrb[201].mxu1 }
 0x5f3   : > { %4980 = vmatpush1.bf16.msra.mxu1 %v9586_v51  ;;  %7131 = vmatprep.subr.bf16.mxu0 %v9317_v37  ;;  %v3237_v24 = vmul.f32 0.6931472, %v7757_v38  ;;  %v6923_v18 = vadd.f32 %v6922_v35, %v6921_v62  ;;  %v6924_v13 = vpop.f32.mrb[202].mxu1  ;;  %v9610_v37 = vld [vmem:[%s10338_s8 + $0x3c0] sm:$0xff]   ;;  %v9685_v35 = vld [vmem:[%s10338_s8 + $0x3e8] sm:$0xff]  }
 0x5f4   : > { %v3242_v21 = vadd.f32 %v3235_v47, %v3194_v6  ;;  %4981 = vmatprep.subr.bf16.mxu1 %v7861_v3  ;;  %v6925_v0 = vpop.f32.mrb[203].mxu1  ;;  %v9666_v47 = vld [vmem:[%s10338_s8 + $0x3e0] sm:$0xff]   ;;  %v9709_v13 = vld [vmem:[%s10338_s8 + $0x454] sm:$0xff]  }
 0x5f5   : > { %v3243_v30 = vadd.f32 %v3237_v24, %v3195_v10  ;;  %v3739_v57 = vadd.f32 %v6945_v16, %v6923_v18  ;;  %v9690_v10 = vld [vmem:[%s10338_s8 + $0x44c] sm:$0xff]   ;;  %v9719_v0 = vld [vmem:[%s10338_s8 + $0x414] sm:$0xff]  }
 0x5f6   : > { %7132 = vmatpush3.bf16.msra.mxu0 %v9328_v34  ;;  %v3251_v7 = vsel %vm2028_vm3, %v3242_v21, 0.0  ;;  %v9697_v24 = vld [vmem:[%s10338_s8 + $0x40c] sm:$0xff]   ;;  %v7658_v21 = vld [vmem:[%s10338_s8 + $0x3f8] ss:$0 sps:$4 sm:$0x33]  }
 0x5f7   : > { %4982 = vmatpush1.bf16.msra.mxu1 %v9600_v61  ;;  %7133 = vmatprep.subr.bf16.mxu0 %v9340_v9  ;;  %v3252_v4 = vadd.f32 %v3251_v7, %v9536_v17  ;;  %v3253_v23 = vsel %vm2038_vm4, %v3243_v30, 0.0  ;;  %v9615_v33 = vadd.f32 %v3739_v57, %v9396_v50  ;;  %v9623_v9 = vld [vmem:[%s10338_s8 + $0x3c8] sm:$0xff]   ;;  %v9704_v18 = vld [vmem:[%s10338_s8 + $0x3f0] sm:$0xff]   ;;  %v9726_v30 = vld [vmem:[%s10338_s8 + $0x45c] sm:$0xff]   ;;  %v9730_v57 = vsel %vm812_vm0, %v7658_v21, 0 }
 0x5f8   : > { %4983 = vmatprep.subr.bf16.mxu1 %v7861_v3  ;;  %v9736_v7 = vld [vmem:[%s10338_s8 + $0x41c] sm:$0xff]  }
 0x5f9   : > { %v3254_v34 = vadd.f32 %v3253_v23, %v3252_v4  ;;  %v4629_v4 = vrot.slane %v9070_v39, 1  ;;  %v9744_v23 = vld [vmem:[%s10338_s8 + $0x464] sm:$0xff]  }
 0x5fa   : > { %7134 = vmatpush3.bf16.msra.mxu0 %v9354_v42  ;;  %v9635_v42 = vld [vmem:[%s10338_s8 + $0x3d0] sm:$0xff]  }
 0x5fb   : > { %4984 = vmatpush1.bf16.msra.mxu1 %v9610_v37  ;;  %3255 = vadd.xlane.f32.xlu1 %v3254_v34  ;;  %v5021_v34 = vrot.slane %v8509_v63, 1 }
 0x5fc   : > { %7135 = vmatprep.subr.bf16.mxu0 %v9369_v11  ;;  %4985 = vmatprep.subr.bf16.mxu1 %v7861_v3  ;;  %v6965_v17 = vpop.f32.mrb[216].mxu0  ;;  %v9644_v11 = vld [vmem:[%s10338_s8 + $0x3d8] sm:$0xff]  }
 0x5fd   : > { %v6966_v16 = vpop.f32.mrb[217].mxu0 }
 0x5fe   : > { %7136 = vmatpush3.bf16.msra.mxu0 %v9383_v60  ;;  %v9628_v32 = vadd.f32 %v6966_v16, %v6965_v17  ;;  %v6968_v62 = vpop.f32.mrb[218].mxu0  ;;  %v9649_v60 = vld [vmem:[%s10338_s8 + $0x43c] sm:$0xff]   ;;  %v9752_v17 = vld [vmem:[%s10338_s8 + $0x424] sm:$0xff]   ;;  %v9759_v16 = vld [vmem:[%s10338_s8 + $0x46c] sm:$0xff]  }
 0x5ff   : > { %4986 = vmatpush1.bf16.msra.mxu1 %v9623_v9  ;;  %7137 = vmatprep.subr.bf16.mxu0 %v9390_v48  ;;  %v6969_v38 = vpop.f32.mrb[219].mxu0  ;;  %v5018_v48 = vrot.slane %v8463_v22, 1 }
 0x600   : > { %4987 = vmatprep.subr.bf16.mxu1 %v7861_v3 }
 0x602   : > { %7138 = vmatpush3.bf16.msra.mxu0 %v9402_v52  ;;  %v9657_v52 = vld [vmem:[%s10338_s8 + $0x3fc] sm:$0xff]  }
 0x603   : > { %4988 = vmatpush1.bf16.msra.mxu1 %v9635_v42  ;;  %7139 = vmatprep.subr.bf16.mxu0 %v9410_v44  ;;  %v10339_v44 = vshrl.u32 %v8028_v15, 16  ;;  %v9678_v15 = vld [vmem:[%s10338_s8 + $0x404] sm:$0xff]  }
 0x604   : > { %4989 = vmatprep.subr.bf16.mxu1 %v7861_v3 }
 0x605   : > { %v5240_v6 = vrot.slane %v10339_v44, 1  ;;  %v9773_v44 = vld [vmem:[%s10338_s8 + $0x474] sm:$0xff]  }
 0x606   : > { %7140 = vmatpush3.bf16.msra.mxu0 %v9420_v43  ;;  %v9671_v43 = vld [vmem:[%s10338_s8 + $0x444] sm:$0xff]  }
 0x607   : > { %4990 = vmatpush1.bf16.msra.mxu1 %v9644_v11  ;;  %7169 = vmatprep.subr.bf16.mxu0 %v9649_v60 }
 0x608   : > { %4991 = vmatprep.subr.bf16.mxu1 %v7861_v3 }
 0x609   : > { %5065 = vmatmul.mubr.bf16.vlgmr.msra.gmra.mrb[244].mxu0 %v5018_v48  ;;  %v9766_v48 = vld [vmem:[%s10338_s8 + $0x42c] sm:$0xff]  }
 0x60a   : > { %7170 = vmatpush3.bf16.msra.mxu0 %v9657_v52  ;;  %5543 = vmatprep.mubr.bf16.mxu0 %v5240_v6 }
 0x60b   : > { %4992 = vmatpush1.bf16.msra.mxu1 %v9666_v47  ;;  %7171 = vmatprep.subr.bf16.mxu0 %v9671_v43 }
 0x60c   : > { %4993 = vmatprep.subr.bf16.mxu1 %v7861_v3 }
 0x60e   : > { %7172 = vmatpush3.bf16.msra.mxu0 %v9678_v15 }
 0x60f   : > { %4994 = vmatpush1.bf16.msra.mxu1 %v9685_v35  ;;  %7173 = vmatprep.subr.bf16.mxu0 %v9690_v10 }
 0x610   : > { %4995 = vmatprep.subr.bf16.mxu1 %v7861_v3 }
 0x612   : > { %7174 = vmatpush3.bf16.msra.mxu0 %v9697_v24 }
 0x613   : > { %4996 = vmatpush1.bf16.msra.mxu1 %v9704_v18  ;;  %7175 = vmatprep.subr.bf16.mxu0 %v9709_v13 }
 0x614   : > { %4997 = vmatprep.subr.bf16.mxu1 %v7861_v3 }
 0x616   : > { %7176 = vmatpush3.bf16.msra.mxu0 %v9719_v0 }
 0x617   : > { %4998 = vmatpush1.bf16.msra.mxu1 %v9730_v57  ;;  %7177 = vmatprep.subr.bf16.mxu0 %v9726_v30 }
 0x618   : > { %7147 = vmatprep.subr.bf16.mxu1 %v9427_v46 }
 0x61a   : > { %7178 = vmatpush3.bf16.msra.mxu0 %v9736_v7  ;;  %5010 = vmatmul.mubr.bf16.vlgmr.msra.gmra.mrb[204].mxu1 %v4629_v4  ;;  %v9800_v4 = vld [vmem:[%s10338_s8 + $0x47c] sm:$0xff]  }
 0x61b   : > { %7148 = vmatpush3.bf16.msra.mxu1 %v9438_v29  ;;  %7179 = vmatprep.subr.bf16.mxu0 %v9744_v23 }
 0x61c   : > { %v6987_v46 = vpop.f32.mrb[220].mxu0  ;;  %7149 = vmatprep.subr.bf16.mxu1 %v9446_v40  ;;  %5104 = vmatprep.mubr.bf16.mxu1 %v5021_v34 }
 0x61d   : > { %v6988_v62 = vpop.f32.mrb[221].mxu0 }
 0x61e   : > { %v6989_v38 = vadd.f32 %v6988_v62, %v6987_v46  ;;  %7180 = vmatpush3.bf16.msra.mxu0 %v9752_v17  ;;  %v6990_v29 = vpop.f32.mrb[222].mxu0  ;;  %v9874_v46 = vld [vmem:[%s10338_s8 + $0x4a4] sm:$0xff]  }
 0x61f   : > { %7150 = vmatpush3.bf16.msra.mxu1 %v9453_v2  ;;  %7181 = vmatprep.subr.bf16.mxu0 %v9759_v16  ;;  %v6991_v40 = vpop.f32.mrb[223].mxu0  ;;  %v9784_v2 = vld [vmem:[%s10338_s8 + $0x434] sm:$0xff]   ;;  %v9889_v29 = vld [vmem:[%s10338_s8 + $0x4ac] sm:$0xff]  }
 0x620   : > { %v3867_v6 = vadd.f32 %v6989_v38, %v9628_v32  ;;  %7151 = vmatprep.subr.bf16.mxu1 %v9460_v53  ;;  %v9791_v32 = vld [vmem:[%s10338_s8 + $0x4bc] sm:$0xff]  }
 0x622   : > { %v9778_v21 = vadd.f32 %v3867_v6, %v9396_v50  ;;  %7182 = vmatpush3.bf16.msra.mxu0 %v9766_v48  ;;  %v10340_v50 = vshrl.u32 %v8019_v12, 16  ;;  %v9816_v12 = vld [vmem:[%s10338_s8 + $0x484] sm:$0xff]   ;;  %v9898_v6 = vld [vmem:[%s10338_s8 + $0x4f4] sm:$0xff]  }
 0x623   : > { %7152 = vmatpush3.bf16.msra.mxu1 %v9467_v55  ;;  %7183 = vmatprep.subr.bf16.mxu0 %v9773_v44  ;;  %v10341_v55 = vshrl.u32 %v8059_v27, 16  ;;  %v9823_v27 = vld [vmem:[%s10338_s8 + $0x4cc] sm:$0xff]  }
 0x624   : > { %7153 = vmatprep.subr.bf16.mxu1 %v9474_v28  ;;  %v5239_v53 = vrot.slane %v10340_v50, 1  ;;  %v9809_v28 = vld [vmem:[%s10338_s8 + $0x4c4] sm:$0xff]  }
 0x625   : > { %v5242_v34 = vrot.slane %v10341_v55, 1 }
 0x626   : > { %7184 = vmatpush3.bf16.msra.mxu0 %v9784_v2 }
 0x627   : > { %7154 = vmatpush3.bf16.msra.mxu1 %v9486_v19  ;;  %7191 = vmatprep.subr.bf16.mxu0 %v9791_v32  ;;  %v9837_v19 = vld [vmem:[%s10338_s8 + $0x4d4] sm:$0xff]  }
 0x628   : > { %7155 = vmatprep.subr.bf16.mxu1 %v9496_v58  ;;  %v9830_v58 = vld [vmem:[%s10338_s8 + $0x48c] sm:$0xff]  }
 0x629   : > { %5544 = vmatmul.mubr.bf16.vlgmr.msra.gmra.mrb[248].mxu0 %v5239_v53  ;;  %v9905_v53 = vld [vmem:[%s10338_s8 + $0x4b4] sm:$0xff]  }
 0x62a   : > { %7192 = vmatpush3.bf16.msra.mxu0 %v9800_v4  ;;  %5583 = vmatprep.mubr.bf16.mxu0 %v5242_v34  ;;  %v10343_v34 = vshrl.u32 %v8467_v45, 16 }
 0x62b   : > { %7156 = vmatpush3.bf16.msra.mxu1 %v9509_v31  ;;  %7193 = vmatprep.subr.bf16.mxu0 %v9809_v28  ;;  %v9844_v31 = vld [vmem:[%s10338_s8 + $0x494] sm:$0xff]  }
 0x62c   : > { %7157 = vmatprep.subr.bf16.mxu1 %v9516_v41  ;;  %v9851_v41 = vld [vmem:[%s10338_s8 + $0x4dc] sm:$0xff]  }
 0x62e   : > { %7194 = vmatpush3.bf16.msra.mxu0 %v9816_v12 }
 0x62f   : > { %7158 = vmatpush3.bf16.msra.mxu1 %v9524_v5  ;;  %7195 = vmatprep.subr.bf16.mxu0 %v9823_v27  ;;  %v5020_v5 = vrot.slane %v8505_v1, 1 }
 0x630   : > { %7159 = vmatprep.subr.bf16.mxu1 %v9533_v59  ;;  %v9859_v59 = vld [vmem:[%s10338_s8 + $0x49c] sm:$0xff]  }
 0x632   : > { %7196 = vmatpush3.bf16.msra.mxu0 %v9830_v58 }
 0x633   : > { %7160 = vmatpush3.bf16.msra.mxu1 %v9542_v25  ;;  %7197 = vmatprep.subr.bf16.mxu0 %v9837_v19  ;;  %v9866_v25 = vld [vmem:[%s10338_s8 + $0x4e4] sm:$0xff]  }
 0x634   : > { %7161 = vmatprep.subr.bf16.mxu1 %v9549_v54  ;;  %v5023_v54 = vrot.slane %v8474_v36, 1 }
 0x636   : > { %7198 = vmatpush3.bf16.msra.mxu0 %v9844_v31 }
 0x637   : > { %7162 = vmatpush3.bf16.msra.mxu1 %v9556_v49  ;;  %7199 = vmatprep.subr.bf16.mxu0 %v9851_v41  ;;  %v9881_v49 = vld [vmem:[%s10338_s8 + $0x4ec] sm:$0xff]  }
 0x638   : > { %5112 = vmatprep.subr.bf16.mxu1 %v7861_v3 }
 0x63a   : > { %5105 = vmatmul.mubr.bf16.vlgmr.msra.gmra.mrb[216].mxu1 %v5020_v5  ;;  %7200 = vmatpush3.bf16.msra.mxu0 %v9859_v59  ;;  %v5633_v5 = vrot.slane %v10343_v34, 1  ;;  %v7695_v34 = vld [vmem:[%s10351_s10 + $0x8] sm:$0xff]  }
 0x63b   : > { %5113 = vmatpush1.bf16.msra.mxu1 %v9574_v56  ;;  %7201 = vmatprep.subr.bf16.mxu0 %v9866_v25 }
 0x63c   : > { %5114 = vmatprep.subr.bf16.mxu1 %v7861_v3  ;;  %6712 = vmatprep.mubr.msk.bf16.mxu1 %vm3658_vm7, %v5023_v54  ;;  %v7009_v62 = vpop.f32.mrb[224].mxu0 }
 0x63d   : > { %v7010_v38 = vpop.f32.mrb[225].mxu0 }
 0x63e   : > { %7202 = vmatpush3.bf16.msra.mxu0 %v9874_v46  ;;  %v9891_v56 = vadd.f32 %v7010_v38, %v7009_v62  ;;  %v7012_v40 = vpop.f32.mrb[226].mxu0 }
 0x63f   : > { %5115 = vmatpush1.bf16.msra.mxu1 %v9586_v51  ;;  %7203 = vmatprep.subr.bf16.mxu0 %v9881_v49  ;;  %v7013_v50 = vpop.f32.mrb[227].mxu0  ;;  %v10342_v51 = vshrl.u32 %v8024_v14, 16 }
 0x640   : > { %5116 = vmatprep.subr.bf16.mxu1 %v7861_v3 }
 0x641   : > { %v5241_v55 = vrot.slane %v10342_v51, 1 }
 0x642   : > { %7204 = vmatpush3.bf16.msra.mxu0 %v9889_v29 }
 0x643   : > { %5117 = vmatpush1.bf16.msra.mxu1 %v9600_v61  ;;  %7205 = vmatprep.subr.bf16.mxu0 %v9898_v6 }
 0x644   : > { %5118 = vmatprep.subr.bf16.mxu1 %v7861_v3 }
 0x646   : > { %7206 = vmatpush3.bf16.msra.mxu0 %v9905_v53 }
 0x647   : > { %5119 = vmatpush1.bf16.msra.mxu1 %v9610_v37  ;;  %7213 = vmatprep.subr.bf16.mxu0 %v9649_v60  ;;  %v9951_v60 = vld [vmem:[%s10338_s8 + $0x4fc] sm:$0xff]  }
 0x648   : > { %5120 = vmatprep.subr.bf16.mxu1 %v7861_v3 }
 0x649   : > { %5584 = vmatmul.mubr.bf16.vlgmr.msra.gmra.mrb[252].mxu0 %v5241_v55  ;;  %v7694_v55 = vld [vmem:[%s10351_s10] sm:$0xff]  }
 0x64a   : > { %7214 = vmatpush3.bf16.msra.mxu0 %v9657_v52  ;;  %5678 = vmatprep.mubr.bf16.mxu0 %v5633_v5  ;;  %v10344_v52 = vshrl.u32 %v8036_v20, 16  ;;  %v7696_v5 = vld [vmem:[%s10351_s10 + $0x10] sm:$0xff]  }
 0x64b   : > { %5121 = vmatpush1.bf16.msra.mxu1 %v9623_v9  ;;  %7215 = vmatprep.subr.bf16.mxu0 %v9671_v43  ;;  %v10345_v43 = vshrl.u32 %v8463_v22, 16 }
 0x64c   : > { %5122 = vmatprep.subr.bf16.mxu1 %v7861_v3 }
 0x64e   : > { %7216 = vmatpush3.bf16.msra.mxu0 %v9678_v15  ;;  %v5632_v15 = vrot.slane %v10345_v43, 1 }
 0x64f   : > { %5123 = vmatpush1.bf16.msra.mxu1 %v9635_v42  ;;  %7217 = vmatprep.subr.bf16.mxu0 %v9690_v10  ;;  %v7794_v42 = vld.sshfl [vmem:[%s8456_s16 + $0x8] sm:$0x33 pattern:$0x76325410]  ;;  %s539_s16 = scalar_lea.vmem %s10352_s3, %s7998_s30 }
 0x650   : > { %5124 = vmatprep.subr.bf16.mxu1 %v7861_v3 }
 0x652   : > { %7218 = vmatpush3.bf16.msra.mxu0 %v9697_v24  ;;  %v9966_v24 = vld [vmem:[%s10338_s8 + $0x504] sm:$0xff]  }
 0x653   : > { %5125 = vmatpush1.bf16.msra.mxu1 %v9644_v11  ;;  %7219 = vmatprep.subr.bf16.mxu0 %v9709_v13  ;;  %v5022_v11 = vrot.slane %v7794_v42, 1  ;;  %v7697_v42 = vld [vmem:[%s10351_s10 + $0x18] sm:$0xff]  }
 0x654   : > { %5126 = vmatprep.subr.bf16.mxu1 %v7861_v3 }
 0x656   : > { %7220 = vmatpush3.bf16.msra.mxu0 %v9719_v0 }
 0x657   : > { %5127 = vmatpush1.bf16.msra.mxu1 %v9666_v47  ;;  %7221 = vmatprep.subr.bf16.mxu0 %v9726_v30  ;;  %v5244_v47 = vrot.slane %v10344_v52, 1 }
 0x658   : > { %5128 = vmatprep.subr.bf16.mxu1 %v7861_v3 }
 0x65a   : > { %7222 = vmatpush3.bf16.msra.mxu0 %v9736_v7  ;;  %v9989_v7 = vld [vmem:[%s10338_s8 + $0x514] sm:$0xff]  }
 0x65b   : > { %5129 = vmatpush1.bf16.msra.mxu1 %v9685_v35  ;;  %7223 = vmatprep.subr.bf16.mxu0 %v9744_v23  ;;  %v10346_v35 = vshrl.u32 %v8509_v63, 16  ;;  %v10007_v23 = vld [vmem:[%s10338_s8 + $0x524] sm:$0xff]  }
 0x65c   : > { %5130 = vmatprep.subr.bf16.mxu1 %v7861_v3  ;;  %v7053_v14 = vpop.f32.mrb[228].mxu0 }
 0x65d   : > { %v7054_v45 = vpop.f32.mrb[229].mxu0  ;;  %v5635_v10 = vrot.slane %v10346_v35, 1  ;;  %v7699_v35 = vld [vmem:[%s10351_s10 + $0x28] sm:$0xff]  }
 0x65e   : > { %7224 = vmatpush3.bf16.msra.mxu0 %v9752_v17  ;;  %v9939_v61 = vadd.f32 %v7054_v45, %v7053_v14  ;;  %v7056_v37 = vpop.f32.mrb[230].mxu0  ;;  %v10016_v17 = vld [vmem:[%s10338_s8 + $0x52c] sm:$0xff]   ;;  %v5636_v14 = vrot.slane %v4406_v8, 1 }
 0x65f   : > { %5131 = vmatpush1.bf16.msra.mxu1 %v9704_v18  ;;  %7225 = vmatprep.subr.bf16.mxu0 %v9759_v16  ;;  %v7057_v9 = vpop.f32.mrb[231].mxu0  ;;  %v9976_v18 = vld [vmem:[%s10338_s8 + $0x50c] sm:$0xff]  }
 0x660   : > { %5132 = vmatprep.subr.bf16.mxu1 %v7861_v3 }
 0x662   : > { %7226 = vmatpush3.bf16.msra.mxu0 %v9766_v48 }
 0x663   : > { %5133 = vmatpush1.bf16.msra.mxu1 %v9730_v57  ;;  %7227 = vmatprep.subr.bf16.mxu0 %v9773_v44 }
 0x664   : > { %5591 = vmatprep.subr.bf16.mxu1 %v7861_v3 }
 0x666   : > { %7228 = vmatpush3.bf16.msra.mxu0 %v9784_v2  ;;  %5145 = vmatmul.mubr.bf16.vlgmr.msra.gmra.mrb[208].mxu1 %v5022_v11 }
 0x667   : > { %5592 = vmatpush1.bf16.msra.mxu1 %v9951_v60  ;;  %7235 = vmatprep.subr.bf16.mxu0 %v9791_v32  ;;  %v10025_v32 = vld [vmem:[%s10338_s8 + $0x534] sm:$0xff]  }
 0x668   : > { %5593 = vmatprep.subr.bf16.mxu1 %v7861_v3  ;;  %6841 = vmatprep.mubr.msk.bf16.mxu1 %vm3658_vm7, %v5244_v47 }
 0x669   : > { %v7031_v20 = vpop.f32.mrb[212].mxu1  ;;  %5679 = vmatmul.mubr.bf16.vlgmr.msra.gmra.mrb[0].mxu0 %v5632_v15 }
 0x66a   : > { %v7032_v22 = vpop.f32.mrb[213].mxu1  ;;  %7236 = vmatpush3.bf16.msra.mxu0 %v9800_v4  ;;  %5718 = vmatprep.mubr.bf16.mxu0 %v5635_v10  ;;  %v7700_v10 = vld [vmem:[%s10351_s10 + $0x30] sm:$0xff]  }
 0x66b   : > { %v7033_v63 = vadd.f32 %v7032_v22, %v7031_v20  ;;  %5594 = vmatpush1.bf16.msra.mxu1 %v9966_v24  ;;  %7237 = vmatprep.subr.bf16.mxu0 %v9809_v28  ;;  %v7034_v13 = vpop.f32.mrb[214].mxu1 }
 0x66c   : > { %5595 = vmatprep.subr.bf16.mxu1 %v7861_v3  ;;  %v7035_v0 = vpop.f32.mrb[215].mxu1 }
 0x66d   : > { %v4352_v30 = vadd.f32 %v7033_v63, %v9891_v56 }
 0x66e   : > { %7238 = vmatpush3.bf16.msra.mxu0 %v9816_v12 }
 0x66f   : > { %v9982_v57 = vadd.f32 %v9615_v33, %v4352_v30  ;;  %5596 = vmatpush1.bf16.msra.mxu1 %v9976_v18  ;;  %7239 = vmatprep.subr.bf16.mxu0 %v9823_v27  ;;  %v9998_v33 = vld [vmem:[%s10338_s8 + $0x51c] sm:$0xff]  }
 0x670   : > { %5597 = vmatprep.subr.bf16.mxu1 %v7861_v3  ;;  %v7691_v27 = vld [vmem:[%s10338_s8 + $0x53c] sm:$0xff]  }
 0x672   : > { %7240 = vmatpush3.bf16.msra.mxu0 %v9830_v58  ;;  %v10347_v58 = vshrl.u32 %v8505_v1, 16 }
 0x673   : > { %5598 = vmatpush1.bf16.msra.mxu1 %v9989_v7  ;;  %7241 = vmatprep.subr.bf16.mxu0 %v9837_v19 }
 0x674   : > { %5599 = vmatprep.subr.bf16.mxu1 %v7861_v3  ;;  %v5634_v19 = vrot.slane %v10347_v58, 1 }
 0x676   : > { %7242 = vmatpush3.bf16.msra.mxu0 %v9844_v31  ;;  %v10348_v31 = vmov 0.0  }
 0x677   : > { %5600 = vmatpush1.bf16.msra.mxu1 %v9998_v33  ;;  %7243 = vmatprep.subr.bf16.mxu0 %v9851_v41 }
 0x678   : > { %5601 = vmatprep.subr.bf16.mxu1 %v7861_v3 }
 0x67a   : > { %7244 = vmatpush3.bf16.msra.mxu0 %v9859_v59  ;;  %v7693_v59 = vld [vmem:[%s10338_s8 + $0x54c] ss:$0 sps:$4 sm:$0x33]  }
 0x67b   : > { %5602 = vmatpush1.bf16.msra.mxu1 %v10007_v23  ;;  %7245 = vmatprep.subr.bf16.mxu0 %v9866_v25  ;;  %v5509_v54 = vsel %vm812_vm0, %v7693_v59, 0 }
 0x67c   : > { %v7075_v16 = vpop.f32.mrb[232].mxu0  ;;  %5603 = vmatprep.subr.bf16.mxu1 %v7861_v3 }
 0x67d   : > { %v7076_v48 = vpop.f32.mrb[233].mxu0 }
 0x67e   : > { %v7077_v44 = vadd.f32 %v7076_v48, %v7075_v16  ;;  %7246 = vmatpush3.bf16.msra.mxu0 %v9874_v46  ;;  %v7078_v2 = vpop.f32.mrb[234].mxu0 }
 0x67f   : > { %5604 = vmatpush1.bf16.msra.mxu1 %v10016_v17  ;;  %7247 = vmatprep.subr.bf16.mxu0 %v9881_v49  ;;  %v7079_v4 = vpop.f32.mrb[235].mxu0  ;;  %v10349_v49 = vshrl.u32 %v9070_v39, 16 }
 0x680   : > { %v4493_v28 = vadd.f32 %v7077_v44, %v9939_v61  ;;  %5605 = vmatprep.subr.bf16.mxu1 %v7861_v3 }
 0x681   : > { %v5243_v62 = vrot.slane %v10349_v49, 1 }
 0x682   : > { %v10030_v12 = vadd.f32 %v9778_v21, %v4493_v28  ;;  %7248 = vmatpush3.bf16.msra.mxu0 %v9889_v29  ;;  %v7692_v21 = vld [vmem:[%s10338_s8 + $0x544] sm:$0xff]   ;;  %v10350_v29 = vshrl.u32 %v8474_v36, 16 }
 0x683   : > { %5606 = vmatpush1.bf16.msra.mxu1 %v10025_v32  ;;  %7249 = vmatprep.subr.bf16.mxu0 %v9898_v6 }
 0x684   : > { %5607 = vmatprep.subr.bf16.mxu1 %v7861_v3  ;;  %v5637_v56 = vrot.slane %v10350_v29, 1 }
 0x686   : > { %7250 = vmatpush3.bf16.msra.mxu0 %v9905_v53 }
 0x687   : > { %5608 = vmatpush1.bf16.msra.mxu1 %v7691_v27  ;;  %7303 = vmatprep.subr.bf16.mxu0 %v10348_v31 }
 0x688   : > { %v3256_v41 = vpop.xlane.xlu1 %3255  ;;  %5609 = vmatprep.subr.bf16.mxu1 %v7861_v3 }
 0x689   : > { %v3257_v25 = vrot.slane %v3256_v41, 4  ;;  %5719 = vmatmul.mubr.bf16.vlgmr.msra.gmra.mrb[4].mxu0 %v5634_v19 }
 0x68a   : > { %7319 = vmatprep.mubr.msk.bf16.mxu0 %vm7863_vm6, %v10348_v31  ;;  %7304 = vmatpush3.bf16.msra.mxu0 %v7694_v55 }
 0x68b   : > { %v3258_v1 = vadd.f32 %v3257_v25, %v3256_v41  ;;  %5610 = vmatpush1.bf16.msra.mxu1 %v7692_v21  ;;  %7305 = vmatprep.subr.bf16.mxu0 %v10348_v31 }
 0x68c   : > { %5611 = vmatprep.subr.bf16.mxu1 %v7861_v3 }
 0x68d   : > { %v3259_v46 = vrot.slane %v3258_v1, 2 }
 0x68e   : > { %7306 = vmatpush3.bf16.msra.mxu0 %v7695_v34 }
 0x68f   : > { %5612 = vmatpush1.bf16.msra.mxu1 %v5509_v54  ;;  %v3260_v38 = vadd.f32 %v3259_v46, %v3258_v1  ;;  %7307 = vmatprep.subr.bf16.mxu0 %v10348_v31 }
 0x690   : > { %5726 = vmatprep.subr.bf16.mxu1 %v7861_v3 }
 0x691   : > { %v3261_v40 = vrot.slane %v3260_v38, 1 }
 0x692   : > { %5624 = vmatmul.mubr.bf16.vlgmr.msra.gmra.mrb[204].mxu1 %v5243_v62  ;;  %7308 = vmatpush3.bf16.msra.mxu0 %v7696_v5 }
 0x693   : > { %5727 = vmatpush1.bf16.msra.mxu1 %v9951_v60  ;;  %v3262_v6 = vadd.f32 %v3261_v40, %v3260_v38  ;;  %6842 = vmatprep.mubr.msk.bf16.mxu1 %vm3658_vm7, %v5637_v56  ;;  %v7698_v60 = vld [vmem:[%s10351_s10 + $0x20] sm:$0xff]  }
 0x694   : > { %5728 = vmatprep.subr.bf16.mxu1 %v7861_v3  ;;  %7309 = vmatprep.subr.bf16.mxu0 %v10348_v31  ;;  %v625_v40 = vld [vmem:[%s10292_s12] sm:$0xf] }
 0x695   : > { %7434 = vpush %v3262_v6 }
 0x696   : > { %7310 = vmatpush3.bf16.msra.mxu0 %v7697_v42 }
 0x697   : > { %5729 = vmatpush1.bf16.msra.mxu1 %v9966_v24  ;;  %7311 = vmatprep.subr.bf16.mxu0 %v10348_v31  ;;  %v7701_v24 = vld [vmem:[%s10351_s10 + $0x38] sm:$0xff]  }
 0x698   : > { %5730 = vmatprep.subr.bf16.mxu1 %v7861_v3 }
 0x69a   : > { %7312 = vmatpush3.bf16.msra.mxu0 %v7698_v60 }
 0x69b   : > { %5731 = vmatpush1.bf16.msra.mxu1 %v9976_v18  ;;  %7313 = vmatprep.subr.bf16.mxu0 %v10348_v31 }
 0x69c   : > { %5732 = vmatprep.subr.bf16.mxu1 %v7861_v3  ;;  %v7097_v36 = vpop.f32.mrb[236].mxu0 }
 0x69d   : > { %v7098_v39 = vpop.f32.mrb[237].mxu0 }
 0x69e   : > { %v7099_v50 = vadd.f32 %v7098_v39, %v7097_v36  ;;  %v7100_v53 = vpop.f32.mrb[238].mxu0  ;;  %7314 = vmatpush3.bf16.msra.mxu0 %v7699_v35 }
 0x69f   : > { %5733 = vmatpush1.bf16.msra.mxu1 %v9989_v7  ;;  %v7101_v51 = vpop.f32.mrb[239].mxu0  ;;  %7315 = vmatprep.subr.bf16.mxu0 %v10348_v31  ;;  %v649_v53 = vld [vmem:[%s539_s16] sm:$0x1] }
 0x6a0   : > { %5734 = vmatprep.subr.bf16.mxu1 %v7861_v3 }
 0x6a2   : > { %7316 = vmatpush3.bf16.msra.mxu0 %v7700_v10 }
 0x6a3   : > { %5735 = vmatpush1.bf16.msra.mxu1 %v9998_v33  ;;  %7317 = vmatprep.subr.bf16.mxu0 %v10348_v31 }
 0x6a4   : > { %5736 = vmatprep.subr.bf16.mxu1 %v7861_v3 }
 0x6a6   : > { %7318 = vmatpush3.bf16.msra.mxu0 %v7701_v24 }
 0x6a7   : > { %5737 = vmatpush1.bf16.msra.mxu1 %v10007_v23  ;;  %7343 = vmatprep.subr.bf16.mxu0 %v10348_v31 }
 0x6a8   : > { %5738 = vmatprep.subr.bf16.mxu1 %v7861_v3 }
 0x6ab   : > { %5739 = vmatpush1.bf16.msra.mxu1 %v10016_v17 }
 0x6ac   : > { %5740 = vmatprep.subr.bf16.mxu1 %v7861_v3 }
 0x6af   : > { %5741 = vmatpush1.bf16.msra.mxu1 %v10025_v32 }
 0x6b0   : > { %5742 = vmatprep.subr.bf16.mxu1 %v7861_v3 }
 0x6b3   : > { %5743 = vmatpush1.bf16.msra.mxu1 %v7691_v27 }
 0x6b4   : > { %5744 = vmatprep.subr.bf16.mxu1 %v7861_v3 }
 0x6b7   : > { %5745 = vmatpush1.bf16.msra.mxu1 %v7692_v21 }
 0x6b8   : > { %5746 = vmatprep.subr.bf16.mxu1 %v7861_v3 }
 0x6bb   : > { %5747 = vmatpush1.bf16.msra.mxu1 %v5509_v54 }
 0x6bc   : > { %v7119_v45 = vpop.f32.mrb[240].mxu0  ;;  %7323 = vmatprep.subr.bf16.mxu1 %v10348_v31 }
 0x6bd   : > { %v7120_v61 = vpop.f32.mrb[241].mxu0 }
 0x6be   : > { %v7121_v37 = vadd.f32 %v7120_v61, %v7119_v45  ;;  %5759 = vmatmul.mubr.bf16.vlgmr.msra.gmra.mrb[208].mxu1 %v5636_v14  ;;  %v7122_v9 = vpop.f32.mrb[242].mxu0 }
 0x6bf   : > { %v7123_v11 = vpop.f32.mrb[243].mxu0  ;;  %7324 = vmatpush3.bf16.msra.mxu1 %v7694_v55  ;;  %7339 = vmatprep.mubr.msk.bf16.mxu1 %vm7863_vm6, %v10348_v31  ;;  %v7702_v9 = vld [vmem:[%s10293_s13] sm:$0xff]  }
 0x6c0   : > { %v4972_v3 = vadd.f32 %v7121_v37, %v7099_v50  ;;  %7325 = vmatprep.subr.bf16.mxu1 %v10348_v31  ;;  %v5957_v50 = vsel %vm3269_vm5, %v625_v40, 0  ;;  %v7795_v37 = vld [vmem:[%s8005_s25] sm:$0x1]  ;;  %v7704_v11 = vld [vmem:[%s10293_s13 + $0x10] sm:$0xff]   ;;  %s7864_s25 = smov 0.0  }
 0x6c2   : > { %v7399_v26 = vadd.f32 %v9982_v57, %v4972_v3  ;;  %v7705_v3 = vld [vmem:[%s10293_s13 + $0x18] sm:$0xff]  }
 0x6c3   : > { %7326 = vmatpush3.bf16.msra.mxu1 %v7695_v34 }
 0x6c4   : > { %7327 = vmatprep.subr.bf16.mxu1 %v10348_v31 }
 0x6c6   : > { %s10191_s17 = spop %7434 }
 0x6c7   : > { %7328 = vmatpush3.bf16.msra.mxu1 %v7696_v5 }
 0x6c8   : > { %7329 = vmatprep.subr.bf16.mxu1 %v10348_v31 }
 0x6cb   : > { %7330 = vmatpush3.bf16.msra.mxu1 %v7697_v42  ;;  %v7703_v42 = vld [vmem:[%s10293_s13 + $0x8] sm:$0xff]  }
 0x6cc   : > { %7331 = vmatprep.subr.bf16.mxu1 %v10348_v31 }
 0x6cf   : > { %7332 = vmatpush3.bf16.msra.mxu1 %v7698_v60  ;;  %v7708_v60 = vld [vmem:[%s10293_s13 + $0x30] sm:$0xff]  }
 0x6d0   : > { %7333 = vmatprep.subr.bf16.mxu1 %v10348_v31 }
 0x6d3   : > { %7334 = vmatpush3.bf16.msra.mxu1 %v7699_v35 }
 0x6d4   : > { %7335 = vmatprep.subr.bf16.mxu1 %v10348_v31 }
 0x6d7   : > { %7336 = vmatpush3.bf16.msra.mxu1 %v7700_v10 }
 0x6d8   : > { %7337 = vmatprep.subr.bf16.mxu1 %v10348_v31 }
 0x6db   : > { %7338 = vmatpush3.bf16.msra.mxu1 %v7701_v24 }
 0x6dc   : > { %v7141_v8 = vpop.f32.mrb[244].mxu0  ;;  %7369 = vmatprep.subr.bf16.mxu1 %v10348_v31 }
 0x6dd   : > { %v7142_v52 = vpop.f32.mrb[245].mxu0 }
 0x6de   : > { %v7143_v47 = vadd.f32 %v7142_v52, %v7141_v8  ;;  %v7144_v43 = vpop.f32.mrb[246].mxu0  ;;  %v7707_v8 = vld [vmem:[%s10293_s13 + $0x28] sm:$0xff]   ;;  %v7709_v52 = vld [vmem:[%s10293_s13 + $0x38] sm:$0xff]  }
 0x6df   : > { %v7145_v15 = vpop.f32.mrb[247].mxu0 }
 0x6fc   : > { %v7185_v20 = vpop.f32.mrb[248].mxu0 }
 0x6fd   : > { %v7186_v22 = vpop.f32.mrb[249].mxu0 }
 0x6fe   : > { %v7187_v63 = vadd.f32 %v7186_v22, %v7185_v20  ;;  %v7188_v18 = vpop.f32.mrb[250].mxu0 }
 0x6ff   : > { %v7189_v13 = vpop.f32.mrb[251].mxu0 }
 0x70d   : > { %v7163_v0 = vpop.f32.mrb[216].mxu1 }
 0x70e   : > { %v7164_v30 = vpop.f32.mrb[217].mxu1 }
 0x70f   : > { %v7165_v57 = vadd.f32 %v7164_v30, %v7163_v0  ;;  %v7166_v7 = vpop.f32.mrb[218].mxu1 }
 0x710   : > { %v7167_v33 = vpop.f32.mrb[219].mxu1 }
 0x711   : > { %v5107_v23 = vadd.f32 %v7165_v57, %v7143_v47  ;;  %v623_v47 = vld [vmem:[%s10291_s11] sm:$0x1] }
 0x712   : > { %v624_v43 = vunpack.c.l.bf16 %v623_v47 }
 0x713   : > { %v7404_v17 = vadd.f32 %v10030_v12, %v5107_v23 }
 0x71c   : > { %v7207_v16 = vpop.f32.mrb[252].mxu0 }
 0x71d   : > { %v7208_v48 = vpop.f32.mrb[253].mxu0 }
 0x71e   : > { %v7209_v44 = vadd.f32 %v7208_v48, %v7207_v16  ;;  %v7210_v2 = vpop.f32.mrb[254].mxu0 }
 0x71f   : > { %v7211_v32 = vpop.f32.mrb[255].mxu0 }
 0x720   : > { %v5586_v4 = vadd.f32 %v7209_v44, %v7187_v63 }
 0x722   : > { %v7400_v28 = vadd.f32 %v7399_v26, %v5586_v4  ;;  %v7706_v26 = vld [vmem:[%s10293_s13 + $0x20] sm:$0xff]  }
 0x73c   : > { %v7229_v27 = vpop.f32.mrb[0].mxu0 }
 0x73d   : > { %v7230_v58 = vpop.f32.mrb[1].mxu0 }
 0x73e   : > { %v7231_v19 = vadd.f32 %v7230_v58, %v7229_v27  ;;  %v7232_v21 = vpop.f32.mrb[2].mxu0 }
 0x73f   : > { %v7233_v41 = vpop.f32.mrb[3].mxu0 }
 0x75c   : > { %v7251_v59 = vpop.f32.mrb[4].mxu0 }
 0x75d   : > { %v7252_v25 = vpop.f32.mrb[5].mxu0 }
 0x75e   : > { %v7253_v1 = vadd.f32 %v7252_v25, %v7251_v59  ;;  %v7254_v54 = vpop.f32.mrb[6].mxu0 }
 0x75f   : > { %v7255_v46 = vpop.f32.mrb[7].mxu0 }
 0x760   : > { %v5721_v49 = vadd.f32 %v7253_v1, %v7231_v19 }
 0x762   : > { %v7405_v12 = vadd.f32 %v7404_v17, %v5721_v49 }
 0x765   : > { %v5625_v62 = vpop.f32.mrb[204].mxu1 }
 0x766   : > { %v7401_v38 = vadd.f32 %v7400_v28, %v5625_v62  ;;  %v5627_v29 = vpop.f32.mrb[205].mxu1 }
 0x767   : > { %v5628_v56 = vpop.f32.mrb[206].mxu1 }
 0x768   : > { %v5767_v6 = vmax.f32 %v7401_v38, 0.0  ;;  %v5629_v36 = vpop.f32.mrb[207].mxu1 }
 0x76a   : > { %v5768_v39 = vpack.c.bf16 %v5767_v6, %v5767_v6 }
 0x76c   : > { %7320 = vmatmul.mubr.bf16.vlgmr.msra.gmra.mrb[8].mxu0 %v5768_v39 }
 0x76d   : > { %7344 = vmatpush3.bf16.msra.mxu0 %v5957_v50  ;;  %7345 = vmatprep.mubr.msk.bf16.mxu0 %vm7863_vm6, %v10348_v31 }
 0x76e   : > { %7349 = vmatprep.subr.bf16.mxu0 %v10348_v31 }
 0x774   : > { %7346 = vmatmul.mubr.msk.bf16.vlgmr.msra.gmra.mrb[12].mxu0 %vm671_vm2, %v649_v53 }
 0x775   : > { %7365 = vmatprep.mubr.msk.bf16.mxu0 %vm7863_vm6, %v10348_v31  ;;  %7350 = vmatpush3.bf16.msra.mxu0 %v7702_v9 }
 0x776   : > { %7351 = vmatprep.subr.bf16.mxu0 %v10348_v31 }
 0x779   : > { %7352 = vmatpush3.bf16.msra.mxu0 %v7703_v42 }
 0x77a   : > { %7353 = vmatprep.subr.bf16.mxu0 %v10348_v31 }
 0x77d   : > { %7354 = vmatpush3.bf16.msra.mxu0 %v7704_v11 }
 0x77e   : > { %7355 = vmatprep.subr.bf16.mxu0 %v10348_v31 }
 0x781   : > { %7356 = vmatpush3.bf16.msra.mxu0 %v7705_v3 }
 0x782   : > { %7357 = vmatprep.subr.bf16.mxu0 %v10348_v31 }
 0x785   : > { %7358 = vmatpush3.bf16.msra.mxu0 %v7706_v26 }
 0x786   : > { %7359 = vmatprep.subr.bf16.mxu0 %v10348_v31 }
 0x789   : > { %7360 = vmatpush3.bf16.msra.mxu0 %v7707_v8 }
 0x78a   : > { %7361 = vmatprep.subr.bf16.mxu0 %v10348_v31 }
 0x78d   : > { %7362 = vmatpush3.bf16.msra.mxu0 %v7708_v60 }
 0x78e   : > { %7363 = vmatprep.subr.bf16.mxu0 %v10348_v31 }
 0x791   : > { %v5760_v51 = vpop.f32.mrb[208].mxu1  ;;  %7364 = vmatpush3.bf16.msra.mxu0 %v7709_v52 }
 0x792   : > { %v7406_v55 = vadd.f32 %v7405_v12, %v5760_v51  ;;  %v5762_v34 = vpop.f32.mrb[209].mxu1  ;;  %v642_v12 = vld [vmem:[%s10294_s14] sm:$0x1] }
 0x793   : > { %v5763_v5 = vpop.f32.mrb[210].mxu1  ;;  %v643_v62 = vunpack.c.l.bf16 %v642_v12 }
 0x794   : > { %v5883_v14 = vmax.f32 %v7406_v55, 0.0  ;;  %v5764_v45 = vpop.f32.mrb[211].mxu1 }
 0x796   : > { %v5884_v61 = vpack.c.bf16 %v5883_v14, %v5883_v14 }
 0x798   : > { %7340 = vmatmul.mubr.bf16.vlgmr.msra.gmra.mrb[220].mxu1 %v5884_v61 }
 0x799   : > { %7370 = vmatpush3.bf16.msra.mxu1 %v5957_v50  ;;  %7371 = vmatprep.mubr.msk.bf16.mxu1 %vm7863_vm6, %v10348_v31 }
 0x79a   : > { %7375 = vmatprep.subr.bf16.mxu1 %v10348_v31 }
 0x7a0   : > { %7372 = vmatmul.mubr.msk.bf16.vlgmr.msra.gmra.mrb[224].mxu1 %vm671_vm2, %v7795_v37 }
 0x7a1   : > { %7391 = vmatprep.mubr.msk.bf16.mxu1 %vm7863_vm6, %v10348_v31  ;;  %7376 = vmatpush3.bf16.msra.mxu1 %v7702_v9 }
 0x7a2   : > { %7377 = vmatprep.subr.bf16.mxu1 %v10348_v31 }
 0x7a5   : > { %7378 = vmatpush3.bf16.msra.mxu1 %v7703_v42 }
 0x7a6   : > { %7379 = vmatprep.subr.bf16.mxu1 %v10348_v31 }
 0x7a9   : > { %7380 = vmatpush3.bf16.msra.mxu1 %v7704_v11 }
 0x7aa   : > { %7381 = vmatprep.subr.bf16.mxu1 %v10348_v31 }
 0x7ad   : > { %7382 = vmatpush3.bf16.msra.mxu1 %v7705_v3 }
 0x7ae   : > { %7383 = vmatprep.subr.bf16.mxu1 %v10348_v31 }
 0x7b1   : > { %7384 = vmatpush3.bf16.msra.mxu1 %v7706_v26 }
 0x7b2   : > { %7385 = vmatprep.subr.bf16.mxu1 %v10348_v31 }
 0x7b5   : > { %7386 = vmatpush3.bf16.msra.mxu1 %v7707_v8 }
 0x7b6   : > { %7387 = vmatprep.subr.bf16.mxu1 %v10348_v31 }
 0x7b9   : > { %7388 = vmatpush3.bf16.msra.mxu1 %v7708_v60 }
 0x7ba   : > { %7389 = vmatprep.subr.bf16.mxu1 %v10348_v31 }
 0x7bd   : > { %7390 = vmatpush3.bf16.msra.mxu1 %v7709_v52 }
 0x83f   : > { %v5851_v15 = vpop.f32.mrb[8].mxu0 }
 0x840   : > { %v5857_v35 = vmax.f32 %v5851_v15, 0.0  ;;  %v7321_v10 = vpop.f32.mrb[9].mxu0 }
 0x841   : > { %v5854_v24 = vpop.f32.mrb[10].mxu0 }
 0x842   : > { %v7322_v20 = vpop.f32.mrb[11].mxu0  ;;  %v5858_v22 = vmul.f32 %v5857_v35, %v624_v43 }
 0x844   : > { %v5859_v63 = vsel %vm2028_vm3, %v5858_v22, 0.0 }
 0x845   : > { %5860 = vadd.xlane.f32.xlu0 %v5859_v63 }
 0x847   : > { %v5993_v31 = vpop.f32.mrb[12].mxu0 }
 0x848   : > { %v5999_v18 = vmax.f32 %v5993_v31, 0.0  ;;  %v7347_v13 = vpop.f32.mrb[13].mxu0 }
 0x849   : > { %v5996_v0 = vpop.f32.mrb[14].mxu0 }
 0x84a   : > { %v6000_v30 = vpack.c.bf16 %v5999_v18, %v5999_v18  ;;  %v7348_v57 = vpop.f32.mrb[15].mxu0 }
 0x84c   : > { %7366 = vmatmul.mubr.bf16.vlgmr.msra.gmra.mrb[16].mxu0 %v6000_v30 }
 0x86b   : > { %v5919_v7 = vpop.f32.mrb[220].mxu1 }
 0x86c   : > { %v5925_v33 = vmax.f32 %v5919_v7, 0.0  ;;  %v7341_v23 = vpop.f32.mrb[221].mxu1 }
 0x86d   : > { %v5922_v17 = vpop.f32.mrb[222].mxu1 }
 0x86e   : > { %v7342_v16 = vpop.f32.mrb[223].mxu1  ;;  %v5926_v48 = vmul.f32 %v5925_v33, %v624_v43 }
 0x870   : > { %v5927_v44 = vsel %vm2028_vm3, %v5926_v48, 0.0 }
 0x871   : > { %5928 = vadd.xlane.f32.xlu1 %v5927_v44 }
 0x873   : > { %v6135_v2 = vpop.f32.mrb[224].mxu1 }
 0x874   : > { %v6141_v32 = vmax.f32 %v6135_v2, 0.0  ;;  %v7373_v4 = vpop.f32.mrb[225].mxu1 }
 0x875   : > { %v6138_v28 = vpop.f32.mrb[226].mxu1 }
 0x876   : > { %v6142_v27 = vpack.c.bf16 %v6141_v32, %v6141_v32  ;;  %v7374_v58 = vpop.f32.mrb[227].mxu1 }
 0x878   : > { %7392 = vmatmul.mubr.bf16.vlgmr.msra.gmra.mrb[228].mxu1 %v6142_v27 }
 0x8d2   : > { %v5861_v19 = vpop.xlane.xlu0 %5860 }
 0x8d3   : > { %v5862_v21 = vrot.slane %v5861_v19, 4 }
 0x8d5   : > { %v5863_v41 = vadd.f32 %v5862_v21, %v5861_v19 }
 0x8d7   : > { %v5864_v59 = vrot.slane %v5863_v41, 2 }
 0x8d9   : > { %v5865_v25 = vadd.f32 %v5864_v59, %v5863_v41 }
 0x8db   : > { %v5866_v1 = vrot.slane %v5865_v25, 1 }
 0x8dd   : > { %v5867_v54 = vadd.f32 %v5866_v1, %v5865_v25 }
 0x8df   : > { %7436 = vpush %v5867_v54 }
 0x8fe   : > { %v5929_v5 = vpop.xlane.xlu1 %5928 }
 0x8ff   : > { %v5930_v37 = vrot.slane %v5929_v5, 4 }
 0x901   : > { %v5931_v9 = vadd.f32 %v5930_v37, %v5929_v5 }
 0x903   : > { %v5932_v11 = vrot.slane %v5931_v9, 2 }
 0x905   : > { %v5933_v3 = vadd.f32 %v5932_v11, %v5931_v9 }
 0x907   : > { %v5934_v26 = vrot.slane %v5933_v3, 1 }
 0x909   : > { %v5935_v52 = vadd.f32 %v5934_v26, %v5933_v3 }
 0x910   : > { %s10193_s20 = spop %7436 }
 0x911   : > { %s5869_s0 = ssub.f32 0.0, %s10193_s20 }
 0x913   : > { %s5871_s2 = sand.u32 2147483647, %s5869_s0  ;;  %s10206_s26 = smax.f32 %s7864_s25, %s5869_s0 }
 0x914   : > { %s5872_s16 = ssub.f32 0.0, %s5871_s2 }
 0x916   : > { %v5873_v46 = vstv %s5872_s16 }
 0x917   : > { %v5874_v49 = vmul.f32 1.442695, %v5873_v46 }
 0x919   : > { %7758 = vpow2.f32 %v5874_v49 }
 0x91f   : > { %v6083_v38 = vpop.f32.mrb[16].mxu0 }
 0x920   : > { %v6089_v29 = vmax.f32 %v6083_v38, 0.0  ;;  %v7367_v56 = vpop.f32.mrb[17].mxu0 }
 0x921   : > { %v6086_v40 = vpop.f32.mrb[18].mxu0 }
 0x922   : > { %v6090_v6 = vmul.f32 %v6089_v29, %v643_v62  ;;  %v7368_v36 = vpop.f32.mrb[19].mxu0 }
 0x923   : > { %v7759_v39 = vpop.eup %7758 }
 0x924   : > { %7438 = vpush %v7759_v39  ;;  %v6091_v50 = vsel %vm2028_vm3, %v6090_v6, 0.0 }
 0x925   : > { %6092 = vadd.xlane.f32.xlu0 %v6091_v50 }
 0x94b   : > { %v6177_v53 = vpop.f32.mrb[228].mxu1 }
 0x94c   : > { %v6183_v51 = vmax.f32 %v6177_v53, 0.0  ;;  %v7393_v55 = vpop.f32.mrb[229].mxu1 }
 0x94d   : > { %v6180_v34 = vpop.f32.mrb[230].mxu1 }
 0x94e   : > { %v6184_v14 = vmul.f32 %v6183_v51, %v643_v62  ;;  %v7394_v45 = vpop.f32.mrb[231].mxu1 }
 0x950   : > { %v6185_v61 = vsel %vm2028_vm3, %v6184_v14, 0.0 }
 0x951   : > { %6186 = vadd.xlane.f32.xlu1 %v6185_v61 }
 0x955   : > { %s7439_s24 = spop %7438 }
 0x956   : > { %s5877_s23 = sadd.f32 1.0, %s7439_s24 }
 0x958   : > { %v5878_v42 = vstv %s5877_s23 }
 0x959   : > { %7760 = vlog2.f32 %v5878_v42 }
 0x963   : > { %v7761_v8 = vpop.eup %7760 }
 0x964   : > { %v5880_v60 = vmul.f32 0.6931472, %v7761_v8 }
 0x966   : > { %7440 = vpush %v5880_v60 }
 0x967   : > { %7442 = vpush %v5935_v52 }
 0x997   : > { %s10208_s2 = spop %7440 }
 0x998   : > { %s10212_s30 = spop %7442  ;;  %s10353_s4 = sadd.f32 %s10208_s2, %s10206_s26 }
 0x999   : > { %s5937_s1 = ssub.f32 0.0, %s10212_s30 }
 0x99b   : > { %s5939_s24 = sand.u32 2147483647, %s5937_s1 }
 0x99c   : > { %s5940_s23 = ssub.f32 0.0, %s5939_s24 }
 0x99d   : > { %s3264_s24 = ssub.f32 %s10189_s27, %s10191_s17 }
 0x99e   : > { %v5941_v47 = vstv %s5940_s23  ;;  %s5938_s23 = smax.f32 %s7864_s25, %s5937_s1 }
 0x99f   : > { %v5942_v43 = vmul.f32 1.442695, %v5941_v47  ;;  %s6224_s6 = smul.f32 0.000739645, %s3264_s24 }
 0x9a1   : > { %7762 = vpow2.f32 %v5942_v43 }
 0x9ab   : > { %v7763_v15 = vpop.eup %7762 }
 0x9ac   : > { %7444 = vpush %v7763_v15 }
 0x9b2   : > { %v6093_v35 = vpop.xlane.xlu0 %6092 }
 0x9b3   : > { %v6094_v10 = vrot.slane %v6093_v35, 4 }
 0x9b5   : > { %v6095_v24 = vadd.f32 %v6094_v10, %v6093_v35 }
 0x9b7   : > { %v6096_v31 = vrot.slane %v6095_v24, 2 }
 0x9b9   : > { %v6097_v0 = vadd.f32 %v6096_v31, %v6095_v24 }
 0x9bb   : > { %v6098_v7 = vrot.slane %v6097_v0, 1 }
 0x9bd   : > { %v6099_v16 = vadd.f32 %v6098_v7, %v6097_v0 }
 0x9dd   : > { %s7445_s20 = spop %7444 }
 0x9de   : > { %s5945_s0 = sadd.f32 1.0, %s7445_s20  ;;  %v6187_v20 = vpop.xlane.xlu1 %6186 }
 0x9df   : > { %v6188_v22 = vrot.slane %v6187_v20, 4 }
 0x9e0   : > { %v5946_v63 = vstv %s5945_s0 }
 0x9e1   : > { %7764 = vlog2.f32 %v5946_v63  ;;  %v6189_v18 = vadd.f32 %v6188_v22, %v6187_v20 }
 0x9e3   : > { %v6190_v13 = vrot.slane %v6189_v18, 2 }
 0x9e5   : > { %v6191_v30 = vadd.f32 %v6190_v13, %v6189_v18 }
 0x9e7   : > { %v6192_v57 = vrot.slane %v6191_v30, 1 }
 0x9e9   : > { %v6193_v17 = vadd.f32 %v6192_v57, %v6191_v30 }
 0x9eb   : > { %v7765_v33 = vpop.eup %7764 }
 0x9ec   : > { %v5948_v23 = vmul.f32 0.6931472, %v7765_v33 }
 0x9ee   : > { %7446 = vpush %v5948_v23 }
 0x9ef   : > { %7448 = vpush %v6099_v16 }
 0x9f0   : > { %7450 = vpush %v6193_v17 }
 0xa1f   : > { %s7447_s20 = spop %7446 }
 0xa20   : > { %s5950_s0 = sadd.f32 %s7447_s20, %s5938_s23  ;;  %s10222_s16 = spop %7448 }
 0xa21   : > { %s6195_s3 = ssub.f32 0.0, %s10222_s16  ;;  %s7451_s27 = spop %7450 }
 0xa22   : > { %s5951_s5 = ssub.f32 %s10353_s4, %s5950_s0  ;;  %s6210_s17 = sand.u32 2147483647, %s7451_s27 }
 0xa23   : > { %s6197_s7 = sand.u32 2147483647, %s6195_s3  ;;  %s6211_s30 = ssub.f32 0.0, %s6210_s17 }
 0xa24   : > { %s6225_s8 = smul.f32 0.25, %s5951_s5  ;;  %s6198_s9 = ssub.f32 0.0, %s6197_s7 }
 0xa25   : > { %v6212_v32 = vstv %s6211_s30  ;;  %s6196_s4 = smax.f32 %s7864_s25, %s6195_s3  ;;  %s6209_s26 = smax.f32 %s7864_s25, %s7451_s27 }
 0xa26   : > { %s10228_s10 = sadd.f32 %s6225_s8, %s6224_s6  ;;  %v6199_v48 = vstv %s6198_s9  ;;  %v6213_v4 = vmul.f32 1.442695, %v6212_v32  ;;  %s522_s9 = sand.u32 1, %s7850_s19  }
 0xa27   : > { %v6200_v44 = vmul.f32 1.442695, %v6199_v48  ;;  %s6861_s20 = sshll.u32 %s7967_s22, 4  ;;  %s523_s3 = scalar_lea.vmem [#allocation2], %s522_s9 }
 0xa28   : > { %s6244_s17 = sshll.u32 %s523_s3, 4  ;;  %s6232_s25 = scalar_lea.sflag [#allocation3], %s522_s9  ;;  %s10240_s17 = int_to_ptr.vmem [resolvable:$true] %s6244_s17 }
 0xa29   : > { %7766 = vpow2.f32 %v6200_v44  ;;  %s7796_s27 = scalar_lea.vmem %s10240_s17, 16  ;;  %s7865_s22 = smov [#allocation2]  }
 0xa2a   : > { %p7797_p11 = scmp.ne.s32.totalorder %s10240_s17, %s7796_s27 }
 0xa2c   : > { %p7798_p12 = pnand %p7797_p11, %p7984_p5 }
 0xa2e   : > { %p7799_p13 = pneg %p7798_p12 }
 0xa33   : > { %v7767_v2 = vpop.eup %7766 }
 0xa34   : > { %7452 = vpush %v7767_v2 }
 0xa65   : > { %s7453_s1 = spop %7452 }
 0xa66   : > { %s6203_s23 = sadd.f32 1.0, %s7453_s1 }
 0xa68   : > { %v6204_v28 = vstv %s6203_s23 }
 0xa69   : > { %7768 = vlog2.f32 %v6204_v28 }
 0xa6a   : > { %7770 = vpow2.f32 %v6213_v4 }
 0xa73   : > { %v7769_v27 = vpop.eup %7768 }
 0xa74   : > { %v6206_v58 = vmul.f32 0.6931472, %v7769_v27  ;;  %v7771_v19 = vpop.eup %7770 }
 0xa76   : > { %7454 = vpush %v6206_v58 }
 0xa77   : > { %7456 = vpush %v7771_v19 }
 0xaa7   : > { %s7455_s5 = spop %7454 }
 0xaa8   : > { %s6208_s6 = sadd.f32 %s7455_s5, %s6196_s4  ;;  %s7457_s7 = spop %7456 }
 0xaa9   : > { %s6216_s8 = sadd.f32 1.0, %s7457_s7  ;;  %s10238_s4 = scalar_lea.hbm %s10295_s15, %s6861_s20 }
 0xaab   : > { %v6217_v21 = vstv %s6216_s8 }
 0xaac   : > { %7772 = vlog2.f32 %v6217_v21 }
 0xab6   : > { %v7773_v41 = vpop.eup %7772 }
 0xab7   : > { %v6219_v59 = vmul.f32 0.6931472, %v7773_v41 }
 0xab9   : > { %7458 = vpush %v6219_v59 }
 0xaea   : > { %s7459_s2 = spop %7458 }
 0xaeb   : > { %s6221_s16 = sadd.f32 %s7459_s2, %s6209_s26 }
 0xaed   : > { %s6222_s24 = sadd.f32 %s6221_s16, %s6208_s6 }
 0xaef   : > { %s6227_s0 = smul.f32 0.05, %s6222_s24 }
 0xaf1   : > { %s6228_s30 = sadd.f32 %s6227_s0, %s10228_s10  ;;  %s7800_s10 = sshll.u32 %s7865_s22, 4  ;;  %s7801_s10 = int_to_ptr.vmem [resolvable:$false] %s7800_s10 }
 0xaf2   : > { %s7802_s5 = scalar_lea.vmem %s7801_s10, 32  ;;  %p7803_p0 = scmp.lt.s32.totalorder %s10240_s17, %s7801_s10 }
 0xaf3   : > { %v6229_v25 = vstv %s6228_s30  ;;  %p7804_p1 = scmp.lt.s32.totalorder %s7802_s5, %s7796_s27 }
 0xaf4   : > { %6230 = vst [vmem:[%s523_s3] sm:$0x1] %v6229_v25 }
 0xaf5   : > { %p7805_p2 = por %p7804_p1, %p7803_p0 }
 0xaf7   : > { %p7806_p3 = pnand %p7805_p2, %p7799_p13 }
 0xaf9   : > { %7809 = shalt.err (!%p7806_p3)
}
 0xafa   : > { %s7810_s6 = scalar_lea.hbm %s10238_s4, 16  ;;  %s7814_s9 = scalar_lea.hbm %s10295_s15, 32 }
 0xafb   : > { %p7811_p4 = scmp.ne.s32.totalorder %s10238_s4, %s7810_s6  ;;  %p7815_p9 = scmp.lt.u32.totalorder %s10238_s4, %s10295_s15 }
 0xafc   : > { %p7816_p10 = scmp.lt.u32.totalorder %s7814_s9, %s7810_s6  ;;  %p7818_p12 = scmp.lt.u32.totalorder %s7810_s6, %s10238_s4 }
 0xafd   : > { %p7812_p7 = pnand %p7811_p4, %p7984_p5 }
 0xafe   : > { %p7817_p11 = por %p7816_p10, %p7815_p9 }
 0xaff   : > { %p7813_p8 = pneg %p7812_p7 }
 0xb00   : > { %p7819_p13 = por %p7818_p12, %p7817_p11 }
 0xb02   : > { %p7820_p0 = pnand %p7819_p13, %p7813_p8 }
 0xb04   : > { %7823 = shalt.err (!%p7820_p0)
}
 0xb05   : > { %7460 = dma.vmem_to_hbm [thread:$0]  (%p7984_p5), %s10240_s17, 16, %s10238_s4, %s6232_s25  }
 0xb06 PF: > { %p7466_p1 = scmp.ge.s32.totalorder %s7858_s21, 2  ;;  %s6256_s16 = sand.u32 1, %s7846_s18  }
 0xb07   : > { %s6257_s24 = scalar_lea.sflag [#allocation3], %s6256_s16 }
 0xb08   : > { %p7463_p2 = pnand %p7466_p1, %p7988_p6 }
 0xb0a   : > { %7841 = dma.done.wait (!%p7463_p2), %s6257_s24, 16  }
 0xb0b   : > { %7843 = vsyncadd (!%p7463_p2), %s6257_s24, 4294967280  ;;  %s10354_s21 = sld [smem:[#allocation6_spill]]  ;;  %s10355_s20 = sld [smem:[#allocation5_spill]] }
 0xb0c   : > { %s10356_s0 = sld [smem:[#allocation7_spill]]  ;;  %s10357_s18 = smov %s7850_s19 }
 0xb11   : > { %p25_p3 = scmp.ge.s32.totalorder %s10354_s21, 4   ;;  %s10358_s19 = smov %s10355_s20 }
 0xb12   : > { %s10359_s20 = smov %s10356_s0 }
 0xb13   :  { %27 = sbr.rel (!%p25_p3) target bundleno = 15 (0xf), region = 127 }
 0xb1a   :  { %6261 = vsyncpa [#allocation3], 1 }
 0xb1b   :  { %6263 = vsyncpa [#allocation3 + $0x1], 1 }

</bundles_post_ra>
